<compile_context>
chip_gen: v7x
topology: tpu7x:2x2x1
jax: 0.10.0
libtpu: 0.0.40
codegen_flags: <defaults>
</compile_context>

<pallas_src>
import jax
import jax.numpy as jnp
import numpy as np
from jax.experimental import pallas as pl
from jax.experimental.pallas import tpu as pltpu

EMBED_DIM = 32                 # small synthetic embed_dim
NUM_CLASSES = 3
HIDDEN = 64
OUT_HW = 224
N_BOUNDARY = OUT_HW * OUT_HW   # 50176 = 392 * 128
TN = 12544                     # boundary output tile: 50176 / 4, multiple of 128
N_STEPS = N_BOUNDARY // TN     # 4 grid steps

# packed small-heads slab layout (128 lanes): [ hidden(64) | cls(3) | bbox(4) | pad ]
SMALL_LANES = 128
CLS_OFF = HIDDEN                       # 64
BBOX_OFF = HIDDEN + NUM_CLASSES        # 67


# ---------------------------------------------------------------------------
# Fused kernel: small heads + boundary decoder tile.
#   x        [B, D]            f32
#   ws       [D, 128]          f32   (w1 | wc | wb | 0, column-packed)
#   bs       [1, 128]          f32   (b1 | bc | bb | 0)
#   w2       [64, N_BOUNDARY]  bf16  (streamed, tiled by TN)
#   b2       [1, N_BOUNDARY]   bf16  (tiled by TN)
# Outputs:
#   heads    [N_STEPS, B, 128] f32   (per-step block -> grid axis can be "parallel";
#                                     every block holds identical values, wrapper
#                                     reads block 0)
#   boundary [B, N_BOUNDARY]   bf16  (lane-dense tiles of width TN)
# ---------------------------------------------------------------------------
def _decoder_head_kernel(x_ref, ws_ref, bs_ref, w2_ref, b2_ref,
                         heads_ref, bnd_ref):
    # --- small heads: one MXU push for cls | bbox | hidden (recomputed per step,
    # ~B*32*128 MACs -> negligible; per-step output block keeps the axis "parallel").
    x = x_ref[...]                                                   # [B, D]
    small = (jnp.dot(x, ws_ref[...], preferred_element_type=jnp.float32)
             + bs_ref[...])                                          # [B, 128]
    heads_ref[0] = small                                             # lane-dense store

    h = jnp.maximum(small[:, :HIDDEN], 0.0).astype(jnp.bfloat16)     # ReLU -> [B, 64]

    # --- boundary hot path: [B,64] @ [64,TN] with bf16 operands, f32 accumulation.
    z = (jnp.dot(h, w2_ref[...], preferred_element_type=jnp.float32)
         + b2_ref[...].astype(jnp.float32))                          # [B, TN]
    # sigmoid = 1 / (1 + exp(-z)): exp + approx reciprocal both go to the EUP slot.
    sig = pl.reciprocal(1.0 + jnp.exp(-z), approx=True)
    bnd_ref[...] = sig.astype(bnd_ref.dtype)                         # bf16 store


def _decoder_head_call(x, ws, bs, w2_bf16, b2_bf16):
    B = x.shape[0]
    cost = pl.CostEstimate(
        flops=2 * B * HIDDEN * N_BOUNDARY
              + 2 * B * EMBED_DIM * SMALL_LANES * N_STEPS,
        transcendentals=2 * B * N_BOUNDARY,               # exp + reciprocal
        bytes_accessed=(HIDDEN * N_BOUNDARY * 2           # w2 (bf16) stream
                        + N_BOUNDARY * 2                  # b2 (bf16)
                        + B * N_BOUNDARY * 2              # boundary out (bf16)
                        + B * EMBED_DIM * 4               # x
                        + (EMBED_DIM + 1) * SMALL_LANES * 4
                        + N_STEPS * B * SMALL_LANES * 4), # heads out
    )
    return pl.pallas_call(
        _decoder_head_kernel,
        out_shape=(
            jax.ShapeDtypeStruct((N_STEPS, B, SMALL_LANES), jnp.float32),
            jax.ShapeDtypeStruct((B, N_BOUNDARY), jnp.bfloat16),
        ),
        grid_spec=pltpu.PrefetchScalarGridSpec(
            num_scalar_prefetch=0,
            grid=(N_STEPS,),                              # 4 steps
            in_specs=[
                pl.BlockSpec((B, EMBED_DIM), lambda j: (0, 0)),            # x (resident)
                pl.BlockSpec((EMBED_DIM, SMALL_LANES), lambda j: (0, 0)),  # ws
                pl.BlockSpec((1, SMALL_LANES), lambda j: (0, 0)),          # bs
                pl.BlockSpec((HIDDEN, TN), lambda j: (0, j)),              # w2 tile (bf16)
                pl.BlockSpec((1, TN), lambda j: (0, j)),                   # b2 tile (bf16)
            ],
            out_specs=[
                pl.BlockSpec((1, B, SMALL_LANES), lambda j: (j, 0, 0)),    # heads / step
                pl.BlockSpec((B, TN), lambda j: (0, j)),                   # boundary tile
            ],
        ),
        # No grid-invariant output blocks remain -> safe to megacore-shard (v7x).
        compiler_params=pltpu.CompilerParams(
            dimension_semantics=("parallel",)),
        cost_estimate=cost,
    )(x, ws, bs, w2_bf16, b2_bf16)


# ---------------------------------------------------------------------------
# One-time parameter preparation (do NOT run per forward call): packs the three
# tiny heads into one lane-dense weight/bias and casts the big boundary weight
# and bias to bf16 once.
# ---------------------------------------------------------------------------
def prepare_decoder_params(params):
    (wc, bc, wb, bb, w1, b1, w2, b2) = params
    D = w1.shape[0]
    ws = jnp.zeros((D, SMALL_LANES), jnp.float32)
    ws = ws.at[:, :HIDDEN].set(w1)
    ws = ws.at[:, CLS_OFF:CLS_OFF + NUM_CLASSES].set(wc)
    ws = ws.at[:, BBOX_OFF:BBOX_OFF + 4].set(wb)
    bs = jnp.zeros((1, SMALL_LANES), jnp.float32)
    bs = bs.at[:, :HIDDEN].set(b1)
    bs = bs.at[:, CLS_OFF:CLS_OFF + NUM_CLASSES].set(bc)
    bs = bs.at[:, BBOX_OFF:BBOX_OFF + 4].set(bb)
    w2_bf16 = w2.astype(jnp.bfloat16)
    b2_bf16 = b2.astype(jnp.bfloat16)
    return (ws, bs, w2_bf16, b2_bf16)


# ---------------------------------------------------------------------------
# DecoderHead forward (takes prepared params; no per-call casts or packing)
# ---------------------------------------------------------------------------
@jax.jit
def decoder_head_forward(x, prepared):
    ws, bs, w2_bf16, b2_bf16 = prepared
    heads_all, boundary_flat = _decoder_head_call(x, ws, bs, w2_bf16, b2_bf16)
    heads = heads_all[0]                                              # [B, 128]
    class_logits = heads[:, CLS_OFF:CLS_OFF + NUM_CLASSES]            # [B, 3]
    bbox_coords = heads[:, BBOX_OFF:BBOX_OFF + 4]                     # [B, 4]
    # Module contract returns NCHW [B,1,224,224]; bitcast-able reshape, ~free.
    boundary_map = boundary_flat.reshape(-1, 1, OUT_HW, OUT_HW)       # bf16
    return class_logits, bbox_coords, boundary_map


def init_params(key, embed_dim=EMBED_DIM):
    ks = jax.random.split(key, 8)
    scale = 0.05
    wc = scale * jax.random.normal(ks[0], (embed_dim, NUM_CLASSES), jnp.float32)
    bc = scale * jax.random.normal(ks[1], (1, NUM_CLASSES), jnp.float32)
    wb = scale * jax.random.normal(ks[2], (embed_dim, 4), jnp.float32)
    bb = scale * jax.random.normal(ks[3], (1, 4), jnp.float32)
    w1 = scale * jax.random.normal(ks[4], (embed_dim, HIDDEN), jnp.float32)
    b1 = scale * jax.random.normal(ks[5], (1, HIDDEN), jnp.float32)
    w2 = scale * jax.random.normal(ks[6], (HIDDEN, N_BOUNDARY), jnp.float32)
    b2 = scale * jax.random.normal(ks[7], (1, N_BOUNDARY), jnp.float32)
    return (wc, bc, wb, bb, w1, b1, w2, b2)


def _reference(x, params):
    (wc, bc, wb, bb, w1, b1, w2, b2) = params
    cls = x @ wc + bc
    bbox = x @ wb + bb
    h = jnp.maximum(x @ w1 + b1, 0.0)
    # Mirror the kernel's bf16 storage of h / w2 / b2 for the big matmul.
    h_bf = h.astype(jnp.bfloat16).astype(jnp.float32)
    w2_bf = w2.astype(jnp.bfloat16).astype(jnp.float32)
    b2_bf = b2.astype(jnp.bfloat16).astype(jnp.float32)
    bm = jax.nn.sigmoid(h_bf @ w2_bf + b2_bf).reshape(-1, 1, OUT_HW, OUT_HW)
    return cls, bbox, bm


if __name__ == "__main__":
    key = jax.random.PRNGKey(0)
    k_x, k_p = jax.random.split(key)
    B = 2
    x = jax.random.normal(k_x, (B, EMBED_DIM), jnp.float32)
    params = init_params(k_p)

    # One-time prep (outside the per-call forward): packing + bf16 casts.
    prepared = prepare_decoder_params(params)
    prepared = jax.tree_util.tree_map(jax.block_until_ready, prepared)

    cls, bbox, bmap = decoder_head_forward(x, prepared)
    jax.block_until_ready((cls, bbox, bmap))

    # sanity check against pure-JAX reference (bf16 stream + bf16 output)
    cls_r, bbox_r, bmap_r = _reference(x, params)
    assert cls.shape == (B, NUM_CLASSES)
    assert bbox.shape == (B, 4)
    assert bmap.shape == (B, 1, OUT_HW, OUT_HW)
    np.testing.assert_allclose(np.asarray(cls), np.asarray(cls_r), rtol=1e-4, atol=1e-5)
    np.testing.assert_allclose(np.asarray(bbox), np.asarray(bbox_r), rtol=1e-4, atol=1e-5)
    np.testing.assert_allclose(np.asarray(bmap, dtype=np.float32),
                               np.asarray(bmap_r, dtype=np.float32),
                               rtol=2e-2, atol=1e-2)

    print("KERNEL_OK")
</pallas_src>

<mosaic_0001>
module attributes {stable_mosaic.version = 11 : i64} {
  func.func @_decoder_head_kernel(%arg0: i32, %arg1: memref<2x32xf32, #tpu.memory_space<vmem>>, %arg2: memref<32x128xf32, #tpu.memory_space<vmem>>, %arg3: memref<1x128xf32, #tpu.memory_space<vmem>>, %arg4: memref<64x12544xbf16, #tpu.memory_space<vmem>>, %arg5: memref<1x12544xbf16, #tpu.memory_space<vmem>>, %arg6: memref<1x2x128xf32, #tpu.memory_space<vmem>>, %arg7: memref<2x12544xbf16, #tpu.memory_space<vmem>>) attributes {dimension_semantics = [#tpu.dimension_semantics<parallel>], iteration_bounds = array<i64: 4>, scalar_prefetch = 0 : i64, scratch_operands = 0 : i64, tpu.core_type = #tpu.core_type<tc>, window_params = [{pipeline_mode = #tpu.pipeline_mode<synchronous>, transform_indices = @transform_0, window_bounds = array<i64: 2, 32>}, {pipeline_mode = #tpu.pipeline_mode<synchronous>, transform_indices = @transform_1, window_bounds = array<i64: 32, 128>}, {pipeline_mode = #tpu.pipeline_mode<synchronous>, transform_indices = @transform_2, window_bounds = array<i64: 1, 128>}, {transform_indices = @transform_3, window_bounds = array<i64: 64, 12544>}, {transform_indices = @transform_4, window_bounds = array<i64: 1, 12544>}, {transform_indices = @transform_5, window_bounds = array<i64: 1, 2, 128>}, {transform_indices = @transform_6, window_bounds = array<i64: 2, 12544>}]} {
    %c0 = arith.constant 0 : index
    %c0_0 = arith.constant 0 : index
    %0 = vector.load %arg1[%c0, %c0_0] : memref<2x32xf32, #tpu.memory_space<vmem>>, vector<2x32xf32>
    %c0_1 = arith.constant 0 : index
    %c0_2 = arith.constant 0 : index
    %1 = vector.load %arg2[%c0_1, %c0_2] : memref<32x128xf32, #tpu.memory_space<vmem>>, vector<32x128xf32>
    %cst = arith.constant dense<0.000000e+00> : vector<2x128xf32>
    %2 = tpu.matmul %0, %1, %cst {dimension_numbers = #tpu.dot_dimension_numbers<[1], [0], [0], [1], [0, 0, 1, 1], [], []>} : vector<2x32xf32>, vector<32x128xf32>, vector<2x128xf32> -> vector<2x128xf32>
    %c0_3 = arith.constant 0 : index
    %c0_4 = arith.constant 0 : index
    %3 = vector.load %arg3[%c0_3, %c0_4] : memref<1x128xf32, #tpu.memory_space<vmem>>, vector<1x128xf32>
    %4 = vector.broadcast %3 : vector<1x128xf32> to vector<2x128xf32>
    %5 = arith.addf %2, %4 : vector<2x128xf32>
    %c0_5 = arith.constant 0 : index
    %c0_6 = arith.constant 0 : index
    %c0_7 = arith.constant 0 : index
    %6 = vector.load %arg6[%c0_5, %c0_6, %c0_7] : memref<1x2x128xf32, #tpu.memory_space<vmem>>, vector<1x2x128xf32>
    %7 = vector.shape_cast %6 : vector<1x2x128xf32> to vector<2x128xf32>
    %8 = vector.shape_cast %5 : vector<2x128xf32> to vector<1x2x128xf32>
    tpu.vector_store %arg6[%c0_5, %c0_6, %c0_7], %8 {strides = array<i32>} : memref<1x2x128xf32, #tpu.memory_space<vmem>>, vector<1x2x128xf32>,
    %9 = vector.extract_strided_slice %5 {offsets = [0, 0], sizes = [2, 64], strides = [1, 1]} : vector<2x128xf32> to vector<2x64xf32>
    %cst_8 = arith.constant 0.000000e+00 : f32
    %10 = vector.broadcast %cst_8 : f32 to vector<2x64xf32>
    %11 = arith.maximumf %9, %10 : vector<2x64xf32>
    %12 = arith.truncf %11 : vector<2x64xf32> to vector<2x64xbf16>
    %c0_9 = arith.constant 0 : index
    %c0_10 = arith.constant 0 : index
    %13 = vector.load %arg4[%c0_9, %c0_10] : memref<64x12544xbf16, #tpu.memory_space<vmem>>, vector<64x12544xbf16>
    %cst_11 = arith.constant dense<0.000000e+00> : vector<2x12544xf32>
    %14 = tpu.matmul %12, %13, %cst_11 {dimension_numbers = #tpu.dot_dimension_numbers<[1], [0], [0], [1], [0, 0, 1, 1], [], []>} : vector<2x64xbf16>, vector<64x12544xbf16>, vector<2x12544xf32> -> vector<2x12544xf32>
    %c0_12 = arith.constant 0 : index
    %c0_13 = arith.constant 0 : index
    %15 = vector.load %arg5[%c0_12, %c0_13] : memref<1x12544xbf16, #tpu.memory_space<vmem>>, vector<1x12544xbf16>
    %16 = arith.extf %15 : vector<1x12544xbf16> to vector<1x12544xf32>
    %17 = vector.broadcast %16 : vector<1x12544xf32> to vector<2x12544xf32>
    %18 = arith.addf %14, %17 : vector<2x12544xf32>
    %cst_14 = arith.constant 0.000000e+00 : f32
    %19 = vector.broadcast %cst_14 : f32 to vector<2x12544xf32>
    %20 = arith.subf %19, %18 : vector<2x12544xf32>
    %21 = math.exp %20 : vector<2x12544xf32>
    %cst_15 = arith.constant 1.000000e+00 : f32
    %22 = vector.broadcast %cst_15 : f32 to vector<2x12544xf32>
    %23 = arith.addf %22, %21 : vector<2x12544xf32>
    %24 = tpu.reciprocal %23 {approx = true} : vector<2x12544xf32> -> vector<2x12544xf32>
    %25 = arith.truncf %24 : vector<2x12544xf32> to vector<2x12544xbf16>
    %c0_16 = arith.constant 0 : index
    %c0_17 = arith.constant 0 : index
    %26 = vector.load %arg7[%c0_16, %c0_17] : memref<2x12544xbf16, #tpu.memory_space<vmem>>, vector<2x12544xbf16>
    tpu.vector_store %arg7[%c0_16, %c0_17], %25 {strides = array<i32>} : memref<2x12544xbf16, #tpu.memory_space<vmem>>, vector<2x12544xbf16>,
    return
  }
  func.func @transform_0(%arg0: i32) -> (i32, i32) {
    %c0_i32 = arith.constant 0 : i32
    %c0_i32_0 = arith.constant 0 : i32
    %c0_i32_1 = arith.constant 0 : i32
    return %c0_i32, %c0_i32_0 : i32, i32
  }
  func.func @transform_1(%arg0: i32) -> (i32, i32) {
    %c0_i32 = arith.constant 0 : i32
    %c0_i32_0 = arith.constant 0 : i32
    %c0_i32_1 = arith.constant 0 : i32
    return %c0_i32, %c0_i32_0 : i32, i32
  }
  func.func @transform_2(%arg0: i32) -> (i32, i32) {
    %c0_i32 = arith.constant 0 : i32
    %c0_i32_0 = arith.constant 0 : i32
    %c0_i32_1 = arith.constant 0 : i32
    return %c0_i32, %c0_i32_0 : i32, i32
  }
  func.func @transform_3(%arg0: i32) -> (i32, i32) {
    %c0_i32 = arith.constant 0 : i32
    %c0_i32_0 = arith.constant 0 : i32
    return %c0_i32, %arg0 : i32, i32
  }
  func.func @transform_4(%arg0: i32) -> (i32, i32) {
    %c0_i32 = arith.constant 0 : i32
    %c0_i32_0 = arith.constant 0 : i32
    return %c0_i32, %arg0 : i32, i32
  }
  func.func @transform_5(%arg0: i32) -> (i32, i32, i32) {
    %c0_i32 = arith.constant 0 : i32
    %c0_i32_0 = arith.constant 0 : i32
    %c0_i32_1 = arith.constant 0 : i32
    return %arg0, %c0_i32, %c0_i32_0 : i32, i32, i32
  }
  func.func @transform_6(%arg0: i32) -> (i32, i32) {
    %c0_i32 = arith.constant 0 : i32
    %c0_i32_0 = arith.constant 0 : i32
    return %c0_i32, %arg0 : i32, i32
  }
}

</mosaic_0001>

<bundles_post_ra>
// kernel: decoder_head_forward.1
= control target key start
LH: loop header
LB: loop body
LE: loop exit
PB: predicated region body
PF: predicated region fallthrough
CT: control target
= control target key end

     0   :  { %s10290_s0 = inlined_call_operand.hbm [shape: f32[2,32], index: 0, kind: input, shape index: {}]   ;;  %s10291_s1 = inlined_call_operand.hbm [shape: f32[32,128], index: 1, kind: input, shape index: {}]   ;;  %s10292_s2 = inlined_call_operand.hbm [shape: f32[1,128], index: 2, kind: input, shape index: {}]   ;;  %s10293_s3 = inlined_call_operand.hbm [shape: bf16[64,50176], index: 3, kind: input, shape index: {}]   ;;  %s10294_s4 = inlined_call_operand.hbm [shape: bf16[1,50176], index: 4, kind: input, shape index: {}]   ;;  %s10295_s5 = inlined_call_operand.vmem [shape: f32[4,2,128], index: 5, kind: output, shape index: {0}]   ;;  %s10296_s6 = inlined_call_operand.vmem [shape: bf16[2,50176], index: 6, kind: output, shape index: {1}]  }
   0x1   :  { %10308 = sst [smem:[#allocation15_spill]] %s10291_s1 }
   0x2   :  { %10309 = sst [smem:[#allocation16_spill]] %s10293_s3 }
   0x3   :  { %12 = vsyncpa [#allocation3], 0 }
   0x4   :  { %13 = vsyncpa [#allocation5], 0 }
   0x5   :  { %14 = vsyncpa [#allocation8], 0 }
   0x6   :  { %16 = vsyncpa [#allocation8 + $0x1], 0  ;;  %s9057_s21 = smov 0   ;;  %s9059_s22 = smov 0  }
   0x7   :  { %s9061_s23 = smov 0   ;;  %s9063_s24 = smov 0  }
   0x8 LB: > { %s9076_s25 = sadd.s32 4294967295, %s9005_s24   ;;  %s9079_s26 = sadd.s32 1, %s9005_s24   ;;  %s9005_s24 = sphi %s9063_s24, %s10333_s24   ;;  %s9001_s23 = sphi %s9061_s23, %s10337_s23   ;;  %s8997_s22 = sphi %s9059_s22, %s10336_s22   ;;  %s8993_s21 = sphi %s9057_s21, %s10335_s21  }
   0x9   : > { %10310 = sst [smem:[#allocation13_spill]] %s9079_s26  ;;  %s89_s27 = ssub.s32 %s9005_s24, %s9079_s26 }
   0xa   : > { %s92_s28 = sadd.s32 1, %s9001_s23  ;;  %p90_p0 = scmp.eq.s32.totalorder %s89_s27, 0 }
   0xb   : > { %p99_p1 = scmp.ne.s32.totalorder %s9001_s23, %s8997_s22  ;;  %p100_p2 = scmp.eq.s32.totalorder %s9005_s24, 0 }
   0xc   : > { %p105_p3 = scmp.ne.s32.totalorder %s8997_s22, %s8993_s21  ;;  %p10297_p5 = scmp.eq.s32.totalorder %s9076_s25, 0 }
   0xd   : > { %s9089_s29 = scalar_select %p90_p0, %s9001_s23, %s92_s28  }
   0xe   : > { %p9091_p4 = por %p100_p2, %p99_p1  ;;  %p7219_p6 = scmp.ge.s32.totalorder %s9005_s24, 1 }
   0xf   : > { %10311 = sst [smem:[#allocation14_spill]] %s9089_s29  ;;  %p194_p7 = scmp.lt.s32.totalorder %s9005_s24, 5 }
  0x10   : > { %p9100_p8 = por %p10297_p5, %p105_p3  ;;  %s9007_s9 = smov [#allocation4]  }
  0x11   : > { %p9104_p9 = pnand %p7219_p6, %p194_p7  ;;  %s217_s10 = sshll.u32 %s9007_s9, 4  ;;  %s218_s10 = int_to_ptr.vmem [resolvable:$true] %s217_s10 }
  0x12   : > { %s10313_s7 = scalar_select %p9100_p8, 1, 0 }
  0x13   : > { %s10314_s8 = scalar_select %p9104_p9, 1, 0 }
  0x14   : > { %p7770_p10 = pneg %p9104_p9  ;;  %p7790_p12 = scmp.lt.s32.totalorder %s9005_s24, 4 }
  0x15   : > { %s242_s12 = sand.u32 1, %s9005_s24   ;;  %s10305_s13 = sand.u32 1, %s9001_s23  }
  0x16   : > { %p9112_p11 = pnand %p7770_p10, %p10297_p5  ;;  %p9121_p13 = pnand %p7790_p12, %p9091_p4 }
  0x17   : > { %s10317_s1 = sld [smem:[#allocation15_spill]] }
  0x18   : > { %s10315_s11 = scalar_select %p9112_p11, 1, 0 }
  0x19   : > { %s10316_s14 = scalar_select %p9121_p13, 1, 0 }
  0x1a   : > { %p9133_p1 = pneg %p9112_p11 }
  0x1d   : > { %s8819_s17 = scalar_lea.hbm %s10317_s1, 512 }
  0x1e   : > { %p8820_p0 = scmp.ne.s32.totalorder %s10317_s1, %s8819_s17  ;;  %p8826_p4 = scmp.lt.u32.totalorder %s8819_s17, %s10317_s1 }
  0x20   : > { %p8822_p2 = pnand %p9133_p1, %p8820_p0 }
  0x22   : > { %p8823_p3 = pneg %p8822_p2 }
  0x24   : > { %p8828_p6 = pnand %p8826_p4, %p8823_p3 }
  0x26   : > { %8831 = shalt.err (!%p8828_p6)
}
  0x27   : > { %s8832_s28 = scalar_lea.vmem %s218_s10, 512  ;;  %p8840_p5 = scmp.lt.s32.totalorder %s218_s10, %s218_s10 }
  0x28   : > { %p8833_p7 = scmp.ne.s32.totalorder %s218_s10, %s8832_s28  ;;  %p8841_p8 = scmp.lt.s32.totalorder %s8832_s28, %s8832_s28 }
  0x2a   : > { %p8835_p10 = pnand %p8833_p7, %p9133_p1  ;;  %p8842_p9 = por %p8841_p8, %p8840_p5 }
  0x2c   : > { %p8836_p12 = pneg %p8835_p10 }
  0x2e   : > { %p8843_p13 = pnand %p8842_p9, %p8836_p12 }
  0x30   : > { %8846 = shalt.err (!%p8843_p13)
}
  0x31   : > { %s9008_s30 = smov 128   ;;  %s9009_s9 = smov 8  }
  0x32   : > { %7776 = dma.hbm_to_vmem [thread:$0]  (!%p9112_p11), %s10317_s1, 512, %s218_s10, [#allocation5], %s9008_s30, %s9008_s30, %s9009_s9  }
  0x33   : > { %s7750_s17 = smul.u32 3136, %s10305_s13  ;;  %s10319_s3 = sld [smem:[#allocation16_spill]] }
  0x34   : > { %s7726_s18 = smul.u32 6272, %s9005_s24  ;;  %s9159_s26 = scalar_lea.sflag [#allocation8], %s242_s12 }
  0x35   : > { %s246_s28 = scalar_lea.vmem [#allocation7], %s7750_s17  ;;  %p10320_p8 = scmp.ne.s32.totalorder %s10316_s14, 0 }
  0x36   : > { %s253_s29 = sshll.u32 %s246_s28, 4  ;;  %s9157_s29 = int_to_ptr.vmem [resolvable:$true] %s253_s29 }
  0x37   : > { %p10306_p9 = pneg %p10320_p8 }
  0x39   : > { %s9155_s27 = scalar_lea.hbm %s10319_s3, %s7726_s18  ;;  %s8852_s9 = scalar_lea.hbm %s10319_s3, 200704 }
  0x3a   : > { %s8847_s15 = scalar_lea.hbm %s9155_s27, 50176  ;;  %p8853_p2 = scmp.lt.u32.totalorder %s9155_s27, %s10319_s3 }
  0x3b   : > { %p8848_p5 = scmp.ne.s32.totalorder %s9155_s27, %s8847_s15  ;;  %p8854_p3 = scmp.lt.u32.totalorder %s8852_s9, %s8847_s15 }
  0x3c   : > { %p8856_p6 = scmp.lt.u32.totalorder %s8847_s15, %s9155_s27 }
  0x3d   : > { %p8850_p13 = pnand %p10306_p9, %p8848_p5  ;;  %p8855_p4 = por %p8854_p3, %p8853_p2 }
  0x3f   : > { %p8851_p0 = pneg %p8850_p13  ;;  %p8857_p7 = por %p8856_p6, %p8855_p4 }
  0x41   : > { %p8858_p10 = pnand %p8857_p7, %p8851_p0 }
  0x43   : > { %8861 = shalt.err (!%p8858_p10)
}
  0x44   : > { %s8862_s12 = scalar_lea.vmem %s9157_s29, 50176  ;;  %s9010_s17 = smov [#allocation7]  }
  0x45   : > { %p8863_p12 = scmp.ne.s32.totalorder %s9157_s29, %s8862_s12  ;;  %s8867_s19 = sshll.u32 %s9010_s17, 4  ;;  %s8868_s19 = int_to_ptr.vmem [resolvable:$false] %s8867_s19 }
  0x46   : > { %s8869_s21 = scalar_lea.vmem %s8868_s19, 100352  ;;  %p8870_p11 = scmp.lt.s32.totalorder %s9157_s29, %s8868_s19 }
  0x47   : > { %p8865_p5 = pnand %p8863_p12, %p10306_p9  ;;  %p8871_p2 = scmp.lt.s32.totalorder %s8869_s21, %s8862_s12 }
  0x49   : > { %p8866_p13 = pneg %p8865_p5  ;;  %p8872_p3 = por %p8871_p2, %p8870_p11 }
  0x4b   : > { %p8873_p4 = pnand %p8872_p3, %p8866_p13 }
  0x4d   : > { %8876 = shalt.err (!%p8873_p4)
}
  0x4e   : > { %s9011_s28 = smov 25088   ;;  %s9012_s15 = smov 6272  }
  0x4f   : > { %s9013_s10 = smov 392   ;;  %s9014_s30 = smov [#allocation2]  }
  0x50   : > { %7783 = dma.hbm_to_vmem [thread:$0]  (!%p10320_p8), %s9155_s27, 50176, %s9157_s29, %s9159_s26, %s9011_s28, %s9012_s15, %s9013_s10  }
  0x51   : > { %s207_s9 = sshll.u32 %s9014_s30, 4  ;;  %s9015_s16 = smov [#allocation6]   ;;  %s208_s9 = int_to_ptr.vmem [resolvable:$true] %s207_s9 }
  0x52   : > { %s231_s18 = sshll.u32 %s9015_s16, 4  ;;  %s8877_s19 = scalar_lea.hbm %s10290_s0, 32  ;;  %s232_s18 = int_to_ptr.vmem [resolvable:$true] %s231_s18 }
  0x53   : > { %p8878_p11 = scmp.ne.s32.totalorder %s10290_s0, %s8877_s19  ;;  %p8884_p7 = scmp.lt.u32.totalorder %s8877_s19, %s10290_s0 }
  0x55   : > { %p8880_p0 = pnand %p8878_p11, %p9133_p1 }
  0x57   : > { %p8881_p6 = pneg %p8880_p0 }
  0x59   : > { %p8886_p10 = pnand %p8884_p7, %p8881_p6 }
  0x5b   : > { %8889 = shalt.err (!%p8886_p10)
}
  0x5c   : > { %s8890_s29 = scalar_lea.vmem %s208_s9, 32  ;;  %p8898_p2 = scmp.lt.s32.totalorder %s208_s9, %s208_s9 }
  0x5d   : > { %p8891_p12 = scmp.ne.s32.totalorder %s208_s9, %s8890_s29  ;;  %p8899_p3 = scmp.lt.s32.totalorder %s8890_s29, %s8890_s29 }
  0x5f   : > { %p8893_p5 = pnand %p8891_p12, %p9133_p1  ;;  %p8900_p4 = por %p8899_p3, %p8898_p2 }
  0x61   : > { %p8894_p13 = pneg %p8893_p5 }
  0x63   : > { %p8901_p9 = pnand %p8900_p4, %p8894_p13 }
  0x65   : > { %8904 = shalt.err (!%p8901_p9)
}
  0x66   : > { %p10321_p11 = scmp.ne.s32.totalorder %s10315_s11, 0  ;;  %s10322_s1 = sand.u32 1, %s9001_s23  }
  0x67   : > { %s7751_s3 = smul.u32 98, %s10322_s1  ;;  %s8905_s10 = scalar_lea.hbm %s10292_s2, 16 }
  0x68   : > { %7773 = dma.hbm_to_vmem [thread:$0]  (!%p10321_p11), %s10290_s0, 32, %s208_s9, [#allocation3]  }
  0x69   : > { %p8906_p0 = scmp.ne.s32.totalorder %s10292_s2, %s8905_s10  ;;  %p8912_p7 = scmp.lt.u32.totalorder %s8905_s10, %s10292_s2 }
  0x6b   : > { %p8908_p9 = pnand %p8906_p0, %p9133_p1 }
  0x6d   : > { %p8909_p6 = pneg %p8908_p9 }
  0x6f   : > { %p8914_p10 = pnand %p8912_p7, %p8909_p6 }
  0x71   : > { %8917 = shalt.err (!%p8914_p10)
}
  0x72   : > { %s8918_s9 = scalar_lea.vmem %s232_s18, 16  ;;  %s8925_s19 = scalar_lea.vmem %s232_s18, 32 }
  0x73   : > { %p8919_p12 = scmp.ne.s32.totalorder %s232_s18, %s8918_s9  ;;  %p8926_p2 = scmp.lt.s32.totalorder %s232_s18, %s232_s18 }
  0x74   : > { %p8927_p3 = scmp.lt.s32.totalorder %s8925_s19, %s8918_s9 }
  0x75   : > { %p8921_p5 = pnand %p8919_p12, %p9133_p1 }
  0x76   : > { %p8928_p4 = por %p8927_p3, %p8926_p2 }
  0x77   : > { %p8922_p13 = pneg %p8921_p5 }
  0x79   : > { %p8929_p8 = pnand %p8928_p4, %p8922_p13 }
  0x7b   : > { %8932 = shalt.err (!%p8929_p8)
}
  0x7c   : > { %7779 = dma.hbm_to_vmem [thread:$0]  (!%p10321_p11), %s10292_s2, 16, %s232_s18, [#allocation5]  }
  0x7d   : > { %s7727_s13 = smul.u32 1568, %s9005_s24  ;;  %s267_s27 = scalar_lea.vmem [#allocation9], %s7751_s3 }
  0x7e   : > { %s275_s1 = sshll.u32 %s267_s27, 4  ;;  %p10323_p0 = scmp.ne.s32.totalorder %s10316_s14, 0  ;;  %s276_s1 = int_to_ptr.vmem [resolvable:$true] %s275_s1 }
  0x7f   : > { %s273_s15 = scalar_lea.hbm %s10294_s4, %s7727_s13  ;;  %s8938_s16 = scalar_lea.hbm %s10294_s4, 6272 }
  0x80   : > { %s8933_s10 = scalar_lea.hbm %s273_s15, 1568  ;;  %p10324_p8 = pneg %p10323_p0 }
  0x81   : > { %p8934_p1 = scmp.ne.s32.totalorder %s273_s15, %s8933_s10  ;;  %p8939_p11 = scmp.lt.u32.totalorder %s273_s15, %s10294_s4 }
  0x82   : > { %p8940_p7 = scmp.lt.u32.totalorder %s8938_s16, %s8933_s10  ;;  %p8942_p12 = scmp.lt.u32.totalorder %s8933_s10, %s273_s15 }
  0x83   : > { %p8936_p9 = pnand %p8934_p1, %p10324_p8 }
  0x84   : > { %p8941_p10 = por %p8940_p7, %p8939_p11 }
  0x85   : > { %p8937_p6 = pneg %p8936_p9 }
  0x86   : > { %p8943_p5 = por %p8942_p12, %p8941_p10 }
  0x88   : > { %p8944_p13 = pnand %p8943_p5, %p8937_p6 }
  0x8a   : > { %8947 = shalt.err (!%p8944_p13)
}
  0x8b   : > { %s8948_s24 = scalar_lea.vmem %s276_s1, 1568  ;;  %p10325_p3 = pmov %p10324_p8 }
  0x8c   : > { %p8949_p2 = scmp.ne.s32.totalorder %s276_s1, %s8948_s24  ;;  %s9016_s3 = smov [#allocation9]  }
  0x8d   : > { %s8953_s12 = sshll.u32 %s9016_s3, 4  ;;  %s8954_s12 = int_to_ptr.vmem [resolvable:$false] %s8953_s12 }
  0x8e   : > { %p8951_p4 = pnand %p8949_p2, %p10325_p3  ;;  %s8955_s9 = scalar_lea.vmem %s8954_s12, 3136 }
  0x8f   : > { %p8956_p8 = scmp.lt.s32.totalorder %s276_s1, %s8954_s12  ;;  %p8957_p9 = scmp.lt.s32.totalorder %s8955_s9, %s8948_s24 }
  0x90   : > { %p8952_p1 = pneg %p8951_p4 }
  0x91   : > { %p8958_p7 = por %p8957_p9, %p8956_p8 }
  0x93   : > { %p8959_p11 = pnand %p8958_p7, %p8952_p1 }
  0x95   : > { %8962 = shalt.err (!%p8959_p11)
}
  0x96   : > { %7786 = dma.hbm_to_vmem [thread:$0]  (!%p10323_p0), %s273_s15, 1568, %s276_s1, %s9159_s26  }
  0x97   : > { %p10326_p6 = scmp.ne.s32.totalorder %s10314_s8, 0 }
  0x98   : > { %p10327_p10 = scmp.eq.s32.totalorder (!%p10326_p6), %s9076_s25, 0 }
  0x99   : > { %284 = sbr.rel (%p10326_p6) target bundleno = 1029 (0x405), region = 40 }
  0xa0   : > { %8980 = dma.done.wait (%p10327_p10), [#allocation3], 32   ;;  %p10328_p12 = pmov %p10327_p10 }
  0xa1   : > { %p10329_p5 = pmov %p10327_p10 }
  0xa2   : > { %8982 = vsyncadd (%p10328_p12), [#allocation3], 4294967264 }
  0xa3   : > { %8984 = dma.done.wait (%p10329_p5), [#allocation5], 528   ;;  %p10330_p13 = pmov %p10329_p5 }
  0xa4   : > { %s298_s26 = sand.u32 1, %s9076_s25   ;;  %s300_s14 = sand.u32 1, %s8997_s22  }
  0xa5   : > { %8986 = vsyncadd (%p10330_p13), [#allocation5], 4294966768  ;;  %s7752_s8 = smul.u32 3136, %s300_s14  ;;  %s299_s19 = scalar_lea.sflag [#allocation8], %s298_s26 }
  0xa6   : > { %p10331_p0 = scmp.ne.s32.totalorder %s10313_s7, 0 }
  0xa7   : > { %s9258_s21 = scalar_lea.vmem [#allocation7], %s7752_s8 }
  0xa8   : > { %8988 = dma.done.wait (%p10331_p0), %s299_s19, 51744  }
  0xa9   : > { %8990 = vsyncadd (%p10331_p0), %s299_s19, 4294915552  ;;  %v9017_v0 = vmov 0.0|0.0   ;;  %vm9018_vm0 = vmmov 0   ;;  %v9019_v1 = vmov 0.0   ;;  %v361_v2 = vld [vmem:[#allocation4] sm:$0xff]  ;;  %v362_v3 = vld [vmem:[#allocation4 + $0x8] sm:$0xff] }
  0xaa   : > { %7744 = vmatprep.subr.bf16.mxu0 %v9017_v0  ;;  %7741 = vmatprep.mubr.msk.f32.mxu0 %vm9018_vm0, %v9019_v1  ;;  %v363_v4 = vld [vmem:[#allocation4 + $0x10] sm:$0xff]  ;;  %v7745_v5 = vpack.c.bf16 %v362_v3, %v361_v2  ;;  %v364_v6 = vld [vmem:[#allocation4 + $0x18] sm:$0xff]  ;;  %v7844_v10 = vld [vmem:[%s9258_s21] ss:$392 sps:$4 sm:$0xff]   ;;  %vm372_vm1 = vcmask 261120   ;;  %v9020_v27 = vmov 0  }
  0xab   : > { %v7839_v7 = vld [vmem:[%s9258_s21 + $0x4] ss:$392 sps:$4 sm:$0xff]   ;;  %v7748_v8 = vpack.c.bf16 %v364_v6, %v363_v4  ;;  %v7845_v11 = vld [vmem:[%s9258_s21 + $0x314] ss:$392 sps:$4 sm:$0xff]   ;;  %v7841_v13 = vld [vmem:[%s9258_s21 + $0x8] ss:$392 sps:$4 sm:$0xff]   ;;  %3782 = vmatprep.mubr.bf16.mxu1 %v9020_v27 }
  0xac   : > { %7746 = vmatpush3.bf16.msra.mxu0 %v7745_v5  ;;  %v7843_v9 = vld [vmem:[%s9258_s21 + $0xc] ss:$392 sps:$4 sm:$0xff]   ;;  %3750 = vmatprep.subr.bf16.mxu1 %v7839_v7  ;;  %v360_v12 = vld [vmem:[#allocation2] sm:$0x3]  ;;  %v7850_v14 = vld [vmem:[%s9258_s21 + $0x310] ss:$392 sps:$4 sm:$0xff]  }
  0xad   : > { %7747 = vmatprep.subr.bf16.mxu0 %v9017_v0  ;;  %3751 = vmatpush1.bf16.msra.mxu1 %v7844_v10  ;;  %v7851_v15 = vld [vmem:[%s9258_s21 + $0x624] ss:$392 sps:$4 sm:$0xff]   ;;  %v7847_v17 = vld [vmem:[%s9258_s21 + $0x318] ss:$392 sps:$4 sm:$0xff]   ;;  %v7853_v20 = vld [vmem:[%s9258_s21 + $0x628] ss:$392 sps:$4 sm:$0xff]  }
  0xae   : > { %3752 = vmatprep.subr.bf16.mxu1 %v7845_v11  ;;  %v7849_v16 = vld [vmem:[%s9258_s21 + $0x31c] ss:$392 sps:$4 sm:$0xff]   ;;  %v7856_v18 = vld [vmem:[%s9258_s21 + $0x620] ss:$392 sps:$4 sm:$0xff]   ;;  %v7855_v19 = vld [vmem:[%s9258_s21 + $0x62c] ss:$392 sps:$4 sm:$0xff]  }
  0xaf   : > { %v7857_v21 = vld [vmem:[%s9258_s21 + $0x934] ss:$392 sps:$4 sm:$0xff]   ;;  %v7859_v23 = vld [vmem:[%s9258_s21 + $0x938] ss:$392 sps:$4 sm:$0xff]   ;;  %p350_p2 = scmp.lt.s32.totalorder %s9076_s25, 3  ;;  %vm3746_vm2 = vcmask 523264  }
  0xb0   : > { %7749 = vmatpush3.bf16.msra.mxu0 %v7748_v8  ;;  %v7861_v22 = vld [vmem:[%s9258_s21 + $0x93c] ss:$392 sps:$4 sm:$0xff]   ;;  %v7862_v24 = vld [vmem:[%s9258_s21 + $0x930] ss:$392 sps:$4 sm:$0xff]   ;;  %v7874_v37 = vld [vmem:[%s9258_s21 + $0x32c] ss:$392 sps:$4 sm:$0xff]  }
  0xb1   : > { %3791 = vmatprep.subr.bf16.mxu0 %v7843_v9  ;;  %3753 = vmatpush1.bf16.msra.mxu1 %v7850_v14  ;;  %v7865_v25 = vld [vmem:[%s9258_s21 + $0x14] ss:$392 sps:$4 sm:$0xff]   ;;  %s351_s7 = scalar_select %p350_p2, %s9076_s25, 3  ;;  %v7863_v33 = vld [vmem:[%s9258_s21 + $0x10] ss:$392 sps:$4 sm:$0xff]  }
  0xb2   : > { %3754 = vmatprep.subr.bf16.mxu1 %v7851_v15  ;;  %v7868_v26 = vld [vmem:[%s9258_s21 + $0x1c] ss:$392 sps:$4 sm:$0xff]   ;;  %v7866_v34 = vld [vmem:[%s9258_s21 + $0x18] ss:$392 sps:$4 sm:$0xff]   ;;  %v7872_v39 = vld [vmem:[%s9258_s21 + $0x328] ss:$392 sps:$4 sm:$0xff]  }
  0xb3   : > { %7742 = vmatmul.mubr.msk.f32.vlgmr.msra.gmra.mrb[0].mxu0 %vm372_vm1, %v360_v12  ;;  %s7230_s29 = sshll.u32 %s351_s7, 1  ;;  %v7231_v28 = vld [vmem:[#allocation6] ss:$0 sm:$0xff]  ;;  %v7871_v36 = vld [vmem:[%s9258_s21 + $0x324] ss:$392 sps:$4 sm:$0xff]   ;;  %s7753_s20 = smul.u32 98, %s300_s14 }
  0xb4   : > { %3792 = vmatpush1.bf16.msra.mxu0 %v7841_v13  ;;  %3823 = vmatprep.mubr.bf16.mxu0 %v9020_v27  ;;  %s353_s1 = scalar_lea.vmem %s10295_s5, %s7230_s29  ;;  %v7869_v38 = vld [vmem:[%s9258_s21 + $0x320] ss:$392 sps:$4 sm:$0xff]   ;;  %v7877_v40 = vld [vmem:[%s9258_s21 + $0x634] ss:$392 sps:$4 sm:$0xff]   ;;  %v7875_v42 = vld [vmem:[%s9258_s21 + $0x630] ss:$392 sps:$4 sm:$0xff]  }
  0xb5   : > { %3793 = vmatprep.subr.bf16.mxu0 %v7849_v16  ;;  %3755 = vmatpush1.bf16.msra.mxu1 %v7856_v18  ;;  %v7880_v41 = vld [vmem:[%s9258_s21 + $0x63c] ss:$392 sps:$4 sm:$0xff]   ;;  %v7878_v43 = vld [vmem:[%s9258_s21 + $0x638] ss:$392 sps:$4 sm:$0xff]   ;;  %v7886_v45 = vld [vmem:[%s9258_s21 + $0x94c] ss:$392 sps:$4 sm:$0xff]  }
  0xb6   : > { %3756 = vmatprep.subr.bf16.mxu1 %v7857_v21  ;;  %v7883_v44 = vld [vmem:[%s9258_s21 + $0x944] ss:$392 sps:$4 sm:$0xff]   ;;  %v7881_v46 = vld [vmem:[%s9258_s21 + $0x940] ss:$392 sps:$4 sm:$0xff]   ;;  %v7895_v52 = vld [vmem:[%s9258_s21 + $0x334] ss:$392 sps:$4 sm:$0xff]  }
  0xb7   : > { %v7884_v47 = vld [vmem:[%s9258_s21 + $0x948] ss:$392 sps:$4 sm:$0xff]   ;;  %v7889_v48 = vld [vmem:[%s9258_s21 + $0x24] ss:$392 sps:$4 sm:$0xff]   ;;  %v7896_v55 = vld [vmem:[%s9258_s21 + $0x338] ss:$392 sps:$4 sm:$0xff]  }
  0xb8   : > { %3794 = vmatpush1.bf16.msra.mxu0 %v7847_v17  ;;  %v7892_v49 = vld [vmem:[%s9258_s21 + $0x2c] ss:$392 sps:$4 sm:$0xff]   ;;  %v7887_v50 = vld [vmem:[%s9258_s21 + $0x20] ss:$392 sps:$4 sm:$0xff]   ;;  %v7898_v53 = vld [vmem:[%s9258_s21 + $0x33c] ss:$392 sps:$4 sm:$0xff]  }
  0xb9   : > { %3795 = vmatprep.subr.bf16.mxu0 %v7855_v19  ;;  %3757 = vmatpush1.bf16.msra.mxu1 %v7862_v24  ;;  %v7890_v51 = vld [vmem:[%s9258_s21 + $0x28] ss:$392 sps:$4 sm:$0xff]   ;;  %v7901_v56 = vld [vmem:[%s9258_s21 + $0x644] ss:$392 sps:$4 sm:$0xff]   ;;  %v7907_v60 = vld [vmem:[%s9258_s21 + $0x954] ss:$392 sps:$4 sm:$0xff]  }
  0xba   : > { %3832 = vmatprep.subr.bf16.mxu1 %v7865_v25  ;;  %v7893_v54 = vld [vmem:[%s9258_s21 + $0x330] ss:$392 sps:$4 sm:$0xff]   ;;  %v7904_v57 = vld [vmem:[%s9258_s21 + $0x64c] ss:$392 sps:$4 sm:$0xff]   ;;  %v7899_v58 = vld [vmem:[%s9258_s21 + $0x640] ss:$392 sps:$4 sm:$0xff]  }
  0xbb   : > { %v7902_v59 = vld [vmem:[%s9258_s21 + $0x648] ss:$392 sps:$4 sm:$0xff]   ;;  %v7910_v61 = vld [vmem:[%s9258_s21 + $0x95c] ss:$392 sps:$4 sm:$0xff]   ;;  %v7908_v63 = vld [vmem:[%s9258_s21 + $0x958] ss:$392 sps:$4 sm:$0xff]  }
  0xbc   : > { %3796 = vmatpush1.bf16.msra.mxu0 %v7853_v20  ;;  %v7905_v62 = vld [vmem:[%s9258_s21 + $0x950] ss:$392 sps:$4 sm:$0xff]   ;;  %v7913_v0 = vld [vmem:[%s9258_s21 + $0x34] ss:$392 sps:$4 sm:$0xff]   ;;  %v7919_v4 = vld [vmem:[%s9258_s21 + $0x344] ss:$392 sps:$4 sm:$0xff]  }
  0xbd   : > { %3797 = vmatprep.subr.bf16.mxu0 %v7861_v22  ;;  %v7916_v1 = vld [vmem:[%s9258_s21 + $0x3c] ss:$392 sps:$4 sm:$0xff]   ;;  %v7911_v2 = vld [vmem:[%s9258_s21 + $0x30] ss:$392 sps:$4 sm:$0xff]   ;;  %v7922_v5 = vld [vmem:[%s9258_s21 + $0x34c] ss:$392 sps:$4 sm:$0xff]  }
  0xbe   : > { %v7914_v3 = vld [vmem:[%s9258_s21 + $0x38] ss:$392 sps:$4 sm:$0xff]   ;;  %v7920_v7 = vld [vmem:[%s9258_s21 + $0x348] ss:$392 sps:$4 sm:$0xff]   ;;  %v7925_v8 = vld [vmem:[%s9258_s21 + $0x654] ss:$392 sps:$4 sm:$0xff]  }
  0xbf   : > { %v7917_v6 = vld [vmem:[%s9258_s21 + $0x340] ss:$392 sps:$4 sm:$0xff]   ;;  %v7928_v9 = vld [vmem:[%s9258_s21 + $0x65c] ss:$392 sps:$4 sm:$0xff]   ;;  %v7923_v10 = vld [vmem:[%s9258_s21 + $0x650] ss:$392 sps:$4 sm:$0xff]  }
  0xc0   : > { %3798 = vmatpush1.bf16.msra.mxu0 %v7859_v23  ;;  %v7926_v11 = vld [vmem:[%s9258_s21 + $0x658] ss:$392 sps:$4 sm:$0xff]   ;;  %v7931_v12 = vld [vmem:[%s9258_s21 + $0x964] ss:$392 sps:$4 sm:$0xff]   ;;  %v7932_v15 = vld [vmem:[%s9258_s21 + $0x968] ss:$392 sps:$4 sm:$0xff]  }
  0xc1   : > { %3873 = vmatprep.subr.bf16.mxu0 %v7868_v26  ;;  %v7934_v13 = vld [vmem:[%s9258_s21 + $0x96c] ss:$392 sps:$4 sm:$0xff]   ;;  %v7929_v14 = vld [vmem:[%s9258_s21 + $0x960] ss:$392 sps:$4 sm:$0xff]   ;;  %v7946_v21 = vld [vmem:[%s9258_s21 + $0x35c] ss:$392 sps:$4 sm:$0xff]  }
  0xc2   : > { %v7937_v16 = vld [vmem:[%s9258_s21 + $0x44] ss:$392 sps:$4 sm:$0xff]   ;;  %v7935_v18 = vld [vmem:[%s9258_s21 + $0x40] ss:$392 sps:$4 sm:$0xff]   ;;  %v7943_v20 = vld [vmem:[%s9258_s21 + $0x354] ss:$392 sps:$4 sm:$0xff]  }
  0xc3   : > { %v7940_v17 = vld [vmem:[%s9258_s21 + $0x4c] ss:$392 sps:$4 sm:$0xff]   ;;  %v7938_v19 = vld [vmem:[%s9258_s21 + $0x48] ss:$392 sps:$4 sm:$0xff]   ;;  %v7944_v23 = vld [vmem:[%s9258_s21 + $0x358] ss:$392 sps:$4 sm:$0xff]  }
  0xc4   : > { %v7941_v22 = vld [vmem:[%s9258_s21 + $0x350] ss:$392 sps:$4 sm:$0xff]   ;;  %v7949_v24 = vld [vmem:[%s9258_s21 + $0x664] ss:$392 sps:$4 sm:$0xff]   ;;  %v7947_v26 = vld [vmem:[%s9258_s21 + $0x660] ss:$392 sps:$4 sm:$0xff]  }
  0xc5   : > { %v7952_v25 = vld [vmem:[%s9258_s21 + $0x66c] ss:$392 sps:$4 sm:$0xff]   ;;  %s9575_s28 = scalar_lea.vmem [#allocation9], %s7753_s20  ;;  %s354_s15 = smul.u32 98, %s9076_s25 }
  0xc7   : > { %p9731_p3 = scmp.lt.s32.totalorder %s354_s15, 391 }
  0xc9   : > { %s10339_s15 = smov (!%p9731_p3, %s354_s15), 391 }
  0xca   : > { %s9763_s30 = scalar_lea.vmem %s10296_s6, %s10339_s15 }
 0x186   : > { %v442_v29 = vpop.f32.mrb[0].mxu0 }
 0x187   : > { %v443_v30 = vadd.f32 %v7231_v28, %v442_v29  ;;  %v7743_v31 = vpop.f32.mrb[1].mxu0  ;;  %v7950_v28 = vld [vmem:[%s9258_s21 + $0x668] ss:$392 sps:$4 sm:$0xff]   ;;  %v7955_v29 = vld [vmem:[%s9258_s21 + $0x974] ss:$392 sps:$4 sm:$0xff]  }
 0x188   : > { %v7953_v31 = vld [vmem:[%s9258_s21 + $0x970] ss:$392 sps:$4 sm:$0xff]  }
 0x189   : > { %446 = vst [vmem:[%s353_s1] sm:$0x3] %v443_v30  ;;  %v447_v32 = vmax.f32 %v443_v30, 0.0  ;;  %v7958_v30 = vld [vmem:[%s9258_s21 + $0x97c] ss:$392 sps:$4 sm:$0xff]  }
 0x18b   : > { %v9291_v35 = vpack.c.bf16 %v447_v32, %v447_v32  ;;  %v7956_v32 = vld [vmem:[%s9258_s21 + $0x978] ss:$392 sps:$4 sm:$0xff]  }
 0x18d   : > { %7625 = vmatmul.mubr.msk.bf16.vlgmr.msra.gmra.mrb[0].mxu1 %vm3746_vm2, %v9291_v35  ;;  %7626 = vmatmul.mubr.msk.bf16.vlgmr.msra.gmra.mrb[4].mxu0 %vm3746_vm2, %v9291_v35 }
 0x18e   : > { %3833 = vmatpush1.bf16.msra.mxu1 %v7863_v33  ;;  %3874 = vmatpush1.bf16.msra.mxu0 %v7866_v34  ;;  %v7961_v33 = vld [vmem:[%s9258_s21 + $0x54] ss:$392 sps:$4 sm:$0xff]  }
 0x18f   : > { %3834 = vmatprep.subr.bf16.mxu1 %v7871_v36  ;;  %3875 = vmatprep.subr.bf16.mxu0 %v7874_v37  ;;  %v7964_v34 = vld [vmem:[%s9258_s21 + $0x5c] ss:$392 sps:$4 sm:$0xff]   ;;  %v7959_v36 = vld [vmem:[%s9258_s21 + $0x50] ss:$392 sps:$4 sm:$0xff]  }
 0x190   : > { %3864 = vmatprep.mubr.bf16.mxu1 %v9020_v27  ;;  %3905 = vmatprep.mubr.bf16.mxu0 %v9020_v27  ;;  %v7962_v37 = vld [vmem:[%s9258_s21 + $0x58] ss:$392 sps:$4 sm:$0xff]  }
 0x192   : > { %3835 = vmatpush1.bf16.msra.mxu1 %v7869_v38  ;;  %3876 = vmatpush1.bf16.msra.mxu0 %v7872_v39  ;;  %v7967_v38 = vld [vmem:[%s9258_s21 + $0x364] ss:$392 sps:$4 sm:$0xff]  }
 0x193   : > { %3836 = vmatprep.subr.bf16.mxu1 %v7877_v40  ;;  %3877 = vmatprep.subr.bf16.mxu0 %v7880_v41  ;;  %v7970_v39 = vld [vmem:[%s9258_s21 + $0x36c] ss:$392 sps:$4 sm:$0xff]   ;;  %v7965_v40 = vld [vmem:[%s9258_s21 + $0x360] ss:$392 sps:$4 sm:$0xff]  }
 0x194   : > { %v7968_v41 = vld [vmem:[%s9258_s21 + $0x368] ss:$392 sps:$4 sm:$0xff]  }
 0x196   : > { %3837 = vmatpush1.bf16.msra.mxu1 %v7875_v42  ;;  %3878 = vmatpush1.bf16.msra.mxu0 %v7878_v43  ;;  %v7973_v42 = vld [vmem:[%s9258_s21 + $0x674] ss:$392 sps:$4 sm:$0xff]  }
 0x197   : > { %3838 = vmatprep.subr.bf16.mxu1 %v7883_v44  ;;  %3879 = vmatprep.subr.bf16.mxu0 %v7886_v45  ;;  %v7976_v43 = vld [vmem:[%s9258_s21 + $0x67c] ss:$392 sps:$4 sm:$0xff]   ;;  %v7971_v44 = vld [vmem:[%s9258_s21 + $0x670] ss:$392 sps:$4 sm:$0xff]  }
 0x198   : > { %v7974_v45 = vld [vmem:[%s9258_s21 + $0x678] ss:$392 sps:$4 sm:$0xff]  }
 0x19a   : > { %3839 = vmatpush1.bf16.msra.mxu1 %v7881_v46  ;;  %3880 = vmatpush1.bf16.msra.mxu0 %v7884_v47  ;;  %v7979_v46 = vld [vmem:[%s9258_s21 + $0x984] ss:$392 sps:$4 sm:$0xff]  }
 0x19b   : > { %3914 = vmatprep.subr.bf16.mxu1 %v7889_v48  ;;  %3955 = vmatprep.subr.bf16.mxu0 %v7892_v49  ;;  %v7982_v47 = vld [vmem:[%s9258_s21 + $0x98c] ss:$392 sps:$4 sm:$0xff]   ;;  %v7977_v48 = vld [vmem:[%s9258_s21 + $0x980] ss:$392 sps:$4 sm:$0xff]  }
 0x19c   : > { %v7980_v49 = vld [vmem:[%s9258_s21 + $0x988] ss:$392 sps:$4 sm:$0xff]  }
 0x19d   : > { %7627 = vmatmul.mubr.msk.bf16.vlgmr.msra.gmra.mrb[4].mxu1 %vm3746_vm2, %v9291_v35  ;;  %7628 = vmatmul.mubr.msk.bf16.vlgmr.msra.gmra.mrb[8].mxu0 %vm3746_vm2, %v9291_v35 }
 0x19e   : > { %3915 = vmatpush1.bf16.msra.mxu1 %v7887_v50  ;;  %3956 = vmatpush1.bf16.msra.mxu0 %v7890_v51  ;;  %v7985_v50 = vld [vmem:[%s9258_s21 + $0x64] ss:$392 sps:$4 sm:$0xff]  }
 0x19f   : > { %3916 = vmatprep.subr.bf16.mxu1 %v7895_v52  ;;  %3957 = vmatprep.subr.bf16.mxu0 %v7898_v53  ;;  %v7988_v51 = vld [vmem:[%s9258_s21 + $0x6c] ss:$392 sps:$4 sm:$0xff]   ;;  %v7983_v52 = vld [vmem:[%s9258_s21 + $0x60] ss:$392 sps:$4 sm:$0xff]  }
 0x1a0   : > { %3946 = vmatprep.mubr.bf16.mxu1 %v9020_v27  ;;  %3987 = vmatprep.mubr.bf16.mxu0 %v9020_v27  ;;  %v7986_v53 = vld [vmem:[%s9258_s21 + $0x68] ss:$392 sps:$4 sm:$0xff]  }
 0x1a2   : > { %3917 = vmatpush1.bf16.msra.mxu1 %v7893_v54  ;;  %3958 = vmatpush1.bf16.msra.mxu0 %v7896_v55  ;;  %v7991_v54 = vld [vmem:[%s9258_s21 + $0x374] ss:$392 sps:$4 sm:$0xff]  }
 0x1a3   : > { %3918 = vmatprep.subr.bf16.mxu1 %v7901_v56  ;;  %3959 = vmatprep.subr.bf16.mxu0 %v7904_v57  ;;  %v7994_v55 = vld [vmem:[%s9258_s21 + $0x37c] ss:$392 sps:$4 sm:$0xff]   ;;  %v7989_v56 = vld [vmem:[%s9258_s21 + $0x370] ss:$392 sps:$4 sm:$0xff]  }
 0x1a4   : > { %v7992_v57 = vld [vmem:[%s9258_s21 + $0x378] ss:$392 sps:$4 sm:$0xff]  }
 0x1a6   : > { %3919 = vmatpush1.bf16.msra.mxu1 %v7899_v58  ;;  %3960 = vmatpush1.bf16.msra.mxu0 %v7902_v59  ;;  %v7997_v58 = vld [vmem:[%s9258_s21 + $0x684] ss:$392 sps:$4 sm:$0xff]  }
 0x1a7   : > { %3920 = vmatprep.subr.bf16.mxu1 %v7907_v60  ;;  %3961 = vmatprep.subr.bf16.mxu0 %v7910_v61  ;;  %v8000_v59 = vld [vmem:[%s9258_s21 + $0x68c] ss:$392 sps:$4 sm:$0xff]   ;;  %v7995_v60 = vld [vmem:[%s9258_s21 + $0x680] ss:$392 sps:$4 sm:$0xff]  }
 0x1a8   : > { %v7998_v61 = vld [vmem:[%s9258_s21 + $0x688] ss:$392 sps:$4 sm:$0xff]  }
 0x1aa   : > { %3921 = vmatpush1.bf16.msra.mxu1 %v7905_v62  ;;  %3962 = vmatpush1.bf16.msra.mxu0 %v7908_v63  ;;  %v8003_v62 = vld [vmem:[%s9258_s21 + $0x994] ss:$392 sps:$4 sm:$0xff]  }
 0x1ab   : > { %3996 = vmatprep.subr.bf16.mxu1 %v7913_v0  ;;  %4037 = vmatprep.subr.bf16.mxu0 %v7916_v1  ;;  %v8006_v63 = vld [vmem:[%s9258_s21 + $0x99c] ss:$392 sps:$4 sm:$0xff]   ;;  %v8001_v0 = vld [vmem:[%s9258_s21 + $0x990] ss:$392 sps:$4 sm:$0xff]  }
 0x1ac   : > { %v8004_v1 = vld [vmem:[%s9258_s21 + $0x998] ss:$392 sps:$4 sm:$0xff]  }
 0x1ad   : > { %7629 = vmatmul.mubr.msk.bf16.vlgmr.msra.gmra.mrb[8].mxu1 %vm3746_vm2, %v9291_v35  ;;  %7630 = vmatmul.mubr.msk.bf16.vlgmr.msra.gmra.mrb[12].mxu0 %vm3746_vm2, %v9291_v35 }
 0x1ae   : > { %3997 = vmatpush1.bf16.msra.mxu1 %v7911_v2  ;;  %4038 = vmatpush1.bf16.msra.mxu0 %v7914_v3  ;;  %v8009_v2 = vld [vmem:[%s9258_s21 + $0x74] ss:$392 sps:$4 sm:$0xff]  }
 0x1af   : > { %3998 = vmatprep.subr.bf16.mxu1 %v7919_v4  ;;  %4039 = vmatprep.subr.bf16.mxu0 %v7922_v5  ;;  %v8012_v3 = vld [vmem:[%s9258_s21 + $0x7c] ss:$392 sps:$4 sm:$0xff]   ;;  %v8007_v4 = vld [vmem:[%s9258_s21 + $0x70] ss:$392 sps:$4 sm:$0xff]  }
 0x1b0   : > { %4028 = vmatprep.mubr.bf16.mxu1 %v9020_v27  ;;  %4069 = vmatprep.mubr.bf16.mxu0 %v9020_v27  ;;  %v8010_v5 = vld [vmem:[%s9258_s21 + $0x78] ss:$392 sps:$4 sm:$0xff]  }
 0x1b2   : > { %3999 = vmatpush1.bf16.msra.mxu1 %v7917_v6  ;;  %4040 = vmatpush1.bf16.msra.mxu0 %v7920_v7  ;;  %v8015_v6 = vld [vmem:[%s9258_s21 + $0x384] ss:$392 sps:$4 sm:$0xff]  }
 0x1b3   : > { %4000 = vmatprep.subr.bf16.mxu1 %v7925_v8  ;;  %4041 = vmatprep.subr.bf16.mxu0 %v7928_v9  ;;  %v8018_v7 = vld [vmem:[%s9258_s21 + $0x38c] ss:$392 sps:$4 sm:$0xff]   ;;  %v8013_v8 = vld [vmem:[%s9258_s21 + $0x380] ss:$392 sps:$4 sm:$0xff]  }
 0x1b4   : > { %v8016_v9 = vld [vmem:[%s9258_s21 + $0x388] ss:$392 sps:$4 sm:$0xff]  }
 0x1b6   : > { %4001 = vmatpush1.bf16.msra.mxu1 %v7923_v10  ;;  %4042 = vmatpush1.bf16.msra.mxu0 %v7926_v11  ;;  %v8021_v10 = vld [vmem:[%s9258_s21 + $0x694] ss:$392 sps:$4 sm:$0xff]  }
 0x1b7   : > { %4002 = vmatprep.subr.bf16.mxu1 %v7931_v12  ;;  %4043 = vmatprep.subr.bf16.mxu0 %v7934_v13  ;;  %v8024_v11 = vld [vmem:[%s9258_s21 + $0x69c] ss:$392 sps:$4 sm:$0xff]   ;;  %v8019_v12 = vld [vmem:[%s9258_s21 + $0x690] ss:$392 sps:$4 sm:$0xff]  }
 0x1b8   : > { %v8022_v13 = vld [vmem:[%s9258_s21 + $0x698] ss:$392 sps:$4 sm:$0xff]  }
 0x1ba   : > { %4003 = vmatpush1.bf16.msra.mxu1 %v7929_v14  ;;  %4044 = vmatpush1.bf16.msra.mxu0 %v7932_v15  ;;  %v8027_v14 = vld [vmem:[%s9258_s21 + $0x9a4] ss:$392 sps:$4 sm:$0xff]  }
 0x1bb   : > { %4078 = vmatprep.subr.bf16.mxu1 %v7937_v16  ;;  %4119 = vmatprep.subr.bf16.mxu0 %v7940_v17  ;;  %v8030_v15 = vld [vmem:[%s9258_s21 + $0x9ac] ss:$392 sps:$4 sm:$0xff]   ;;  %v8025_v16 = vld [vmem:[%s9258_s21 + $0x9a0] ss:$392 sps:$4 sm:$0xff]  }
 0x1bc   : > { %v8028_v17 = vld [vmem:[%s9258_s21 + $0x9a8] ss:$392 sps:$4 sm:$0xff]  }
 0x1bd   : > { %7631 = vmatmul.mubr.msk.bf16.vlgmr.msra.gmra.mrb[12].mxu1 %vm3746_vm2, %v9291_v35  ;;  %7632 = vmatmul.mubr.msk.bf16.vlgmr.msra.gmra.mrb[16].mxu0 %vm3746_vm2, %v9291_v35 }
 0x1be   : > { %4079 = vmatpush1.bf16.msra.mxu1 %v7935_v18  ;;  %4120 = vmatpush1.bf16.msra.mxu0 %v7938_v19  ;;  %v8033_v18 = vld [vmem:[%s9258_s21 + $0x84] ss:$392 sps:$4 sm:$0xff]  }
 0x1bf   : > { %4080 = vmatprep.subr.bf16.mxu1 %v7943_v20  ;;  %4121 = vmatprep.subr.bf16.mxu0 %v7946_v21  ;;  %v8036_v19 = vld [vmem:[%s9258_s21 + $0x8c] ss:$392 sps:$4 sm:$0xff]   ;;  %v8031_v20 = vld [vmem:[%s9258_s21 + $0x80] ss:$392 sps:$4 sm:$0xff]  }
 0x1c0   : > { %4110 = vmatprep.mubr.bf16.mxu1 %v9020_v27  ;;  %4151 = vmatprep.mubr.bf16.mxu0 %v9020_v27  ;;  %v8034_v21 = vld [vmem:[%s9258_s21 + $0x88] ss:$392 sps:$4 sm:$0xff]  }
 0x1c2   : > { %4081 = vmatpush1.bf16.msra.mxu1 %v7941_v22  ;;  %4122 = vmatpush1.bf16.msra.mxu0 %v7944_v23  ;;  %v8039_v22 = vld [vmem:[%s9258_s21 + $0x394] ss:$392 sps:$4 sm:$0xff]  }
 0x1c3   : > { %4082 = vmatprep.subr.bf16.mxu1 %v7949_v24  ;;  %4123 = vmatprep.subr.bf16.mxu0 %v7952_v25  ;;  %v8042_v23 = vld [vmem:[%s9258_s21 + $0x39c] ss:$392 sps:$4 sm:$0xff]   ;;  %v8037_v24 = vld [vmem:[%s9258_s21 + $0x390] ss:$392 sps:$4 sm:$0xff]  }
 0x1c4   : > { %v8040_v25 = vld [vmem:[%s9258_s21 + $0x398] ss:$392 sps:$4 sm:$0xff]  }
 0x1c6   : > { %4083 = vmatpush1.bf16.msra.mxu1 %v7947_v26  ;;  %4124 = vmatpush1.bf16.msra.mxu0 %v7950_v28  ;;  %v8045_v26 = vld [vmem:[%s9258_s21 + $0x6a4] ss:$392 sps:$4 sm:$0xff]  }
 0x1c7   : > { %4084 = vmatprep.subr.bf16.mxu1 %v7955_v29  ;;  %4125 = vmatprep.subr.bf16.mxu0 %v7958_v30  ;;  %v8048_v28 = vld [vmem:[%s9258_s21 + $0x6ac] ss:$392 sps:$4 sm:$0xff]   ;;  %v8043_v29 = vld [vmem:[%s9258_s21 + $0x6a0] ss:$392 sps:$4 sm:$0xff]  }
 0x1c8   : > { %v8046_v30 = vld [vmem:[%s9258_s21 + $0x6a8] ss:$392 sps:$4 sm:$0xff]  }
 0x1ca   : > { %4085 = vmatpush1.bf16.msra.mxu1 %v7953_v31  ;;  %4126 = vmatpush1.bf16.msra.mxu0 %v7956_v32  ;;  %v8051_v31 = vld [vmem:[%s9258_s21 + $0x9b4] ss:$392 sps:$4 sm:$0xff]  }
 0x1cb   : > { %4160 = vmatprep.subr.bf16.mxu1 %v7961_v33  ;;  %4201 = vmatprep.subr.bf16.mxu0 %v7964_v34  ;;  %v8054_v32 = vld [vmem:[%s9258_s21 + $0x9bc] ss:$392 sps:$4 sm:$0xff]   ;;  %v8049_v33 = vld [vmem:[%s9258_s21 + $0x9b0] ss:$392 sps:$4 sm:$0xff]  }
 0x1cc   : > { %v8052_v34 = vld [vmem:[%s9258_s21 + $0x9b8] ss:$392 sps:$4 sm:$0xff]  }
 0x1cd   : > { %7633 = vmatmul.mubr.msk.bf16.vlgmr.msra.gmra.mrb[16].mxu1 %vm3746_vm2, %v9291_v35  ;;  %7634 = vmatmul.mubr.msk.bf16.vlgmr.msra.gmra.mrb[20].mxu0 %vm3746_vm2, %v9291_v35 }
 0x1ce   : > { %4161 = vmatpush1.bf16.msra.mxu1 %v7959_v36  ;;  %4202 = vmatpush1.bf16.msra.mxu0 %v7962_v37  ;;  %v8057_v36 = vld [vmem:[%s9258_s21 + $0x94] ss:$392 sps:$4 sm:$0xff]  }
 0x1cf   : > { %4162 = vmatprep.subr.bf16.mxu1 %v7967_v38  ;;  %4203 = vmatprep.subr.bf16.mxu0 %v7970_v39  ;;  %v8060_v37 = vld [vmem:[%s9258_s21 + $0x9c] ss:$392 sps:$4 sm:$0xff]   ;;  %v8055_v38 = vld [vmem:[%s9258_s21 + $0x90] ss:$392 sps:$4 sm:$0xff]  }
 0x1d0   : > { %4192 = vmatprep.mubr.bf16.mxu1 %v9020_v27  ;;  %4233 = vmatprep.mubr.bf16.mxu0 %v9020_v27  ;;  %v8058_v39 = vld [vmem:[%s9258_s21 + $0x98] ss:$392 sps:$4 sm:$0xff]  }
 0x1d2   : > { %4163 = vmatpush1.bf16.msra.mxu1 %v7965_v40  ;;  %4204 = vmatpush1.bf16.msra.mxu0 %v7968_v41  ;;  %v8063_v40 = vld [vmem:[%s9258_s21 + $0x3a4] ss:$392 sps:$4 sm:$0xff]  }
 0x1d3   : > { %4164 = vmatprep.subr.bf16.mxu1 %v7973_v42  ;;  %4205 = vmatprep.subr.bf16.mxu0 %v7976_v43  ;;  %v8066_v41 = vld [vmem:[%s9258_s21 + $0x3ac] ss:$392 sps:$4 sm:$0xff]   ;;  %v8061_v42 = vld [vmem:[%s9258_s21 + $0x3a0] ss:$392 sps:$4 sm:$0xff]  }
 0x1d4   : > { %v8064_v43 = vld [vmem:[%s9258_s21 + $0x3a8] ss:$392 sps:$4 sm:$0xff]  }
 0x1d6   : > { %4165 = vmatpush1.bf16.msra.mxu1 %v7971_v44  ;;  %4206 = vmatpush1.bf16.msra.mxu0 %v7974_v45  ;;  %v8069_v44 = vld [vmem:[%s9258_s21 + $0x6b4] ss:$392 sps:$4 sm:$0xff]  }
 0x1d7   : > { %4166 = vmatprep.subr.bf16.mxu1 %v7979_v46  ;;  %4207 = vmatprep.subr.bf16.mxu0 %v7982_v47  ;;  %v8072_v45 = vld [vmem:[%s9258_s21 + $0x6bc] ss:$392 sps:$4 sm:$0xff]   ;;  %v8067_v46 = vld [vmem:[%s9258_s21 + $0x6b0] ss:$392 sps:$4 sm:$0xff]  }
 0x1d8   : > { %v8070_v47 = vld [vmem:[%s9258_s21 + $0x6b8] ss:$392 sps:$4 sm:$0xff]  }
 0x1da   : > { %4167 = vmatpush1.bf16.msra.mxu1 %v7977_v48  ;;  %4208 = vmatpush1.bf16.msra.mxu0 %v7980_v49  ;;  %v8075_v48 = vld [vmem:[%s9258_s21 + $0x9c4] ss:$392 sps:$4 sm:$0xff]  }
 0x1db   : > { %4242 = vmatprep.subr.bf16.mxu1 %v7985_v50  ;;  %4283 = vmatprep.subr.bf16.mxu0 %v7988_v51  ;;  %v8078_v49 = vld [vmem:[%s9258_s21 + $0x9cc] ss:$392 sps:$4 sm:$0xff]   ;;  %v8073_v50 = vld [vmem:[%s9258_s21 + $0x9c0] ss:$392 sps:$4 sm:$0xff]  }
 0x1dc   : > { %v8076_v51 = vld [vmem:[%s9258_s21 + $0x9c8] ss:$392 sps:$4 sm:$0xff]  }
 0x1dd   : > { %7635 = vmatmul.mubr.msk.bf16.vlgmr.msra.gmra.mrb[20].mxu1 %vm3746_vm2, %v9291_v35  ;;  %7636 = vmatmul.mubr.msk.bf16.vlgmr.msra.gmra.mrb[24].mxu0 %vm3746_vm2, %v9291_v35 }
 0x1de   : > { %4243 = vmatpush1.bf16.msra.mxu1 %v7983_v52  ;;  %4284 = vmatpush1.bf16.msra.mxu0 %v7986_v53  ;;  %v8081_v52 = vld [vmem:[%s9258_s21 + $0xa4] ss:$392 sps:$4 sm:$0xff]  }
 0x1df   : > { %4244 = vmatprep.subr.bf16.mxu1 %v7991_v54  ;;  %4285 = vmatprep.subr.bf16.mxu0 %v7994_v55  ;;  %v8084_v53 = vld [vmem:[%s9258_s21 + $0xac] ss:$392 sps:$4 sm:$0xff]   ;;  %v8079_v54 = vld [vmem:[%s9258_s21 + $0xa0] ss:$392 sps:$4 sm:$0xff]  }
 0x1e0   : > { %4274 = vmatprep.mubr.bf16.mxu1 %v9020_v27  ;;  %4315 = vmatprep.mubr.bf16.mxu0 %v9020_v27  ;;  %v8082_v55 = vld [vmem:[%s9258_s21 + $0xa8] ss:$392 sps:$4 sm:$0xff]  }
 0x1e2   : > { %4245 = vmatpush1.bf16.msra.mxu1 %v7989_v56  ;;  %4286 = vmatpush1.bf16.msra.mxu0 %v7992_v57  ;;  %v8087_v56 = vld [vmem:[%s9258_s21 + $0x3b4] ss:$392 sps:$4 sm:$0xff]  }
 0x1e3   : > { %4246 = vmatprep.subr.bf16.mxu1 %v7997_v58  ;;  %4287 = vmatprep.subr.bf16.mxu0 %v8000_v59  ;;  %v8090_v57 = vld [vmem:[%s9258_s21 + $0x3bc] ss:$392 sps:$4 sm:$0xff]   ;;  %v8085_v58 = vld [vmem:[%s9258_s21 + $0x3b0] ss:$392 sps:$4 sm:$0xff]  }
 0x1e4   : > { %v8088_v59 = vld [vmem:[%s9258_s21 + $0x3b8] ss:$392 sps:$4 sm:$0xff]  }
 0x1e6   : > { %4247 = vmatpush1.bf16.msra.mxu1 %v7995_v60  ;;  %4288 = vmatpush1.bf16.msra.mxu0 %v7998_v61  ;;  %v8093_v60 = vld [vmem:[%s9258_s21 + $0x6c4] ss:$392 sps:$4 sm:$0xff]  }
 0x1e7   : > { %4248 = vmatprep.subr.bf16.mxu1 %v8003_v62  ;;  %4289 = vmatprep.subr.bf16.mxu0 %v8006_v63  ;;  %v8096_v61 = vld [vmem:[%s9258_s21 + $0x6cc] ss:$392 sps:$4 sm:$0xff]   ;;  %v8091_v62 = vld [vmem:[%s9258_s21 + $0x6c0] ss:$392 sps:$4 sm:$0xff]  }
 0x1e8   : > { %v8094_v63 = vld [vmem:[%s9258_s21 + $0x6c8] ss:$392 sps:$4 sm:$0xff]  }
 0x1ea   : > { %4249 = vmatpush1.bf16.msra.mxu1 %v8001_v0  ;;  %4290 = vmatpush1.bf16.msra.mxu0 %v8004_v1  ;;  %v8099_v0 = vld [vmem:[%s9258_s21 + $0x9d4] ss:$392 sps:$4 sm:$0xff]  }
 0x1eb   : > { %4324 = vmatprep.subr.bf16.mxu1 %v8009_v2  ;;  %4365 = vmatprep.subr.bf16.mxu0 %v8012_v3  ;;  %v8102_v1 = vld [vmem:[%s9258_s21 + $0x9dc] ss:$392 sps:$4 sm:$0xff]   ;;  %v8097_v2 = vld [vmem:[%s9258_s21 + $0x9d0] ss:$392 sps:$4 sm:$0xff]  }
 0x1ec   : > { %v8100_v3 = vld [vmem:[%s9258_s21 + $0x9d8] ss:$392 sps:$4 sm:$0xff]  }
 0x1ed   : > { %7637 = vmatmul.mubr.msk.bf16.vlgmr.msra.gmra.mrb[24].mxu1 %vm3746_vm2, %v9291_v35  ;;  %7638 = vmatmul.mubr.msk.bf16.vlgmr.msra.gmra.mrb[28].mxu0 %vm3746_vm2, %v9291_v35 }
 0x1ee   : > { %4325 = vmatpush1.bf16.msra.mxu1 %v8007_v4  ;;  %4366 = vmatpush1.bf16.msra.mxu0 %v8010_v5  ;;  %v8105_v4 = vld [vmem:[%s9258_s21 + $0xb4] ss:$392 sps:$4 sm:$0xff]  }
 0x1ef   : > { %4326 = vmatprep.subr.bf16.mxu1 %v8015_v6  ;;  %4367 = vmatprep.subr.bf16.mxu0 %v8018_v7  ;;  %v8108_v5 = vld [vmem:[%s9258_s21 + $0xbc] ss:$392 sps:$4 sm:$0xff]   ;;  %v8103_v6 = vld [vmem:[%s9258_s21 + $0xb0] ss:$392 sps:$4 sm:$0xff]  }
 0x1f0   : > { %4356 = vmatprep.mubr.bf16.mxu1 %v9020_v27  ;;  %4397 = vmatprep.mubr.bf16.mxu0 %v9020_v27  ;;  %v8106_v7 = vld [vmem:[%s9258_s21 + $0xb8] ss:$392 sps:$4 sm:$0xff]  }
 0x1f2   : > { %4327 = vmatpush1.bf16.msra.mxu1 %v8013_v8  ;;  %4368 = vmatpush1.bf16.msra.mxu0 %v8016_v9  ;;  %v8111_v8 = vld [vmem:[%s9258_s21 + $0x3c4] ss:$392 sps:$4 sm:$0xff]  }
 0x1f3   : > { %4328 = vmatprep.subr.bf16.mxu1 %v8021_v10  ;;  %4369 = vmatprep.subr.bf16.mxu0 %v8024_v11  ;;  %v8114_v9 = vld [vmem:[%s9258_s21 + $0x3cc] ss:$392 sps:$4 sm:$0xff]   ;;  %v8109_v10 = vld [vmem:[%s9258_s21 + $0x3c0] ss:$392 sps:$4 sm:$0xff]  }
 0x1f4   : > { %v8112_v11 = vld [vmem:[%s9258_s21 + $0x3c8] ss:$392 sps:$4 sm:$0xff]  }
 0x1f6   : > { %4329 = vmatpush1.bf16.msra.mxu1 %v8019_v12  ;;  %4370 = vmatpush1.bf16.msra.mxu0 %v8022_v13  ;;  %v8117_v12 = vld [vmem:[%s9258_s21 + $0x6d4] ss:$392 sps:$4 sm:$0xff]  }
 0x1f7   : > { %4330 = vmatprep.subr.bf16.mxu1 %v8027_v14  ;;  %4371 = vmatprep.subr.bf16.mxu0 %v8030_v15  ;;  %v8120_v13 = vld [vmem:[%s9258_s21 + $0x6dc] ss:$392 sps:$4 sm:$0xff]   ;;  %v8115_v14 = vld [vmem:[%s9258_s21 + $0x6d0] ss:$392 sps:$4 sm:$0xff]  }
 0x1f8   : > { %v8118_v15 = vld [vmem:[%s9258_s21 + $0x6d8] ss:$392 sps:$4 sm:$0xff]  }
 0x1fa   : > { %4331 = vmatpush1.bf16.msra.mxu1 %v8025_v16  ;;  %4372 = vmatpush1.bf16.msra.mxu0 %v8028_v17  ;;  %v8123_v16 = vld [vmem:[%s9258_s21 + $0x9e4] ss:$392 sps:$4 sm:$0xff]  }
 0x1fb   : > { %4406 = vmatprep.subr.bf16.mxu1 %v8033_v18  ;;  %4447 = vmatprep.subr.bf16.mxu0 %v8036_v19  ;;  %v8126_v17 = vld [vmem:[%s9258_s21 + $0x9ec] ss:$392 sps:$4 sm:$0xff]   ;;  %v8121_v18 = vld [vmem:[%s9258_s21 + $0x9e0] ss:$392 sps:$4 sm:$0xff]  }
 0x1fc   : > { %v8124_v19 = vld [vmem:[%s9258_s21 + $0x9e8] ss:$392 sps:$4 sm:$0xff]  }
 0x1fd   : > { %7639 = vmatmul.mubr.msk.bf16.vlgmr.msra.gmra.mrb[28].mxu1 %vm3746_vm2, %v9291_v35  ;;  %7640 = vmatmul.mubr.msk.bf16.vlgmr.msra.gmra.mrb[32].mxu0 %vm3746_vm2, %v9291_v35 }
 0x1fe   : > { %4407 = vmatpush1.bf16.msra.mxu1 %v8031_v20  ;;  %4448 = vmatpush1.bf16.msra.mxu0 %v8034_v21  ;;  %v8129_v20 = vld [vmem:[%s9258_s21 + $0xc4] ss:$392 sps:$4 sm:$0xff]  }
 0x1ff   : > { %4408 = vmatprep.subr.bf16.mxu1 %v8039_v22  ;;  %4449 = vmatprep.subr.bf16.mxu0 %v8042_v23  ;;  %v8132_v21 = vld [vmem:[%s9258_s21 + $0xcc] ss:$392 sps:$4 sm:$0xff]   ;;  %v8127_v22 = vld [vmem:[%s9258_s21 + $0xc0] ss:$392 sps:$4 sm:$0xff]  }
 0x200   : > { %4438 = vmatprep.mubr.bf16.mxu1 %v9020_v27  ;;  %4479 = vmatprep.mubr.bf16.mxu0 %v9020_v27  ;;  %v8130_v23 = vld [vmem:[%s9258_s21 + $0xc8] ss:$392 sps:$4 sm:$0xff]  }
 0x202   : > { %4409 = vmatpush1.bf16.msra.mxu1 %v8037_v24  ;;  %4450 = vmatpush1.bf16.msra.mxu0 %v8040_v25  ;;  %v8135_v24 = vld [vmem:[%s9258_s21 + $0x3d4] ss:$392 sps:$4 sm:$0xff]  }
 0x203   : > { %4410 = vmatprep.subr.bf16.mxu1 %v8045_v26  ;;  %4451 = vmatprep.subr.bf16.mxu0 %v8048_v28  ;;  %v8138_v25 = vld [vmem:[%s9258_s21 + $0x3dc] ss:$392 sps:$4 sm:$0xff]   ;;  %v8133_v26 = vld [vmem:[%s9258_s21 + $0x3d0] ss:$392 sps:$4 sm:$0xff]  }
 0x204   : > { %v8136_v28 = vld [vmem:[%s9258_s21 + $0x3d8] ss:$392 sps:$4 sm:$0xff]  }
 0x206   : > { %4411 = vmatpush1.bf16.msra.mxu1 %v8043_v29  ;;  %4452 = vmatpush1.bf16.msra.mxu0 %v8046_v30  ;;  %v8141_v29 = vld [vmem:[%s9258_s21 + $0x6e4] ss:$392 sps:$4 sm:$0xff]  }
 0x207   : > { %4412 = vmatprep.subr.bf16.mxu1 %v8051_v31  ;;  %4453 = vmatprep.subr.bf16.mxu0 %v8054_v32  ;;  %v8144_v30 = vld [vmem:[%s9258_s21 + $0x6ec] ss:$392 sps:$4 sm:$0xff]   ;;  %v8139_v31 = vld [vmem:[%s9258_s21 + $0x6e0] ss:$392 sps:$4 sm:$0xff]  }
 0x208   : > { %v8142_v32 = vld [vmem:[%s9258_s21 + $0x6e8] ss:$392 sps:$4 sm:$0xff]  }
 0x20a   : > { %4413 = vmatpush1.bf16.msra.mxu1 %v8049_v33  ;;  %4454 = vmatpush1.bf16.msra.mxu0 %v8052_v34  ;;  %v8147_v33 = vld [vmem:[%s9258_s21 + $0x9f4] ss:$392 sps:$4 sm:$0xff]  }
 0x20b   : > { %4488 = vmatprep.subr.bf16.mxu1 %v8057_v36  ;;  %4529 = vmatprep.subr.bf16.mxu0 %v8060_v37  ;;  %v8150_v34 = vld [vmem:[%s9258_s21 + $0x9fc] ss:$392 sps:$4 sm:$0xff]   ;;  %v8145_v36 = vld [vmem:[%s9258_s21 + $0x9f0] ss:$392 sps:$4 sm:$0xff]  }
 0x20c   : > { %v8148_v37 = vld [vmem:[%s9258_s21 + $0x9f8] ss:$392 sps:$4 sm:$0xff]  }
 0x20d   : > { %7641 = vmatmul.mubr.msk.bf16.vlgmr.msra.gmra.mrb[32].mxu1 %vm3746_vm2, %v9291_v35  ;;  %7642 = vmatmul.mubr.msk.bf16.vlgmr.msra.gmra.mrb[36].mxu0 %vm3746_vm2, %v9291_v35 }
 0x20e   : > { %4489 = vmatpush1.bf16.msra.mxu1 %v8055_v38  ;;  %4530 = vmatpush1.bf16.msra.mxu0 %v8058_v39  ;;  %v8153_v38 = vld [vmem:[%s9258_s21 + $0xd4] ss:$392 sps:$4 sm:$0xff]  }
 0x20f   : > { %4490 = vmatprep.subr.bf16.mxu1 %v8063_v40  ;;  %4531 = vmatprep.subr.bf16.mxu0 %v8066_v41  ;;  %v8156_v39 = vld [vmem:[%s9258_s21 + $0xdc] ss:$392 sps:$4 sm:$0xff]   ;;  %v8151_v40 = vld [vmem:[%s9258_s21 + $0xd0] ss:$392 sps:$4 sm:$0xff]  }
 0x210   : > { %4520 = vmatprep.mubr.bf16.mxu1 %v9020_v27  ;;  %4561 = vmatprep.mubr.bf16.mxu0 %v9020_v27  ;;  %v8154_v41 = vld [vmem:[%s9258_s21 + $0xd8] ss:$392 sps:$4 sm:$0xff]  }
 0x212   : > { %4491 = vmatpush1.bf16.msra.mxu1 %v8061_v42  ;;  %4532 = vmatpush1.bf16.msra.mxu0 %v8064_v43  ;;  %v8159_v42 = vld [vmem:[%s9258_s21 + $0x3e4] ss:$392 sps:$4 sm:$0xff]  }
 0x213   : > { %4492 = vmatprep.subr.bf16.mxu1 %v8069_v44  ;;  %4533 = vmatprep.subr.bf16.mxu0 %v8072_v45  ;;  %v8162_v43 = vld [vmem:[%s9258_s21 + $0x3ec] ss:$392 sps:$4 sm:$0xff]   ;;  %v904_v44 = vlaneseq  ;;  %v8157_v45 = vld [vmem:[%s9258_s21 + $0x3e0] ss:$392 sps:$4 sm:$0xff]  }
 0x216   : > { %4493 = vmatpush1.bf16.msra.mxu1 %v8067_v46  ;;  %4534 = vmatpush1.bf16.msra.mxu0 %v8070_v47  ;;  %v8160_v46 = vld [vmem:[%s9258_s21 + $0x3e8] ss:$392 sps:$4 sm:$0xff]   ;;  %v8165_v47 = vld [vmem:[%s9258_s21 + $0x6f4] ss:$392 sps:$4 sm:$0xff]  }
 0x217   : > { %4494 = vmatprep.subr.bf16.mxu1 %v8075_v48  ;;  %4535 = vmatprep.subr.bf16.mxu0 %v8078_v49  ;;  %v8168_v48 = vld [vmem:[%s9258_s21 + $0x6fc] ss:$392 sps:$4 sm:$0xff]   ;;  %v9571_v49 = vshrl.u32 %v904_v44, 7  ;;  %v8196_v44 = vld [vmem:[%s9258_s21 + $0xa18] ss:$392 sps:$4 sm:$0xff]  }
 0x21a   : > { %4495 = vmatpush1.bf16.msra.mxu1 %v8073_v50  ;;  %4536 = vmatpush1.bf16.msra.mxu0 %v8076_v51  ;;  %v8163_v50 = vld [vmem:[%s9258_s21 + $0x6f0] ss:$392 sps:$4 sm:$0xff]  }
 0x21b   : > { %4570 = vmatprep.subr.bf16.mxu1 %v8081_v52  ;;  %4611 = vmatprep.subr.bf16.mxu0 %v8084_v53  ;;  %v8166_v51 = vld [vmem:[%s9258_s21 + $0x6f8] ss:$392 sps:$4 sm:$0xff]   ;;  %v8171_v53 = vld [vmem:[%s9258_s21 + $0xa04] ss:$392 sps:$4 sm:$0xff]  }
 0x21c   : > { %v9578_v52 = vld [vmem:[%s9575_s28] sm:$0xff] }
 0x21d   : > { %7643 = vmatmul.mubr.msk.bf16.vlgmr.msra.gmra.mrb[36].mxu1 %vm3746_vm2, %v9291_v35  ;;  %7644 = vmatmul.mubr.msk.bf16.vlgmr.msra.gmra.mrb[40].mxu0 %vm3746_vm2, %v9291_v35 }
 0x21e   : > { %4571 = vmatpush1.bf16.msra.mxu1 %v8079_v54  ;;  %4612 = vmatpush1.bf16.msra.mxu0 %v8082_v55  ;;  %v8174_v54 = vld [vmem:[%s9258_s21 + $0xa0c] ss:$392 sps:$4 sm:$0xff]   ;;  %v854_v55 = vunpack.c.l.bf16 %v9578_v52 }
 0x21f   : > { %4572 = vmatprep.subr.bf16.mxu1 %v8087_v56  ;;  %4613 = vmatprep.subr.bf16.mxu0 %v8090_v57  ;;  %v9584_v56 = vsub.s32 0, %v9571_v49  ;;  %v9587_v57 = vsub.s32 4, %v9571_v49 }
 0x220   : > { %4602 = vmatprep.mubr.bf16.mxu1 %v9020_v27  ;;  %4643 = vmatprep.mubr.bf16.mxu0 %v9020_v27 }
 0x222   : > { %4573 = vmatpush1.bf16.msra.mxu1 %v8085_v58  ;;  %4614 = vmatpush1.bf16.msra.mxu0 %v8088_v59  ;;  %v8169_v58 = vld [vmem:[%s9258_s21 + $0xa00] ss:$392 sps:$4 sm:$0xff]  }
 0x223   : > { %4574 = vmatprep.subr.bf16.mxu1 %v8093_v60  ;;  %4615 = vmatprep.subr.bf16.mxu0 %v8096_v61  ;;  %v8172_v59 = vld [vmem:[%s9258_s21 + $0xa08] ss:$392 sps:$4 sm:$0xff]   ;;  %v9592_v60 = vsub.s32 2, %v9571_v49  ;;  %v9595_v61 = vsub.s32 6, %v9571_v49 }
 0x226   : > { %4575 = vmatpush1.bf16.msra.mxu1 %v8091_v62  ;;  %4616 = vmatpush1.bf16.msra.mxu0 %v8094_v63  ;;  %v8177_v62 = vld [vmem:[%s9258_s21 + $0xe4] ss:$392 sps:$4 sm:$0xff]  }
 0x227   : > { %4576 = vmatprep.subr.bf16.mxu1 %v8099_v0  ;;  %4617 = vmatprep.subr.bf16.mxu0 %v8102_v1  ;;  %v8180_v63 = vld [vmem:[%s9258_s21 + $0xec] ss:$392 sps:$4 sm:$0xff]   ;;  %v907_v0 = vrot.slane %v854_v55, %v9584_v56  ;;  %v915_v1 = vrot.slane %v854_v55, %v9587_v57 }
 0x22a   : > { %4577 = vmatpush1.bf16.msra.mxu1 %v8097_v2  ;;  %4618 = vmatpush1.bf16.msra.mxu0 %v8100_v3  ;;  %v8175_v2 = vld [vmem:[%s9258_s21 + $0xe0] ss:$392 sps:$4 sm:$0xff]  }
 0x22b   : > { %4652 = vmatprep.subr.bf16.mxu1 %v8105_v4  ;;  %4693 = vmatprep.subr.bf16.mxu0 %v8108_v5  ;;  %v8178_v3 = vld [vmem:[%s9258_s21 + $0xe8] ss:$392 sps:$4 sm:$0xff]   ;;  %v911_v4 = vrot.slane %v854_v55, %v9592_v60  ;;  %v919_v5 = vrot.slane %v854_v55, %v9595_v61  ;;  %v8210_v55 = vld [vmem:[%s9258_s21 + $0x40c] ss:$392 sps:$4 sm:$0xff]  }
 0x22d   : > { %7645 = vmatmul.mubr.msk.bf16.vlgmr.msra.gmra.mrb[40].mxu1 %vm3746_vm2, %v9291_v35  ;;  %7646 = vmatmul.mubr.msk.bf16.vlgmr.msra.gmra.mrb[44].mxu0 %vm3746_vm2, %v9291_v35 }
 0x22e   : > { %4653 = vmatpush1.bf16.msra.mxu1 %v8103_v6  ;;  %4694 = vmatpush1.bf16.msra.mxu0 %v8106_v7  ;;  %v8183_v6 = vld [vmem:[%s9258_s21 + $0x3f4] ss:$392 sps:$4 sm:$0xff]  }
 0x22f   : > { %4654 = vmatprep.subr.bf16.mxu1 %v8111_v8  ;;  %4695 = vmatprep.subr.bf16.mxu0 %v8114_v9  ;;  %v8186_v7 = vld [vmem:[%s9258_s21 + $0x3fc] ss:$392 sps:$4 sm:$0xff]   ;;  %v1397_v8 = vrot.slane %v907_v0, %v9584_v56  ;;  %v1405_v9 = vrot.slane %v915_v1, %v9584_v56  ;;  %v8205_v0 = vld [vmem:[%s9258_s21 + $0x400] ss:$392 sps:$4 sm:$0xff]  }
 0x230   : > { %4684 = vmatprep.mubr.bf16.mxu1 %v9020_v27  ;;  %4725 = vmatprep.mubr.bf16.mxu0 %v9020_v27  ;;  %v8208_v1 = vld [vmem:[%s9258_s21 + $0x408] ss:$392 sps:$4 sm:$0xff]  }
 0x232   : > { %4655 = vmatpush1.bf16.msra.mxu1 %v8109_v10  ;;  %4696 = vmatpush1.bf16.msra.mxu0 %v8112_v11  ;;  %v8181_v10 = vld [vmem:[%s9258_s21 + $0x3f0] ss:$392 sps:$4 sm:$0xff]  }
 0x233   : > { %4656 = vmatprep.subr.bf16.mxu1 %v8117_v12  ;;  %4697 = vmatprep.subr.bf16.mxu0 %v8120_v13  ;;  %v8184_v11 = vld [vmem:[%s9258_s21 + $0x3f8] ss:$392 sps:$4 sm:$0xff]   ;;  %v1401_v12 = vrot.slane %v911_v4, %v9584_v56  ;;  %v1409_v13 = vrot.slane %v919_v5, %v9584_v56 }
 0x236   : > { %4657 = vmatpush1.bf16.msra.mxu1 %v8115_v14  ;;  %4698 = vmatpush1.bf16.msra.mxu0 %v8118_v15  ;;  %v8189_v14 = vld [vmem:[%s9258_s21 + $0x704] ss:$392 sps:$4 sm:$0xff]  }
 0x237   : > { %4658 = vmatprep.subr.bf16.mxu1 %v8123_v16  ;;  %4699 = vmatprep.subr.bf16.mxu0 %v8126_v17  ;;  %v8192_v15 = vld [vmem:[%s9258_s21 + $0x70c] ss:$392 sps:$4 sm:$0xff]  }
 0x23a   : > { %4659 = vmatpush1.bf16.msra.mxu1 %v8121_v18  ;;  %4700 = vmatpush1.bf16.msra.mxu0 %v8124_v19 }
 0x23b   : > { %4734 = vmatprep.subr.bf16.mxu1 %v8129_v20  ;;  %4775 = vmatprep.subr.bf16.mxu0 %v8132_v21 }
 0x23d   : > { %7647 = vmatmul.mubr.msk.bf16.vlgmr.msra.gmra.mrb[44].mxu1 %vm3746_vm2, %v9291_v35  ;;  %7648 = vmatmul.mubr.msk.bf16.vlgmr.msra.gmra.mrb[48].mxu0 %vm3746_vm2, %v9291_v35 }
 0x23e   : > { %4735 = vmatpush1.bf16.msra.mxu1 %v8127_v22  ;;  %4776 = vmatpush1.bf16.msra.mxu0 %v8130_v23  ;;  %v8187_v22 = vld [vmem:[%s9258_s21 + $0x700] ss:$392 sps:$4 sm:$0xff]  }
 0x23f   : > { %4736 = vmatprep.subr.bf16.mxu1 %v8135_v24  ;;  %4777 = vmatprep.subr.bf16.mxu0 %v8138_v25 }
 0x240   : > { %4766 = vmatprep.mubr.bf16.mxu1 %v9020_v27  ;;  %4807 = vmatprep.mubr.bf16.mxu0 %v9020_v27 }
 0x242   : > { %4737 = vmatpush1.bf16.msra.mxu1 %v8133_v26  ;;  %4778 = vmatpush1.bf16.msra.mxu0 %v8136_v28  ;;  %v8190_v28 = vld [vmem:[%s9258_s21 + $0x708] ss:$392 sps:$4 sm:$0xff]  }
 0x243   : > { %4738 = vmatprep.subr.bf16.mxu1 %v8141_v29  ;;  %4779 = vmatprep.subr.bf16.mxu0 %v8144_v30  ;;  %v8195_v29 = vld [vmem:[%s9258_s21 + $0xa14] ss:$392 sps:$4 sm:$0xff]  }
 0x246   : > { %4739 = vmatpush1.bf16.msra.mxu1 %v8139_v31  ;;  %4780 = vmatpush1.bf16.msra.mxu0 %v8142_v32 }
 0x247   : > { %4740 = vmatprep.subr.bf16.mxu1 %v8147_v33  ;;  %4781 = vmatprep.subr.bf16.mxu0 %v8150_v34  ;;  %v8198_v34 = vld [vmem:[%s9258_s21 + $0xa1c] ss:$392 sps:$4 sm:$0xff]  }
 0x24a   : > { %4741 = vmatpush1.bf16.msra.mxu1 %v8145_v36  ;;  %4782 = vmatpush1.bf16.msra.mxu0 %v8148_v37 }
 0x24b   : > { %4816 = vmatprep.subr.bf16.mxu1 %v8153_v38  ;;  %4857 = vmatprep.subr.bf16.mxu0 %v8156_v39 }
 0x24d   : > { %7649 = vmatmul.mubr.msk.bf16.vlgmr.msra.gmra.mrb[48].mxu1 %vm3746_vm2, %v9291_v35  ;;  %7650 = vmatmul.mubr.msk.bf16.vlgmr.msra.gmra.mrb[52].mxu0 %vm3746_vm2, %v9291_v35 }
 0x24e   : > { %4817 = vmatpush1.bf16.msra.mxu1 %v8151_v40  ;;  %4858 = vmatpush1.bf16.msra.mxu0 %v8154_v41  ;;  %v8193_v40 = vld [vmem:[%s9258_s21 + $0xa10] ss:$392 sps:$4 sm:$0xff]   ;;  %v855_v41 = vunpack.c.h.bf16 %v9578_v52 }
 0x24f   : > { %4818 = vmatprep.subr.bf16.mxu1 %v8159_v42  ;;  %4859 = vmatprep.subr.bf16.mxu0 %v8162_v43 }
 0x250   : > { %4848 = vmatprep.mubr.bf16.mxu1 %v9020_v27  ;;  %4889 = vmatprep.mubr.bf16.mxu0 %v9020_v27  ;;  %v927_v52 = vrot.slane %v855_v41, %v9592_v60 }
 0x252   : > { %4819 = vmatpush1.bf16.msra.mxu1 %v8157_v45  ;;  %4860 = vmatpush1.bf16.msra.mxu0 %v8160_v46  ;;  %v8201_v45 = vld [vmem:[%s9258_s21 + $0xf4] ss:$392 sps:$4 sm:$0xff]  }
 0x253   : > { %4820 = vmatprep.subr.bf16.mxu1 %v8165_v47  ;;  %4861 = vmatprep.subr.bf16.mxu0 %v8168_v48  ;;  %v8204_v46 = vld [vmem:[%s9258_s21 + $0xfc] ss:$392 sps:$4 sm:$0xff]   ;;  %v923_v47 = vrot.slane %v855_v41, %v9584_v56  ;;  %v931_v48 = vrot.slane %v855_v41, %v9587_v57 }
 0x256   : > { %4821 = vmatpush1.bf16.msra.mxu1 %v8163_v50  ;;  %4862 = vmatpush1.bf16.msra.mxu0 %v8166_v51  ;;  %v8199_v50 = vld [vmem:[%s9258_s21 + $0xf0] ss:$392 sps:$4 sm:$0xff]  }
 0x257   : > { %4822 = vmatprep.subr.bf16.mxu1 %v8171_v53  ;;  %4863 = vmatprep.subr.bf16.mxu0 %v8174_v54  ;;  %v8202_v51 = vld [vmem:[%s9258_s21 + $0xf8] ss:$392 sps:$4 sm:$0xff]   ;;  %v935_v53 = vrot.slane %v855_v41, %v9595_v61  ;;  %v8207_v54 = vld [vmem:[%s9258_s21 + $0x404] ss:$392 sps:$4 sm:$0xff]   ;;  %v9021_v41 = vmov 1966171168  }
 0x25a   : > { %4823 = vmatpush1.bf16.msra.mxu1 %v8169_v58  ;;  %4864 = vmatpush1.bf16.msra.mxu0 %v8172_v59  ;;  %v1413_v58 = vrot.slane %v923_v47, %v9584_v56  ;;  %v1421_v59 = vrot.slane %v931_v48, %v9584_v56  ;;  %v8223_v48 = vld [vmem:[%s9258_s21 + $0x100] ss:$392 sps:$4 sm:$0xff]  }
 0x25b   : > { %4898 = vmatprep.subr.bf16.mxu1 %v8177_v62  ;;  %4939 = vmatprep.subr.bf16.mxu0 %v8180_v63  ;;  %v1417_v62 = vrot.slane %v927_v52, %v9584_v56  ;;  %v1425_v63 = vrot.slane %v935_v53, %v9584_v56 }
 0x25d   : > { %7651 = vmatmul.mubr.msk.bf16.vlgmr.msra.gmra.mrb[52].mxu1 %vm3746_vm2, %v9291_v35  ;;  %7652 = vmatmul.mubr.msk.bf16.vlgmr.msra.gmra.mrb[56].mxu0 %vm3746_vm2, %v9291_v35 }
 0x25e   : > { %4899 = vmatpush1.bf16.msra.mxu1 %v8175_v2  ;;  %4940 = vmatpush1.bf16.msra.mxu0 %v8178_v3  ;;  %v8213_v2 = vld [vmem:[%s9258_s21 + $0x714] ss:$392 sps:$4 sm:$0xff]  }
 0x25f   : > { %4900 = vmatprep.subr.bf16.mxu1 %v8183_v6  ;;  %4941 = vmatprep.subr.bf16.mxu0 %v8186_v7  ;;  %v8216_v3 = vld [vmem:[%s9258_s21 + $0x71c] ss:$392 sps:$4 sm:$0xff]   ;;  %v8211_v6 = vld [vmem:[%s9258_s21 + $0x710] ss:$392 sps:$4 sm:$0xff]  }
 0x260   : > { %v3784_v16 = vpop.f32.mrb[0].mxu1  ;;  %v3825_v17 = vpop.f32.mrb[4].mxu0  ;;  %4930 = vmatprep.mubr.bf16.mxu1 %v9020_v27  ;;  %4971 = vmatprep.mubr.bf16.mxu0 %v9020_v27  ;;  %v8214_v7 = vld [vmem:[%s9258_s21 + $0x718] ss:$392 sps:$4 sm:$0xff]  }
 0x261   : > { %v3785_v18 = vadd.f32 %v3784_v16, %v1397_v8  ;;  %v3826_v19 = vadd.f32 %v3825_v17, %v1405_v9  ;;  %v3786_v20 = vpop.f32.mrb[1].mxu1  ;;  %v3827_v21 = vpop.f32.mrb[5].mxu0  ;;  %v9655_v8 = vld [vmem:[%s9575_s28 + $0x8] sm:$0xff] }
 0x262   : > { %v3787_v23 = vadd.f32 %v3786_v20, %v1401_v12  ;;  %v3828_v24 = vadd.f32 %v3827_v21, %v1409_v13  ;;  %4901 = vmatpush1.bf16.msra.mxu1 %v8181_v10  ;;  %4942 = vmatpush1.bf16.msra.mxu0 %v8184_v11  ;;  %v3788_v25 = vpop.f32.mrb[2].mxu1  ;;  %v3829_v26 = vpop.f32.mrb[6].mxu0 }
 0x263   : > { %v5759_v30 = vsub.f32 0.0, %v3785_v18  ;;  %v5761_v31 = vsub.f32 0.0, %v3826_v19  ;;  %v3789_v32 = vpop.f32.mrb[3].mxu1  ;;  %v3830_v33 = vpop.f32.mrb[7].mxu0  ;;  %4902 = vmatprep.subr.bf16.mxu1 %v8189_v14  ;;  %4943 = vmatprep.subr.bf16.mxu0 %v8192_v15  ;;  %v8219_v14 = vld [vmem:[%s9258_s21 + $0xa24] ss:$392 sps:$4 sm:$0xff]  }
 0x264   : > { %v5760_v36 = vsub.f32 0.0, %v3787_v23  ;;  %v5762_v37 = vsub.f32 0.0, %v3828_v24  ;;  %v8222_v15 = vld [vmem:[%s9258_s21 + $0xa2c] ss:$392 sps:$4 sm:$0xff]  }
 0x265   : > { %v5857_v38 = vmul.f32 1.442695, %v5759_v30  ;;  %v5861_v39 = vmul.f32 1.442695, %v5761_v31 }
 0x266   : > { %v5859_v42 = vmul.f32 1.442695, %v5760_v36  ;;  %v5863_v43 = vmul.f32 1.442695, %v5762_v37  ;;  %4903 = vmatpush1.bf16.msra.mxu1 %v8187_v22  ;;  %4944 = vmatpush1.bf16.msra.mxu0 %v8190_v28 }
 0x267   : > { %8427 = vpow2.f32 %v5857_v38  ;;  %4904 = vmatprep.subr.bf16.mxu1 %v8195_v29  ;;  %4945 = vmatprep.subr.bf16.mxu0 %v8198_v34  ;;  %v856_v29 = vunpack.c.l.bf16 %v9655_v8 }
 0x268   : > { %8429 = vpow2.f32 %v5861_v39  ;;  %v8217_v39 = vld [vmem:[%s9258_s21 + $0xa20] ss:$392 sps:$4 sm:$0xff]  }
 0x269   : > { %8431 = vpow2.f32 %v5859_v42  ;;  %v6450_v42 = vunpack.c.l.s4 %v9021_v41  ;;  %v947_v47 = vrot.slane %v856_v29, %v9587_v57  ;;  %v951_v52 = vrot.slane %v856_v29, %v9595_v61 }
 0x26a   : > { %8433 = vpow2.f32 %v5863_v43  ;;  %4905 = vmatpush1.bf16.msra.mxu1 %v8193_v40  ;;  %4946 = vmatpush1.bf16.msra.mxu0 %v8196_v44  ;;  %v8220_v40 = vld [vmem:[%s9258_s21 + $0xa28] ss:$392 sps:$4 sm:$0xff]   ;;  %v8225_v44 = vld [vmem:[%s9258_s21 + $0x104] ss:$392 sps:$4 sm:$0xff]  }
 0x26b   : > { %4980 = vmatprep.subr.bf16.mxu1 %v8201_v45  ;;  %5021 = vmatprep.subr.bf16.mxu0 %v8204_v46  ;;  %v8228_v45 = vld [vmem:[%s9258_s21 + $0x10c] ss:$392 sps:$4 sm:$0xff]   ;;  %v939_v46 = vrot.slane %v856_v29, %v9584_v56  ;;  %v6451_v53 = vunpack.c.0.s8 %v6450_v42 }
 0x26d   : > { %7653 = vmatmul.mubr.msk.bf16.vlgmr.msra.gmra.mrb[56].mxu1 %vm3746_vm2, %v9291_v35  ;;  %7654 = vmatmul.mubr.msk.bf16.vlgmr.msra.gmra.mrb[60].mxu0 %vm3746_vm2, %v9291_v35 }
 0x26e   : > { %4981 = vmatpush1.bf16.msra.mxu1 %v8199_v50  ;;  %5022 = vmatpush1.bf16.msra.mxu0 %v8202_v51  ;;  %v8226_v50 = vld [vmem:[%s9258_s21 + $0x108] ss:$392 sps:$4 sm:$0xff]   ;;  %v943_v51 = vrot.slane %v856_v29, %v9592_v60 }
 0x26f   : > { %4982 = vmatprep.subr.bf16.mxu1 %v8207_v54  ;;  %5023 = vmatprep.subr.bf16.mxu0 %v8210_v55  ;;  %v8231_v54 = vld [vmem:[%s9258_s21 + $0x414] ss:$392 sps:$4 sm:$0xff]  }
 0x270   : > { %v3866_v4 = vpop.f32.mrb[4].mxu1  ;;  %v3907_v5 = vpop.f32.mrb[8].mxu0  ;;  %5012 = vmatprep.mubr.bf16.mxu1 %v9020_v27  ;;  %5053 = vmatprep.mubr.bf16.mxu0 %v9020_v27  ;;  %v8234_v55 = vld [vmem:[%s9258_s21 + $0x41c] ss:$392 sps:$4 sm:$0xff]  }
 0x271   : > { %v8428_v9 = vpop.eup %8427  ;;  %v3867_v10 = vadd.f32 %v3866_v4, %v1413_v58  ;;  %v3908_v11 = vadd.f32 %v3907_v5, %v1421_v59  ;;  %v3868_v12 = vpop.f32.mrb[5].mxu1  ;;  %v1429_v58 = vrot.slane %v939_v46, %v9584_v56  ;;  %v1437_v59 = vrot.slane %v947_v47, %v9584_v56  ;;  %v8237_v5 = vld [vmem:[%s9258_s21 + $0x724] ss:$392 sps:$4 sm:$0xff]  }
 0x272   : > { %v3909_v13 = vpop.f32.mrb[9].mxu0  ;;  %v8430_v16 = vpop.eup %8429  ;;  %v6053_v17 = vadd.f32 1.0, %v8428_v9  ;;  %v3869_v18 = vadd.f32 %v3868_v12, %v1417_v62  ;;  %4983 = vmatpush1.bf16.msra.mxu1 %v8205_v0  ;;  %5024 = vmatpush1.bf16.msra.mxu0 %v8208_v1  ;;  %v1441_v0 = vrot.slane %v951_v52, %v9584_v56  ;;  %v8229_v1 = vld [vmem:[%s9258_s21 + $0x410] ss:$392 sps:$4 sm:$0xff]   ;;  %v9683_v4 = vsub.s32 %v6451_v53, %v9571_v49  ;;  %v8252_v52 = vld [vmem:[%s9258_s21 + $0x11c] ss:$392 sps:$4 sm:$0xff]  }
 0x273   : > { %v3910_v19 = vadd.f32 %v3909_v13, %v1425_v63  ;;  %v3870_v20 = vpop.f32.mrb[6].mxu1  ;;  %v3911_v21 = vpop.f32.mrb[10].mxu0  ;;  %v6055_v23 = vadd.f32 1.0, %v8430_v16  ;;  %v5763_v24 = vsub.f32 0.0, %v3867_v10  ;;  %v5765_v25 = vsub.f32 0.0, %v3908_v11  ;;  %4984 = vmatprep.subr.bf16.mxu1 %v8213_v2  ;;  %5025 = vmatprep.subr.bf16.mxu0 %v8216_v3 }
 0x274   : > { %v8432_v22 = vpop.eup %8431  ;;  %v3871_v26 = vpop.f32.mrb[7].mxu1  ;;  %8435 = vrcp.f32 %v6053_v17  ;;  %v5764_v32 = vsub.f32 0.0, %v3869_v18  ;;  %v1433_v63 = vrot.slane %v943_v51, %v9584_v56  ;;  %v8232_v2 = vld [vmem:[%s9258_s21 + $0x418] ss:$392 sps:$4 sm:$0xff]   ;;  %v8238_v17 = vld [vmem:[%s9258_s21 + $0x728] ss:$392 sps:$4 sm:$0xff]  }
 0x275   : > { %v3912_v28 = vpop.f32.mrb[11].mxu0  ;;  %v8434_v30 = vpop.eup %8433  ;;  %v6054_v31 = vadd.f32 1.0, %v8432_v22  ;;  %v5766_v33 = vsub.f32 0.0, %v3910_v19  ;;  %8437 = vrcp.f32 %v6055_v23  ;;  %v5865_v36 = vmul.f32 1.442695, %v5763_v24 }
 0x276   : > { %v6056_v34 = vadd.f32 1.0, %v8434_v30  ;;  %v5869_v37 = vmul.f32 1.442695, %v5765_v25  ;;  %v5867_v38 = vmul.f32 1.442695, %v5764_v32  ;;  %4985 = vmatpush1.bf16.msra.mxu1 %v8211_v6  ;;  %5026 = vmatpush1.bf16.msra.mxu0 %v8214_v7 }
 0x277   : > { %8439 = vrcp.f32 %v6054_v31  ;;  %v5871_v43 = vmul.f32 1.442695, %v5766_v33  ;;  %4986 = vmatprep.subr.bf16.mxu1 %v8219_v14  ;;  %5027 = vmatprep.subr.bf16.mxu0 %v8222_v15  ;;  %v8240_v6 = vld [vmem:[%s9258_s21 + $0x72c] ss:$392 sps:$4 sm:$0xff]   ;;  %v8235_v16 = vld [vmem:[%s9258_s21 + $0x720] ss:$392 sps:$4 sm:$0xff]  }
 0x278   : > { %8441 = vrcp.f32 %v6056_v34  ;;  %v8243_v24 = vld [vmem:[%s9258_s21 + $0xa34] ss:$392 sps:$4 sm:$0xff]  }
 0x279   : > { %8443 = vpow2.f32 %v5865_v36  ;;  %v8246_v25 = vld [vmem:[%s9258_s21 + $0xa3c] ss:$392 sps:$4 sm:$0xff]  }
 0x27a   : > { %8445 = vpow2.f32 %v5869_v37  ;;  %4987 = vmatpush1.bf16.msra.mxu1 %v8217_v39  ;;  %5028 = vmatpush1.bf16.msra.mxu0 %v8220_v40  ;;  %v8249_v51 = vld [vmem:[%s9258_s21 + $0x114] ss:$392 sps:$4 sm:$0xff]  }
 0x27b   : > { %8447 = vpow2.f32 %v5867_v38  ;;  %5062 = vmatprep.subr.bf16.mxu1 %v8225_v44  ;;  %5103 = vmatprep.subr.bf16.mxu0 %v8228_v45  ;;  %v857_v44 = vunpack.c.h.bf16 %v9655_v8 }
 0x27c   : > { %8449 = vpow2.f32 %v5871_v43  ;;  %v8241_v43 = vld [vmem:[%s9258_s21 + $0xa30] ss:$392 sps:$4 sm:$0xff]  }
 0x27d   : > { %7655 = vmatmul.mubr.msk.bf16.vlgmr.msra.gmra.mrb[60].mxu1 %vm3746_vm2, %v9291_v35  ;;  %7656 = vmatmul.mubr.msk.bf16.vlgmr.msra.gmra.mrb[64].mxu0 %vm3746_vm2, %v9291_v35  ;;  %v955_v53 = vrot.slane %v857_v44, %v9584_v56 }
 0x27e   : > { %v8436_v62 = vpop.eup %8435  ;;  %5063 = vmatpush1.bf16.msra.mxu1 %v8223_v48  ;;  %5104 = vmatpush1.bf16.msra.mxu0 %v8226_v50  ;;  %v8244_v48 = vld [vmem:[%s9258_s21 + $0xa38] ss:$392 sps:$4 sm:$0xff]  }
 0x27f   : > { %v8438_v3 = vpop.eup %8437  ;;  %5064 = vmatprep.subr.bf16.mxu1 %v8231_v54  ;;  %5105 = vmatprep.subr.bf16.mxu0 %v8234_v55  ;;  %v963_v54 = vrot.slane %v857_v44, %v9587_v57  ;;  %v8247_v55 = vld [vmem:[%s9258_s21 + $0x110] ss:$392 sps:$4 sm:$0xff]  }
 0x280   : > { %v3948_v9 = vpop.f32.mrb[8].mxu1  ;;  %v3989_v10 = vpop.f32.mrb[12].mxu0  ;;  %5094 = vmatprep.mubr.bf16.mxu1 %v9020_v27  ;;  %5135 = vmatprep.mubr.bf16.mxu0 %v9020_v27 }
 0x281   : > { %v8440_v7 = vpop.eup %8439  ;;  %v3949_v13 = vadd.f32 %v3948_v9, %v1429_v58  ;;  %v3990_v49 = vadd.f32 %v3989_v10, %v1437_v59  ;;  %v3950_v14 = vpop.f32.mrb[9].mxu1  ;;  %v8250_v58 = vld [vmem:[%s9258_s21 + $0x118] ss:$392 sps:$4 sm:$0xff]   ;;  %v959_v59 = vrot.slane %v857_v44, %v9592_v60  ;;  %v8261_v10 = vld [vmem:[%s9258_s21 + $0x734] ss:$392 sps:$4 sm:$0xff]  }
 0x282   : > { %v8442_v11 = vpop.eup %8441  ;;  %v7674_v12 = vpack.c.bf16 %v8440_v7, %v8436_v62  ;;  %v3991_v15 = vpop.f32.mrb[13].mxu0  ;;  %v3951_v20 = vadd.f32 %v3950_v14, %v1433_v63  ;;  %5065 = vmatpush1.bf16.msra.mxu1 %v8229_v1  ;;  %5106 = vmatpush1.bf16.msra.mxu0 %v8232_v2  ;;  %v967_v62 = vrot.slane %v857_v44, %v9595_v61  ;;  %v8255_v63 = vld [vmem:[%s9258_s21 + $0x424] ss:$392 sps:$4 sm:$0xff]   ;;  %v8256_v7 = vld [vmem:[%s9258_s21 + $0x428] ss:$392 sps:$4 sm:$0xff]  }
 0x283   : > { %v8444_v18 = vpop.eup %8443  ;;  %v7675_v19 = vpack.c.bf16 %v8442_v11, %v8438_v3  ;;  %v3992_v21 = vadd.f32 %v3991_v15, %v1441_v0  ;;  %v3952_v22 = vpop.f32.mrb[10].mxu1  ;;  %v5767_v30 = vsub.f32 0.0, %v3949_v13  ;;  %v5769_v31 = vsub.f32 0.0, %v3990_v49  ;;  %5066 = vmatprep.subr.bf16.mxu1 %v8237_v5  ;;  %5107 = vmatprep.subr.bf16.mxu0 %v8240_v6  ;;  %v8258_v0 = vld [vmem:[%s9258_s21 + $0x42c] ss:$392 sps:$4 sm:$0xff]  }
 0x284   : > { %v3993_v23 = vpop.f32.mrb[14].mxu0  ;;  %v8446_v26 = vpop.eup %8445  ;;  %v9694_v28 = vrot.slane %v7674_v12, %v9683_v4  ;;  %v6057_v29 = vadd.f32 1.0, %v8444_v18  ;;  %v5768_v38 = vsub.f32 0.0, %v3951_v20  ;;  %v1445_v1 = vrot.slane %v955_v53, %v9584_v56  ;;  %v8253_v6 = vld [vmem:[%s9258_s21 + $0x420] ss:$392 sps:$4 sm:$0xff]   ;;  %v9737_v20 = vld [vmem:[%s9575_s28 + $0x10] sm:$0xff] }
 0x285   : > { %v3953_v32 = vpop.f32.mrb[11].mxu1  ;;  %v3994_v33 = vpop.f32.mrb[15].mxu0  ;;  %v9697_v36 = vrot.slane %v7675_v19, %v9683_v4  ;;  %v6059_v37 = vadd.f32 1.0, %v8446_v26  ;;  %v5770_v39 = vsub.f32 0.0, %v3992_v21  ;;  %v5873_v42 = vmul.f32 1.442695, %v5767_v30 }
 0x286   : > { %v8448_v34 = vpop.eup %8447  ;;  %8451 = vrcp.f32 %v6057_v29  ;;  %v5877_v47 = vmul.f32 1.442695, %v5769_v31  ;;  %5067 = vmatpush1.bf16.msra.mxu1 %v8235_v16  ;;  %5108 = vmatpush1.bf16.msra.mxu0 %v8238_v17  ;;  %v5875_v50 = vmul.f32 1.442695, %v5768_v38  ;;  %v1453_v2 = vrot.slane %v963_v54, %v9584_v56  ;;  %v8264_v11 = vld [vmem:[%s9258_s21 + $0x73c] ss:$392 sps:$4 sm:$0xff]  }
 0x287   : > { %v8450_v40 = vpop.eup %8449  ;;  %v6058_v41 = vadd.f32 1.0, %v8448_v34  ;;  %v6477_v45 = vcombine.low %v9694_v28, %v9697_v36  ;;  %8453 = vrcp.f32 %v6059_v37  ;;  %5068 = vmatprep.subr.bf16.mxu1 %v8243_v24  ;;  %5109 = vmatprep.subr.bf16.mxu0 %v8246_v25  ;;  %v5879_v8 = vmul.f32 1.442695, %v5770_v39  ;;  %v8259_v19 = vld [vmem:[%s9258_s21 + $0x730] ss:$392 sps:$4 sm:$0xff]  }
 0x288   : > { %v6060_v46 = vadd.f32 1.0, %v8450_v40  ;;  %v1449_v3 = vrot.slane %v959_v59, %v9584_v56  ;;  %v1457_v5 = vrot.slane %v967_v62, %v9584_v56  ;;  %v8262_v29 = vld [vmem:[%s9258_s21 + $0x738] ss:$392 sps:$4 sm:$0xff]   ;;  %v8267_v30 = vld [vmem:[%s9258_s21 + $0xa44] ss:$392 sps:$4 sm:$0xff]   ;;  %v858_v44 = vunpack.c.l.bf16 %v9737_v20 }
 0x289   : > { %8455 = vrcp.f32 %v6058_v41  ;;  %v8270_v39 = vld [vmem:[%s9258_s21 + $0xa4c] ss:$392 sps:$4 sm:$0xff]  }
 0x28a   : > { %8457 = vrcp.f32 %v6060_v46  ;;  %5069 = vmatpush1.bf16.msra.mxu1 %v8241_v43  ;;  %5110 = vmatpush1.bf16.msra.mxu0 %v8244_v48  ;;  %v975_v28 = vrot.slane %v858_v44, %v9592_v60  ;;  %v983_v36 = vrot.slane %v858_v44, %v9595_v61 }
 0x28b   : > { %8459 = vpow2.f32 %v5873_v42  ;;  %5144 = vmatprep.subr.bf16.mxu1 %v8249_v51  ;;  %5185 = vmatprep.subr.bf16.mxu0 %v8252_v52  ;;  %v8265_v51 = vld [vmem:[%s9258_s21 + $0xa40] ss:$392 sps:$4 sm:$0xff]  }
 0x28c   : > { %8461 = vpow2.f32 %v5877_v47  ;;  %v8268_v52 = vld [vmem:[%s9258_s21 + $0xa48] ss:$392 sps:$4 sm:$0xff]  }
 0x28d   : > { %8463 = vpow2.f32 %v5875_v50  ;;  %7657 = vmatmul.mubr.msk.bf16.vlgmr.msra.gmra.mrb[64].mxu1 %vm3746_vm2, %v9291_v35  ;;  %7658 = vmatmul.mubr.msk.bf16.vlgmr.msra.gmra.mrb[68].mxu0 %vm3746_vm2, %v9291_v35 }
 0x28e   : > { %8465 = vpow2.f32 %v5879_v8  ;;  %5145 = vmatpush1.bf16.msra.mxu1 %v8247_v55  ;;  %5186 = vmatpush1.bf16.msra.mxu0 %v8250_v58  ;;  %v8273_v55 = vld [vmem:[%s9258_s21 + $0x124] ss:$392 sps:$4 sm:$0xff]  }
 0x28f   : > { %5146 = vmatprep.subr.bf16.mxu1 %v8255_v63  ;;  %5187 = vmatprep.subr.bf16.mxu0 %v8258_v0  ;;  %v8276_v63 = vld [vmem:[%s9258_s21 + $0x12c] ss:$392 sps:$4 sm:$0xff]  }
 0x290   : > { %v8452_v9 = vpop.eup %8451  ;;  %v4030_v13 = vpop.f32.mrb[12].mxu1  ;;  %5176 = vmatprep.mubr.bf16.mxu1 %v9020_v27  ;;  %5217 = vmatprep.mubr.bf16.mxu0 %v9020_v27 }
 0x291   : > { %v8454_v12 = vpop.eup %8453  ;;  %v4071_v49 = vpop.f32.mrb[16].mxu0  ;;  %v4031_v15 = vadd.f32 %v4030_v13, %v1445_v1  ;;  %v971_v1 = vrot.slane %v858_v44, %v9584_v56 }
 0x292   : > { %v4072_v16 = vadd.f32 %v4071_v49, %v1453_v2  ;;  %v4032_v17 = vpop.f32.mrb[13].mxu1  ;;  %v4073_v18 = vpop.f32.mrb[17].mxu0  ;;  %5147 = vmatpush1.bf16.msra.mxu1 %v8253_v6  ;;  %5188 = vmatpush1.bf16.msra.mxu0 %v8256_v7  ;;  %v979_v2 = vrot.slane %v858_v44, %v9587_v57  ;;  %v8271_v7 = vld [vmem:[%s9258_s21 + $0x120] ss:$392 sps:$4 sm:$0xff]   ;;  %v1465_v49 = vrot.slane %v975_v28, %v9584_v56 }
 0x293   : > { %v8456_v14 = vpop.eup %8455  ;;  %v4033_v23 = vadd.f32 %v4032_v17, %v1449_v3  ;;  %v4074_v24 = vadd.f32 %v4073_v18, %v1457_v5  ;;  %v4034_v25 = vpop.f32.mrb[14].mxu1  ;;  %v5771_v33 = vsub.f32 0.0, %v4031_v15  ;;  %5148 = vmatprep.subr.bf16.mxu1 %v8261_v10  ;;  %5189 = vmatprep.subr.bf16.mxu0 %v8264_v11  ;;  %v6485_v3 = vrot.slane %v6477_v45, %v9683_v4  ;;  %v8279_v10 = vld [vmem:[%s9258_s21 + $0x434] ss:$392 sps:$4 sm:$0xff]   ;;  %v8277_v15 = vld [vmem:[%s9258_s21 + $0x430] ss:$392 sps:$4 sm:$0xff]  }
 0x294   : > { %v8458_v21 = vpop.eup %8457  ;;  %v7676_v22 = vpack.c.bf16 %v8456_v14, %v8452_v9  ;;  %v4075_v26 = vpop.f32.mrb[18].mxu0  ;;  %v5773_v34 = vsub.f32 0.0, %v4072_v16  ;;  %v8274_v9 = vld [vmem:[%s9258_s21 + $0x128] ss:$392 sps:$4 sm:$0xff]   ;;  %v8282_v11 = vld [vmem:[%s9258_s21 + $0x43c] ss:$392 sps:$4 sm:$0xff]   ;;  %v1469_v13 = vrot.slane %v979_v2, %v9584_v56  ;;  %v1473_v14 = vrot.slane %v983_v36, %v9584_v56 }
 0x295   : > { %v8460_v31 = vpop.eup %8459  ;;  %v7677_v32 = vpack.c.bf16 %v8458_v21, %v8454_v12  ;;  %v4035_v37 = vpop.f32.mrb[15].mxu1  ;;  %v5772_v43 = vsub.f32 0.0, %v4033_v23  ;;  %v5774_v50 = vsub.f32 0.0, %v4074_v24  ;;  %v5881_v54 = vmul.f32 1.442695, %v5771_v33 }
 0x296   : > { %v4076_v38 = vpop.f32.mrb[19].mxu0  ;;  %v8462_v40 = vpop.eup %8461  ;;  %v6469_v41 = vrot.slane %v7676_v22, %v9683_v4  ;;  %v6061_v42 = vadd.f32 1.0, %v8460_v31  ;;  %5149 = vmatpush1.bf16.msra.mxu1 %v8259_v19  ;;  %5190 = vmatpush1.bf16.msra.mxu0 %v8262_v29  ;;  %v5885_v62 = vmul.f32 1.442695, %v5773_v34  ;;  %v1461_v12 = vrot.slane %v971_v1, %v9584_v56  ;;  %v8280_v16 = vld [vmem:[%s9258_s21 + $0x438] ss:$392 sps:$4 sm:$0xff]  }
 0x297   : > { %v8464_v46 = vpop.eup %8463  ;;  %v6476_v47 = vrot.slane %v7677_v32, %v9683_v4  ;;  %v6063_v48 = vadd.f32 1.0, %v8462_v40  ;;  %5150 = vmatprep.subr.bf16.mxu1 %v8267_v30  ;;  %5191 = vmatprep.subr.bf16.mxu0 %v8270_v39  ;;  %v5883_v0 = vmul.f32 1.442695, %v5772_v43  ;;  %v5887_v6 = vmul.f32 1.442695, %v5774_v50 }
 0x298   : > { %v8466_v8 = vpop.eup %8465  ;;  %8467 = vrcp.f32 %v6061_v42  ;;  %v6062_v53 = vadd.f32 1.0, %v8464_v46  ;;  %v8285_v17 = vld [vmem:[%s9258_s21 + $0x744] ss:$392 sps:$4 sm:$0xff]   ;;  %v8283_v30 = vld [vmem:[%s9258_s21 + $0x740] ss:$392 sps:$4 sm:$0xff]  }
 0x299   : > { %v6478_v58 = vcombine.low %v6469_v41, %v6476_v47  ;;  %8469 = vrcp.f32 %v6063_v48  ;;  %v6064_v59 = vadd.f32 1.0, %v8466_v8  ;;  %v8288_v18 = vld [vmem:[%s9258_s21 + $0x74c] ss:$392 sps:$4 sm:$0xff]   ;;  %v8286_v38 = vld [vmem:[%s9258_s21 + $0x748] ss:$392 sps:$4 sm:$0xff]  }
 0x29a   : > { %8471 = vrcp.f32 %v6062_v53  ;;  %5151 = vmatpush1.bf16.msra.mxu1 %v8265_v51  ;;  %5192 = vmatpush1.bf16.msra.mxu0 %v8268_v52  ;;  %v8291_v39 = vld [vmem:[%s9258_s21 + $0xa54] ss:$392 sps:$4 sm:$0xff]  }
 0x29b   : > { %v6492_v5 = vrot.slane %v6478_v58, %v9683_v4  ;;  %8473 = vrcp.f32 %v6064_v59  ;;  %5226 = vmatprep.subr.bf16.mxu1 %v8273_v55  ;;  %5267 = vmatprep.subr.bf16.mxu0 %v8276_v63  ;;  %v8294_v46 = vld [vmem:[%s9258_s21 + $0xa5c] ss:$392 sps:$4 sm:$0xff]   ;;  %v859_v55 = vunpack.c.h.bf16 %v9737_v20 }
 0x29c   : > { %8475 = vpow2.f32 %v5881_v54  ;;  %v8289_v54 = vld [vmem:[%s9258_s21 + $0xa50] ss:$392 sps:$4 sm:$0xff]   ;;  %v8297_v1 = vld [vmem:[%s9258_s21 + $0x134] ss:$392 sps:$4 sm:$0xff]  }
 0x29d   : > { %v6493_v45 = vcombine.low %v6485_v3, %v6492_v5  ;;  %8477 = vpow2.f32 %v5885_v62  ;;  %7659 = vmatmul.mubr.msk.bf16.vlgmr.msra.gmra.mrb[68].mxu1 %vm3746_vm2, %v9291_v35  ;;  %7660 = vmatmul.mubr.msk.bf16.vlgmr.msra.gmra.mrb[72].mxu0 %vm3746_vm2, %v9291_v35  ;;  %v987_v36 = vrot.slane %v859_v55, %v9584_v56 }
 0x29e   : > { %8479 = vpow2.f32 %v5883_v0  ;;  %5227 = vmatpush1.bf16.msra.mxu1 %v8271_v7  ;;  %5268 = vmatpush1.bf16.msra.mxu0 %v8274_v9  ;;  %v8292_v0 = vld [vmem:[%s9258_s21 + $0xa58] ss:$392 sps:$4 sm:$0xff]  }
 0x29f   : > { %7061 = vst [vmem:[%s9763_s30] sm:$0xff] %v6493_v45  ;;  %8481 = vpow2.f32 %v5887_v6  ;;  %5228 = vmatprep.subr.bf16.mxu1 %v8279_v10  ;;  %5269 = vmatprep.subr.bf16.mxu0 %v8282_v11  ;;  %v8300_v6 = vld [vmem:[%s9258_s21 + $0x13c] ss:$392 sps:$4 sm:$0xff]   ;;  %v995_v45 = vrot.slane %v859_v55, %v9587_v57  ;;  %v8295_v11 = vld [vmem:[%s9258_s21 + $0x130] ss:$392 sps:$4 sm:$0xff]  }
 0x2a0   : > { %v4112_v21 = vpop.f32.mrb[16].mxu1  ;;  %v4153_v22 = vpop.f32.mrb[20].mxu0  ;;  %5258 = vmatprep.mubr.bf16.mxu1 %v9020_v27  ;;  %5299 = vmatprep.mubr.bf16.mxu0 %v9020_v27 }
 0x2a1   : > { %v4113_v24 = vadd.f32 %v4112_v21, %v1461_v12  ;;  %v4154_v25 = vadd.f32 %v4153_v22, %v1469_v13  ;;  %v4114_v26 = vpop.f32.mrb[17].mxu1  ;;  %v4155_v29 = vpop.f32.mrb[21].mxu0  ;;  %v8298_v12 = vld [vmem:[%s9258_s21 + $0x138] ss:$392 sps:$4 sm:$0xff]   ;;  %v991_v13 = vrot.slane %v859_v55, %v9592_v60  ;;  %v8304_v22 = vld [vmem:[%s9258_s21 + $0x448] ss:$392 sps:$4 sm:$0xff]  }
 0x2a2   : > { %v8468_v19 = vpop.eup %8467  ;;  %v4115_v32 = vadd.f32 %v4114_v26, %v1465_v49  ;;  %v4156_v33 = vadd.f32 %v4155_v29, %v1473_v14  ;;  %v4116_v34 = vpop.f32.mrb[18].mxu1  ;;  %5229 = vmatpush1.bf16.msra.mxu1 %v8277_v15  ;;  %5270 = vmatpush1.bf16.msra.mxu0 %v8280_v16  ;;  %v999_v49 = vrot.slane %v859_v55, %v9595_v61  ;;  %v8303_v14 = vld [vmem:[%s9258_s21 + $0x444] ss:$392 sps:$4 sm:$0xff]   ;;  %v8301_v21 = vld [vmem:[%s9258_s21 + $0x440] ss:$392 sps:$4 sm:$0xff]  }
 0x2a3   : > { %v8470_v23 = vpop.eup %8469  ;;  %v4157_v37 = vpop.f32.mrb[22].mxu0  ;;  %v5775_v42 = vsub.f32 0.0, %v4113_v24  ;;  %5230 = vmatprep.subr.bf16.mxu1 %v8285_v17  ;;  %5271 = vmatprep.subr.bf16.mxu0 %v8288_v18  ;;  %v5777_v50 = vsub.f32 0.0, %v4154_v25  ;;  %v8306_v15 = vld [vmem:[%s9258_s21 + $0x44c] ss:$392 sps:$4 sm:$0xff]   ;;  %v1477_v16 = vrot.slane %v987_v36, %v9584_v56  ;;  %v1485_v17 = vrot.slane %v995_v45, %v9584_v56  ;;  %v9826_v29 = vld [vmem:[%s9575_s28 + $0x18] sm:$0xff] }
 0x2a4   : > { %v8472_v31 = vpop.eup %8471  ;;  %v4117_v43 = vpop.f32.mrb[19].mxu1  ;;  %v5776_v53 = vsub.f32 0.0, %v4115_v32  ;;  %v5778_v63 = vsub.f32 0.0, %v4156_v33  ;;  %v1481_v18 = vrot.slane %v991_v13, %v9584_v56  ;;  %v8312_v24 = vld [vmem:[%s9258_s21 + $0x75c] ss:$392 sps:$4 sm:$0xff]  }
 0x2a5   : > { %v8474_v40 = vpop.eup %8473  ;;  %v7678_v41 = vpack.c.bf16 %v8472_v31, %v8468_v19  ;;  %v4158_v44 = vpop.f32.mrb[23].mxu0  ;;  %v5889_v5 = vmul.f32 1.442695, %v5775_v42  ;;  %v5893_v9 = vmul.f32 1.442695, %v5777_v50  ;;  %v1489_v19 = vrot.slane %v999_v49, %v9584_v56 }
 0x2a6   : > { %v8476_v47 = vpop.eup %8475  ;;  %v7679_v48 = vpack.c.bf16 %v8474_v40, %v8470_v23  ;;  %5231 = vmatpush1.bf16.msra.mxu1 %v8283_v30  ;;  %5272 = vmatpush1.bf16.msra.mxu0 %v8286_v38  ;;  %v5891_v28 = vmul.f32 1.442695, %v5776_v53  ;;  %v5895_v10 = vmul.f32 1.442695, %v5778_v63  ;;  %v8309_v23 = vld [vmem:[%s9258_s21 + $0x754] ss:$392 sps:$4 sm:$0xff]  }
 0x2a7   : > { %v8478_v51 = vpop.eup %8477  ;;  %v9791_v52 = vrot.slane %v7678_v41, %v9683_v4  ;;  %v6065_v8 = vadd.f32 1.0, %v8476_v47  ;;  %5232 = vmatprep.subr.bf16.mxu1 %v8291_v39  ;;  %5273 = vmatprep.subr.bf16.mxu0 %v8294_v46  ;;  %v8307_v37 = vld [vmem:[%s9258_s21 + $0x750] ss:$392 sps:$4 sm:$0xff]   ;;  %v8315_v44 = vld [vmem:[%s9258_s21 + $0xa64] ss:$392 sps:$4 sm:$0xff]  }
 0x2a8   : > { %v8480_v58 = vpop.eup %8479  ;;  %v9796_v59 = vrot.slane %v7679_v48, %v9683_v4  ;;  %v6067_v62 = vadd.f32 1.0, %v8478_v51  ;;  %v8310_v43 = vld [vmem:[%s9258_s21 + $0x758] ss:$392 sps:$4 sm:$0xff]   ;;  %v8318_v51 = vld [vmem:[%s9258_s21 + $0xa6c] ss:$392 sps:$4 sm:$0xff]  }
 0x2a9   : > { %v8482_v2 = vpop.eup %8481  ;;  %8483 = vrcp.f32 %v6065_v8  ;;  %v6066_v3 = vadd.f32 1.0, %v8480_v58  ;;  %v860_v8 = vunpack.c.l.bf16 %v9826_v29  ;;  %v8321_v45 = vld [vmem:[%s9258_s21 + $0x144] ss:$392 sps:$4 sm:$0xff]  }
 0x2aa   : > { %v6526_v20 = vcombine.low %v9791_v52, %v9796_v59  ;;  %8485 = vrcp.f32 %v6067_v62  ;;  %v6068_v7 = vadd.f32 1.0, %v8482_v2  ;;  %5233 = vmatpush1.bf16.msra.mxu1 %v8289_v54  ;;  %5274 = vmatpush1.bf16.msra.mxu0 %v8292_v0 }
 0x2ab   : > { %8487 = vrcp.f32 %v6066_v3  ;;  %5308 = vmatprep.subr.bf16.mxu1 %v8297_v1  ;;  %5349 = vmatprep.subr.bf16.mxu0 %v8300_v6  ;;  %v8313_v6 = vld [vmem:[%s9258_s21 + $0xa60] ss:$392 sps:$4 sm:$0xff]  }
 0x2ac   : > { %8489 = vrcp.f32 %v6068_v7  ;;  %v8316_v7 = vld [vmem:[%s9258_s21 + $0xa68] ss:$392 sps:$4 sm:$0xff]  }
 0x2ad   : > { %8491 = vpow2.f32 %v5889_v5  ;;  %7661 = vmatmul.mubr.msk.bf16.vlgmr.msra.gmra.mrb[72].mxu1 %vm3746_vm2, %v9291_v35  ;;  %7662 = vmatmul.mubr.msk.bf16.vlgmr.msra.gmra.mrb[76].mxu0 %vm3746_vm2, %v9291_v35 }
 0x2ae   : > { %8493 = vpow2.f32 %v5893_v9  ;;  %5309 = vmatpush1.bf16.msra.mxu1 %v8295_v11  ;;  %5350 = vmatpush1.bf16.msra.mxu0 %v8298_v12  ;;  %v1003_v11 = vrot.slane %v860_v8, %v9584_v56 }
 0x2af   : > { %8495 = vpow2.f32 %v5891_v28  ;;  %5310 = vmatprep.subr.bf16.mxu1 %v8303_v14  ;;  %5351 = vmatprep.subr.bf16.mxu0 %v8306_v15  ;;  %v1011_v14 = vrot.slane %v860_v8, %v9587_v57 }
 0x2b0   : > { %8497 = vpow2.f32 %v5895_v10  ;;  %v4194_v25 = vpop.f32.mrb[20].mxu1  ;;  %v4235_v26 = vpop.f32.mrb[24].mxu0  ;;  %5340 = vmatprep.mubr.bf16.mxu1 %v9020_v27  ;;  %5381 = vmatprep.mubr.bf16.mxu0 %v9020_v27  ;;  %v8324_v10 = vld [vmem:[%s9258_s21 + $0x14c] ss:$392 sps:$4 sm:$0xff]   ;;  %v1493_v52 = vrot.slane %v1003_v11, %v9584_v56 }
 0x2b1   : > { %v4195_v31 = vadd.f32 %v4194_v25, %v1477_v16  ;;  %v4236_v32 = vadd.f32 %v4235_v26, %v1485_v17  ;;  %v4196_v33 = vpop.f32.mrb[21].mxu1  ;;  %v4237_v34 = vpop.f32.mrb[25].mxu0  ;;  %v8327_v26 = vld [vmem:[%s9258_s21 + $0x454] ss:$392 sps:$4 sm:$0xff]   ;;  %v1501_v59 = vrot.slane %v1011_v14, %v9584_v56 }
 0x2b2   : > { %v4197_v39 = vadd.f32 %v4196_v33, %v1481_v18  ;;  %v4238_v40 = vadd.f32 %v4237_v34, %v1489_v19  ;;  %v4198_v41 = vpop.f32.mrb[22].mxu1  ;;  %v4239_v42 = vpop.f32.mrb[26].mxu0  ;;  %5311 = vmatpush1.bf16.msra.mxu1 %v8301_v21  ;;  %5352 = vmatpush1.bf16.msra.mxu0 %v8304_v22  ;;  %v8319_v19 = vld [vmem:[%s9258_s21 + $0x140] ss:$392 sps:$4 sm:$0xff]   ;;  %v1007_v22 = vrot.slane %v860_v8, %v9592_v60  ;;  %v8325_v33 = vld [vmem:[%s9258_s21 + $0x450] ss:$392 sps:$4 sm:$0xff]  }
 0x2b3   : > { %v8484_v30 = vpop.eup %8483  ;;  %v5779_v47 = vsub.f32 0.0, %v4195_v31  ;;  %v4199_v48 = vpop.f32.mrb[23].mxu1  ;;  %5312 = vmatprep.subr.bf16.mxu1 %v8309_v23  ;;  %5353 = vmatprep.subr.bf16.mxu0 %v8312_v24  ;;  %v5781_v55 = vsub.f32 0.0, %v4236_v32  ;;  %v8322_v21 = vld [vmem:[%s9258_s21 + $0x148] ss:$392 sps:$4 sm:$0xff]   ;;  %v1015_v23 = vrot.slane %v860_v8, %v9595_v61  ;;  %v6534_v24 = vrot.slane %v6526_v20, %v9683_v4 }
 0x2b4   : > { %v8486_v38 = vpop.eup %8485  ;;  %v4240_v50 = vpop.f32.mrb[27].mxu0  ;;  %v5780_v0 = vsub.f32 0.0, %v4197_v39  ;;  %v5782_v5 = vsub.f32 0.0, %v4238_v40  ;;  %v1497_v20 = vrot.slane %v1007_v22, %v9584_v56  ;;  %v8328_v34 = vld [vmem:[%s9258_s21 + $0x458] ss:$392 sps:$4 sm:$0xff]  }
 0x2b5   : > { %v8488_v46 = vpop.eup %8487  ;;  %v5897_v63 = vmul.f32 1.442695, %v5779_v47  ;;  %v5901_v49 = vmul.f32 1.442695, %v5781_v55  ;;  %v1505_v32 = vrot.slane %v1015_v23, %v9584_v56  ;;  %v8331_v47 = vld [vmem:[%s9258_s21 + $0x760] ss:$392 sps:$4 sm:$0xff]  }
 0x2b6   : > { %v8490_v53 = vpop.eup %8489  ;;  %v7680_v54 = vpack.c.bf16 %v8488_v46, %v8484_v30  ;;  %5313 = vmatpush1.bf16.msra.mxu1 %v8307_v37  ;;  %5354 = vmatpush1.bf16.msra.mxu0 %v8310_v43  ;;  %v5899_v17 = vmul.f32 1.442695, %v5780_v0  ;;  %v5903_v18 = vmul.f32 1.442695, %v5782_v5  ;;  %v8330_v30 = vld [vmem:[%s9258_s21 + $0x45c] ss:$392 sps:$4 sm:$0xff]   ;;  %v861_v5 = vunpack.c.h.bf16 %v9826_v29 }
 0x2b7   : > { %v8492_v58 = vpop.eup %8491  ;;  %v7681_v62 = vpack.c.bf16 %v8490_v53, %v8486_v38  ;;  %8499 = vpow2.f32 %v5897_v63  ;;  %5314 = vmatprep.subr.bf16.mxu1 %v8315_v44  ;;  %5355 = vmatprep.subr.bf16.mxu0 %v8318_v51  ;;  %v8333_v37 = vld [vmem:[%s9258_s21 + $0x764] ss:$392 sps:$4 sm:$0xff]   ;;  %v8334_v48 = vld [vmem:[%s9258_s21 + $0x768] ss:$392 sps:$4 sm:$0xff]  }
 0x2b8   : > { %v8494_v1 = vpop.eup %8493  ;;  %v6518_v2 = vrot.slane %v7680_v54, %v9683_v4  ;;  %v6069_v3 = vadd.f32 1.0, %v8492_v58  ;;  %v8336_v38 = vld [vmem:[%s9258_s21 + $0x76c] ss:$392 sps:$4 sm:$0xff]  }
 0x2b9   : > { %v8496_v9 = vpop.eup %8495  ;;  %v6525_v28 = vrot.slane %v7681_v62, %v9683_v4  ;;  %v6071_v36 = vadd.f32 1.0, %v8494_v1  ;;  %v8339_v58 = vld [vmem:[%s9258_s21 + $0xa74] ss:$392 sps:$4 sm:$0xff]  }
 0x2ba   : > { %v8498_v12 = vpop.eup %8497  ;;  %8501 = vrcp.f32 %v6069_v3  ;;  %v6070_v13 = vadd.f32 1.0, %v8496_v9  ;;  %5315 = vmatpush1.bf16.msra.mxu1 %v8313_v6  ;;  %5356 = vmatpush1.bf16.msra.mxu0 %v8316_v7  ;;  %v8342_v3 = vld [vmem:[%s9258_s21 + $0xa7c] ss:$392 sps:$4 sm:$0xff]  }
 0x2bb   : > { %v6527_v15 = vcombine.low %v6518_v2, %v6525_v28  ;;  %8503 = vrcp.f32 %v6071_v36  ;;  %v6072_v16 = vadd.f32 1.0, %v8498_v12  ;;  %5390 = vmatprep.subr.bf16.mxu1 %v8321_v45  ;;  %5431 = vmatprep.subr.bf16.mxu0 %v8324_v10 }
 0x2bc   : > { %8505 = vrcp.f32 %v6070_v13  ;;  %v8337_v13 = vld [vmem:[%s9258_s21 + $0xa70] ss:$392 sps:$4 sm:$0xff]  }
 0x2bd   : > { %v6541_v25 = vrot.slane %v6527_v15, %v9683_v4  ;;  %8507 = vrcp.f32 %v6072_v16  ;;  %7663 = vmatmul.mubr.msk.bf16.vlgmr.msra.gmra.mrb[76].mxu1 %vm3746_vm2, %v9291_v35  ;;  %7664 = vmatmul.mubr.msk.bf16.vlgmr.msra.gmra.mrb[80].mxu0 %vm3746_vm2, %v9291_v35  ;;  %v8345_v16 = vld [vmem:[%s9258_s21 + $0x154] ss:$392 sps:$4 sm:$0xff]  }
 0x2be   : > { %8509 = vpow2.f32 %v5901_v49  ;;  %5391 = vmatpush1.bf16.msra.mxu1 %v8319_v19  ;;  %5432 = vmatpush1.bf16.msra.mxu0 %v8322_v21  ;;  %v8340_v49 = vld [vmem:[%s9258_s21 + $0xa78] ss:$392 sps:$4 sm:$0xff]  }
 0x2bf   : > { %v6542_v31 = vcombine.low %v6534_v24, %v6541_v25  ;;  %8511 = vpow2.f32 %v5899_v17  ;;  %5392 = vmatprep.subr.bf16.mxu1 %v8327_v26  ;;  %5433 = vmatprep.subr.bf16.mxu0 %v8330_v30  ;;  %v8348_v17 = vld [vmem:[%s9258_s21 + $0x15c] ss:$392 sps:$4 sm:$0xff]   ;;  %v1027_v26 = vrot.slane %v861_v5, %v9587_v57 }
 0x2c0   : > { %8513 = vpow2.f32 %v5903_v18  ;;  %v4276_v39 = vpop.f32.mrb[24].mxu1  ;;  %v4317_v40 = vpop.f32.mrb[28].mxu0  ;;  %5422 = vmatprep.mubr.bf16.mxu1 %v9020_v27  ;;  %5463 = vmatprep.mubr.bf16.mxu0 %v9020_v27  ;;  %v1019_v18 = vrot.slane %v861_v5, %v9584_v56 }
 0x2c1   : > { %7062 = vst [vmem:[%s9763_s30 + $0x8] sm:$0xff] %v6542_v31  ;;  %v8500_v41 = vpop.eup %8499  ;;  %v4277_v42 = vadd.f32 %v4276_v39, %v1493_v52  ;;  %v4318_v43 = vadd.f32 %v4317_v40, %v1501_v59  ;;  %v4278_v44 = vpop.f32.mrb[25].mxu1  ;;  %v8343_v31 = vld [vmem:[%s9258_s21 + $0x150] ss:$392 sps:$4 sm:$0xff]   ;;  %v1023_v59 = vrot.slane %v861_v5, %v9592_v60  ;;  %v8349_v40 = vld [vmem:[%s9258_s21 + $0x460] ss:$392 sps:$4 sm:$0xff]  }
 0x2c2   : > { %v4319_v46 = vpop.f32.mrb[29].mxu0  ;;  %v6073_v51 = vadd.f32 1.0, %v8500_v41  ;;  %v4279_v8 = vadd.f32 %v4278_v44, %v1497_v20  ;;  %v4280_v54 = vpop.f32.mrb[26].mxu1  ;;  %5393 = vmatpush1.bf16.msra.mxu1 %v8325_v33  ;;  %5434 = vmatpush1.bf16.msra.mxu0 %v8328_v34  ;;  %v8346_v52 = vld [vmem:[%s9258_s21 + $0x158] ss:$392 sps:$4 sm:$0xff]   ;;  %v1031_v20 = vrot.slane %v861_v5, %v9595_v61  ;;  %v1509_v34 = vrot.slane %v1019_v18, %v9584_v56 }
 0x2c3   : > { %v4320_v53 = vadd.f32 %v4319_v46, %v1505_v32  ;;  %v4321_v55 = vpop.f32.mrb[30].mxu0  ;;  %v5783_v63 = vsub.f32 0.0, %v4277_v42  ;;  %v5785_v0 = vsub.f32 0.0, %v4318_v43  ;;  %v4281_v1 = vpop.f32.mrb[27].mxu1  ;;  %5394 = vmatprep.subr.bf16.mxu1 %v8333_v37  ;;  %5435 = vmatprep.subr.bf16.mxu0 %v8336_v38  ;;  %v8351_v32 = vld [vmem:[%s9258_s21 + $0x464] ss:$392 sps:$4 sm:$0xff]   ;;  %v1517_v37 = vrot.slane %v1027_v26, %v9584_v56 }
 0x2c4   : > { %v8502_v50 = vpop.eup %8501  ;;  %v4322_v2 = vpop.f32.mrb[31].mxu0  ;;  %v5784_v7 = vsub.f32 0.0, %v4279_v8  ;;  %8515 = vrcp.f32 %v6073_v51  ;;  %v8354_v33 = vld [vmem:[%s9258_s21 + $0x46c] ss:$392 sps:$4 sm:$0xff]   ;;  %v1513_v38 = vrot.slane %v1023_v59, %v9584_v56  ;;  %v1521_v39 = vrot.slane %v1031_v20, %v9584_v56  ;;  %v8352_v41 = vld [vmem:[%s9258_s21 + $0x468] ss:$392 sps:$4 sm:$0xff]  }
 0x2c5   : > { %v8504_v62 = vpop.eup %8503  ;;  %v5905_v36 = vmul.f32 1.442695, %v5783_v63  ;;  %v5909_v45 = vmul.f32 1.442695, %v5785_v0  ;;  %v5786_v10 = vsub.f32 0.0, %v4320_v53 }
 0x2c6   : > { %v8506_v6 = vpop.eup %8505  ;;  %5395 = vmatpush1.bf16.msra.mxu1 %v8331_v47  ;;  %5436 = vmatpush1.bf16.msra.mxu0 %v8334_v48  ;;  %v5907_v23 = vmul.f32 1.442695, %v5784_v7  ;;  %v8357_v42 = vld [vmem:[%s9258_s21 + $0x774] ss:$392 sps:$4 sm:$0xff]   ;;  %v8355_v48 = vld [vmem:[%s9258_s21 + $0x770] ss:$392 sps:$4 sm:$0xff]  }
 0x2c7   : > { %v8508_v9 = vpop.eup %8507  ;;  %v7682_v28 = vpack.c.bf16 %v8506_v6, %v8502_v50  ;;  %8517 = vpow2.f32 %v5905_v36  ;;  %5396 = vmatprep.subr.bf16.mxu1 %v8339_v58  ;;  %5437 = vmatprep.subr.bf16.mxu0 %v8342_v3  ;;  %v5911_v25 = vmul.f32 1.442695, %v5786_v10  ;;  %v8360_v43 = vld [vmem:[%s9258_s21 + $0x77c] ss:$392 sps:$4 sm:$0xff]   ;;  %v8358_v50 = vld [vmem:[%s9258_s21 + $0x778] ss:$392 sps:$4 sm:$0xff]  }
 0x2c8   : > { %v8510_v11 = vpop.eup %8509  ;;  %v7683_v12 = vpack.c.bf16 %v8508_v9, %v8504_v62  ;;  %8519 = vpow2.f32 %v5909_v45  ;;  %v8363_v58 = vld [vmem:[%s9258_s21 + $0xa84] ss:$392 sps:$4 sm:$0xff]  }
 0x2c9   : > { %v8512_v14 = vpop.eup %8511  ;;  %v9875_v15 = vrot.slane %v7682_v28, %v9683_v4  ;;  %v6075_v29 = vadd.f32 1.0, %v8510_v11  ;;  %v9910_v62 = vld [vmem:[%s9575_s28 + $0x20] sm:$0xff]  ;;  %v8366_v6 = vld [vmem:[%s9258_s21 + $0xa8c] ss:$392 sps:$4 sm:$0xff]  }
 0x2ca   : > { %v8514_v19 = vpop.eup %8513  ;;  %v9881_v21 = vrot.slane %v7683_v12, %v9683_v4  ;;  %v6074_v22 = vadd.f32 1.0, %v8512_v14  ;;  %5397 = vmatpush1.bf16.msra.mxu1 %v8337_v13  ;;  %5438 = vmatpush1.bf16.msra.mxu0 %v8340_v49  ;;  %v862_v49 = vunpack.c.l.bf16 %v9910_v62  ;;  %v8372_v59 = vld [vmem:[%s9258_s21 + $0x16c] ss:$392 sps:$4 sm:$0xff]  }
 0x2cb   : > { %8521 = vrcp.f32 %v6075_v29  ;;  %v6076_v24 = vadd.f32 1.0, %v8514_v19  ;;  %5472 = vmatprep.subr.bf16.mxu1 %v8345_v16  ;;  %5513 = vmatprep.subr.bf16.mxu0 %v8348_v17 }
 0x2cc   : > { %v6575_v30 = vcombine.low %v9875_v15, %v9881_v21  ;;  %8523 = vrcp.f32 %v6074_v22  ;;  %v8361_v22 = vld [vmem:[%s9258_s21 + $0xa80] ss:$392 sps:$4 sm:$0xff]  }
 0x2cd   : > { %8525 = vrcp.f32 %v6076_v24  ;;  %7665 = vmatmul.mubr.msk.bf16.vlgmr.msra.gmra.mrb[80].mxu1 %vm3746_vm2, %v9291_v35  ;;  %7666 = vmatmul.mubr.msk.bf16.vlgmr.msra.gmra.mrb[84].mxu0 %vm3746_vm2, %v9291_v35  ;;  %v8369_v24 = vld [vmem:[%s9258_s21 + $0x164] ss:$392 sps:$4 sm:$0xff]  }
 0x2ce   : > { %8527 = vpow2.f32 %v5907_v23  ;;  %5473 = vmatpush1.bf16.msra.mxu1 %v8343_v31  ;;  %5514 = vmatpush1.bf16.msra.mxu0 %v8346_v52  ;;  %v8516_v44 = vpop.eup %8515  ;;  %v8364_v23 = vld [vmem:[%s9258_s21 + $0xa88] ss:$392 sps:$4 sm:$0xff]  }
 0x2cf   : > { %8529 = vpow2.f32 %v5911_v25  ;;  %5474 = vmatprep.subr.bf16.mxu1 %v8351_v32  ;;  %5515 = vmatprep.subr.bf16.mxu0 %v8354_v33 }
 0x2d0   : > { %v4358_v46 = vpop.f32.mrb[28].mxu1  ;;  %v4399_v47 = vpop.f32.mrb[32].mxu0  ;;  %5504 = vmatprep.mubr.bf16.mxu1 %v9020_v27  ;;  %5545 = vmatprep.mubr.bf16.mxu0 %v9020_v27 }
 0x2d1   : > { %v8518_v51 = vpop.eup %8517  ;;  %v4359_v8 = vadd.f32 %v4358_v46, %v1509_v34  ;;  %v4400_v53 = vadd.f32 %v4399_v47, %v1517_v37  ;;  %v4360_v54 = vpop.f32.mrb[29].mxu1  ;;  %v1035_v34 = vrot.slane %v862_v49, %v9584_v56  ;;  %v1043_v37 = vrot.slane %v862_v49, %v9587_v57 }
 0x2d2   : > { %v4401_v55 = vpop.f32.mrb[33].mxu0  ;;  %v8520_v63 = vpop.eup %8519  ;;  %v6077_v0 = vadd.f32 1.0, %v8518_v51  ;;  %v4361_v1 = vadd.f32 %v4360_v54, %v1513_v38  ;;  %5475 = vmatpush1.bf16.msra.mxu1 %v8349_v40  ;;  %5516 = vmatpush1.bf16.msra.mxu0 %v8352_v41  ;;  %v8370_v40 = vld [vmem:[%s9258_s21 + $0x168] ss:$392 sps:$4 sm:$0xff]   ;;  %v1039_v41 = vrot.slane %v862_v49, %v9592_v60  ;;  %v6583_v46 = vrot.slane %v6575_v30, %v9683_v4  ;;  %v8381_v54 = vld [vmem:[%s9258_s21 + $0x784] ss:$392 sps:$4 sm:$0xff]  }
 0x2d3   : > { %v4402_v2 = vadd.f32 %v4401_v55, %v1521_v39  ;;  %v4362_v3 = vpop.f32.mrb[30].mxu1  ;;  %v4403_v5 = vpop.f32.mrb[34].mxu0  ;;  %v6079_v9 = vadd.f32 1.0, %v8520_v63  ;;  %v5787_v28 = vsub.f32 0.0, %v4359_v8  ;;  %v5789_v36 = vsub.f32 0.0, %v4400_v53  ;;  %5476 = vmatprep.subr.bf16.mxu1 %v8357_v42  ;;  %5517 = vmatprep.subr.bf16.mxu0 %v8360_v43 }
 0x2d4   : > { %v4363_v45 = vpop.f32.mrb[31].mxu1  ;;  %v4404_v10 = vpop.f32.mrb[35].mxu0  ;;  %v5788_v12 = vsub.f32 0.0, %v4361_v1  ;;  %8531 = vrcp.f32 %v6077_v0  ;;  %v8367_v39 = vld [vmem:[%s9258_s21 + $0x160] ss:$392 sps:$4 sm:$0xff]   ;;  %v1047_v42 = vrot.slane %v862_v49, %v9595_v61  ;;  %v1529_v15 = vrot.slane %v1039_v41, %v9584_v56 }
 0x2d5   : > { %v8522_v7 = vpop.eup %8521  ;;  %v5790_v13 = vsub.f32 0.0, %v4402_v2  ;;  %v5913_v16 = vmul.f32 1.442695, %v5787_v28  ;;  %v5917_v17 = vmul.f32 1.442695, %v5789_v36  ;;  %8533 = vrcp.f32 %v6079_v9 }
 0x2d6   : > { %v8524_v11 = vpop.eup %8523  ;;  %5477 = vmatpush1.bf16.msra.mxu1 %v8355_v48  ;;  %5518 = vmatpush1.bf16.msra.mxu0 %v8358_v50  ;;  %v5915_v52 = vmul.f32 1.442695, %v5788_v12  ;;  %v8375_v43 = vld [vmem:[%s9258_s21 + $0x474] ss:$392 sps:$4 sm:$0xff]   ;;  %v1525_v48 = vrot.slane %v1035_v34, %v9584_v56  ;;  %v1533_v50 = vrot.slane %v1043_v37, %v9584_v56  ;;  %v1537_v21 = vrot.slane %v1047_v42, %v9584_v56  ;;  %v8373_v30 = vld [vmem:[%s9258_s21 + $0x470] ss:$392 sps:$4 sm:$0xff]  }
 0x2d7   : > { %v8526_v14 = vpop.eup %8525  ;;  %v7684_v29 = vpack.c.bf16 %v8524_v11, %v8516_v44  ;;  %8535 = vpow2.f32 %v5913_v16  ;;  %5478 = vmatprep.subr.bf16.mxu1 %v8363_v58  ;;  %5519 = vmatprep.subr.bf16.mxu0 %v8366_v6  ;;  %v5919_v33 = vmul.f32 1.442695, %v5790_v13  ;;  %v8378_v44 = vld [vmem:[%s9258_s21 + $0x47c] ss:$392 sps:$4 sm:$0xff]   ;;  %v8376_v8 = vld [vmem:[%s9258_s21 + $0x478] ss:$392 sps:$4 sm:$0xff]  }
 0x2d8   : > { %v8528_v18 = vpop.eup %8527  ;;  %v7685_v19 = vpack.c.bf16 %v8526_v14, %v8522_v7  ;;  %8537 = vpow2.f32 %v5917_v17  ;;  %v8384_v55 = vld [vmem:[%s9258_s21 + $0x78c] ss:$392 sps:$4 sm:$0xff]   ;;  %v8379_v1 = vld [vmem:[%s9258_s21 + $0x780] ss:$392 sps:$4 sm:$0xff]   ;;  %v8390_v49 = vld [vmem:[%s9258_s21 + $0xa9c] ss:$392 sps:$4 sm:$0xff]  }
 0x2d9   : > { %v8530_v25 = vpop.eup %8529  ;;  %v6567_v26 = vrot.slane %v7684_v29, %v9683_v4  ;;  %v6078_v31 = vadd.f32 1.0, %v8528_v18  ;;  %v8382_v9 = vld [vmem:[%s9258_s21 + $0x788] ss:$392 sps:$4 sm:$0xff]   ;;  %v8387_v28 = vld [vmem:[%s9258_s21 + $0xa94] ss:$392 sps:$4 sm:$0xff]  }
 0x2da   : > { %v6574_v20 = vrot.slane %v7685_v19, %v9683_v4  ;;  %v6080_v32 = vadd.f32 1.0, %v8530_v25  ;;  %5479 = vmatpush1.bf16.msra.mxu1 %v8361_v22  ;;  %5520 = vmatpush1.bf16.msra.mxu0 %v8364_v23 }
 0x2db   : > { %8539 = vrcp.f32 %v6078_v31  ;;  %5554 = vmatprep.subr.bf16.mxu1 %v8369_v24  ;;  %5595 = vmatprep.subr.bf16.mxu0 %v8372_v59  ;;  %v8385_v59 = vld [vmem:[%s9258_s21 + $0xa90] ss:$392 sps:$4 sm:$0xff]  }
 0x2dc   : > { %v6576_v38 = vcombine.low %v6567_v26, %v6574_v20  ;;  %8541 = vrcp.f32 %v6080_v32  ;;  %v8388_v20 = vld [vmem:[%s9258_s21 + $0xa98] ss:$392 sps:$4 sm:$0xff]   ;;  %v863_v32 = vunpack.c.h.bf16 %v9910_v62  ;;  %v8396_v62 = vld [vmem:[%s9258_s21 + $0x17c] ss:$392 sps:$4 sm:$0xff]  }
 0x2dd   : > { %8543 = vpow2.f32 %v5915_v52  ;;  %7667 = vmatmul.mubr.msk.bf16.vlgmr.msra.gmra.mrb[84].mxu1 %vm3746_vm2, %v9291_v35  ;;  %7668 = vmatmul.mubr.msk.bf16.vlgmr.msra.gmra.mrb[88].mxu0 %vm3746_vm2, %v9291_v35 }
 0x2de   : > { %v6590_v47 = vrot.slane %v6576_v38, %v9683_v4  ;;  %8545 = vpow2.f32 %v5919_v33  ;;  %5555 = vmatpush1.bf16.msra.mxu1 %v8367_v39  ;;  %5596 = vmatpush1.bf16.msra.mxu0 %v8370_v40  ;;  %v8532_v53 = vpop.eup %8531  ;;  %v8393_v39 = vld [vmem:[%s9258_s21 + $0x174] ss:$392 sps:$4 sm:$0xff]  }
 0x2df   : > { %5556 = vmatprep.subr.bf16.mxu1 %v8375_v43  ;;  %5597 = vmatprep.subr.bf16.mxu0 %v8378_v44  ;;  %v8534_v58 = vpop.eup %8533 }
 0x2e0   : > { %v6591_v51 = vcombine.low %v6583_v46, %v6590_v47  ;;  %v4440_v63 = vpop.f32.mrb[32].mxu1  ;;  %v4481_v0 = vpop.f32.mrb[36].mxu0  ;;  %5586 = vmatprep.mubr.bf16.mxu1 %v9020_v27  ;;  %5627 = vmatprep.mubr.bf16.mxu0 %v9020_v27  ;;  %v1051_v46 = vrot.slane %v863_v32, %v9584_v56  ;;  %v1059_v47 = vrot.slane %v863_v32, %v9587_v57 }
 0x2e1   : > { %v8536_v2 = vpop.eup %8535  ;;  %v4441_v3 = vadd.f32 %v4440_v63, %v1525_v48  ;;  %v4482_v5 = vadd.f32 %v4481_v0, %v1533_v50  ;;  %v4442_v6 = vpop.f32.mrb[33].mxu1  ;;  %v8391_v48 = vld [vmem:[%s9258_s21 + $0x170] ss:$392 sps:$4 sm:$0xff]  }
 0x2e2   : > { %7063 = vst [vmem:[%s9763_s30 + $0x10] sm:$0xff] %v6591_v51  ;;  %v4483_v7 = vpop.f32.mrb[37].mxu0  ;;  %v8538_v36 = vpop.eup %8537  ;;  %v6081_v45 = vadd.f32 1.0, %v8536_v2  ;;  %v4443_v10 = vadd.f32 %v4442_v6, %v1529_v15  ;;  %5557 = vmatpush1.bf16.msra.mxu1 %v8373_v30  ;;  %5598 = vmatpush1.bf16.msra.mxu0 %v8376_v8  ;;  %v8394_v50 = vld [vmem:[%s9258_s21 + $0x178] ss:$392 sps:$4 sm:$0xff]   ;;  %v1055_v51 = vrot.slane %v863_v32, %v9592_v60 }
 0x2e3   : > { %v4484_v11 = vadd.f32 %v4483_v7, %v1537_v21  ;;  %v4444_v12 = vpop.f32.mrb[34].mxu1  ;;  %v4485_v13 = vpop.f32.mrb[38].mxu0  ;;  %v6083_v29 = vadd.f32 1.0, %v8538_v36  ;;  %v5791_v16 = vsub.f32 0.0, %v4441_v3  ;;  %v5793_v17 = vsub.f32 0.0, %v4482_v5  ;;  %5558 = vmatprep.subr.bf16.mxu1 %v8381_v54  ;;  %5599 = vmatprep.subr.bf16.mxu0 %v8384_v55 }
 0x2e4   : > { %v4445_v18 = vpop.f32.mrb[35].mxu1  ;;  %v4486_v19 = vpop.f32.mrb[39].mxu0  ;;  %v5792_v24 = vsub.f32 0.0, %v4443_v10  ;;  %8547 = vrcp.f32 %v6081_v45  ;;  %v1063_v15 = vrot.slane %v863_v32, %v9595_v61  ;;  %v8399_v21 = vld [vmem:[%s9258_s21 + $0x484] ss:$392 sps:$4 sm:$0xff]   ;;  %v1541_v8 = vrot.slane %v1051_v46, %v9584_v56 }
 0x2e5   : > { %v8540_v14 = vpop.eup %8539  ;;  %v5794_v25 = vsub.f32 0.0, %v4484_v11  ;;  %v5921_v52 = vmul.f32 1.442695, %v5791_v16  ;;  %8549 = vrcp.f32 %v6083_v29  ;;  %v5925_v38 = vmul.f32 1.442695, %v5793_v17  ;;  %v9990_v12 = vld [vmem:[%s9575_s28 + $0x28] sm:$0xff] }
 0x2e6   : > { %v8542_v22 = vpop.eup %8541  ;;  %v7686_v23 = vpack.c.bf16 %v8540_v14, %v8532_v53  ;;  %5559 = vmatpush1.bf16.msra.mxu1 %v8379_v1  ;;  %5600 = vmatpush1.bf16.msra.mxu0 %v8382_v9  ;;  %v5923_v42 = vmul.f32 1.442695, %v5792_v24  ;;  %v8402_v30 = vld [vmem:[%s9258_s21 + $0x48c] ss:$392 sps:$4 sm:$0xff]   ;;  %v1549_v53 = vrot.slane %v1059_v47, %v9584_v56  ;;  %v1545_v54 = vrot.slane %v1055_v51, %v9584_v56  ;;  %v8400_v63 = vld [vmem:[%s9258_s21 + $0x488] ss:$392 sps:$4 sm:$0xff]  }
 0x2e7   : > { %v8544_v26 = vpop.eup %8543  ;;  %v7687_v31 = vpack.c.bf16 %v8542_v22, %v8534_v58  ;;  %8551 = vpow2.f32 %v5921_v52  ;;  %5560 = vmatprep.subr.bf16.mxu1 %v8387_v28  ;;  %5601 = vmatprep.subr.bf16.mxu0 %v8390_v49  ;;  %v5927_v43 = vmul.f32 1.442695, %v5794_v25  ;;  %v1553_v55 = vrot.slane %v1063_v15, %v9584_v56  ;;  %v8397_v58 = vld [vmem:[%s9258_s21 + $0x480] ss:$392 sps:$4 sm:$0xff]   ;;  %v8405_v1 = vld [vmem:[%s9258_s21 + $0x794] ss:$392 sps:$4 sm:$0xff]  }
 0x2e8   : > { %v8546_v33 = vpop.eup %8545  ;;  %v9956_v34 = vrot.slane %v7686_v23, %v9683_v4  ;;  %v6082_v37 = vadd.f32 1.0, %v8544_v26  ;;  %v8408_v2 = vld [vmem:[%s9258_s21 + $0x79c] ss:$392 sps:$4 sm:$0xff]   ;;  %v8403_v7 = vld [vmem:[%s9258_s21 + $0x790] ss:$392 sps:$4 sm:$0xff]   ;;  %v864_v32 = vunpack.c.l.bf16 %v9990_v12 }
 0x2e9   : > { %v9960_v40 = vrot.slane %v7687_v31, %v9683_v4  ;;  %v6084_v41 = vadd.f32 1.0, %v8546_v33  ;;  %v8406_v11 = vld [vmem:[%s9258_s21 + $0x798] ss:$392 sps:$4 sm:$0xff]   ;;  %v8411_v18 = vld [vmem:[%s9258_s21 + $0xaa4] ss:$392 sps:$4 sm:$0xff]  }
 0x2ea   : > { %8553 = vrcp.f32 %v6082_v37  ;;  %5561 = vmatpush1.bf16.msra.mxu1 %v8385_v59  ;;  %5602 = vmatpush1.bf16.msra.mxu0 %v8388_v20  ;;  %v8414_v31 = vld [vmem:[%s9258_s21 + $0xaac] ss:$392 sps:$4 sm:$0xff]   ;;  %v8412_v47 = vld [vmem:[%s9258_s21 + $0xaa8] ss:$392 sps:$4 sm:$0xff]  }
 0x2eb   : > { %v6624_v44 = vcombine.low %v9956_v34, %v9960_v40  ;;  %8555 = vrcp.f32 %v6084_v41  ;;  %5636 = vmatprep.subr.bf16.mxu1 %v8393_v39  ;;  %5677 = vmatprep.subr.bf16.mxu0 %v8396_v62  ;;  %v8409_v41 = vld [vmem:[%s9258_s21 + $0xaa0] ss:$392 sps:$4 sm:$0xff]   ;;  %v8417_v51 = vld [vmem:[%s9258_s21 + $0x184] ss:$392 sps:$4 sm:$0xff]  }
 0x2ec   : > { %8557 = vpow2.f32 %v5925_v38 }
 0x2ed   : > { %8559 = vpow2.f32 %v5923_v42  ;;  %7669 = vmatmul.mubr.msk.bf16.vlgmr.msra.gmra.mrb[88].mxu1 %vm3746_vm2, %v9291_v35  ;;  %7670 = vmatmul.mubr.msk.bf16.vlgmr.msra.gmra.mrb[92].mxu0 %vm3746_vm2, %v9291_v35 }
 0x2ee   : > { %8561 = vpow2.f32 %v5927_v43  ;;  %5637 = vmatpush1.bf16.msra.mxu1 %v8391_v48  ;;  %5678 = vmatpush1.bf16.msra.mxu0 %v8394_v50  ;;  %v8548_v0 = vpop.eup %8547 }
 0x2ef   : > { %5638 = vmatprep.subr.bf16.mxu1 %v8399_v21  ;;  %5679 = vmatprep.subr.bf16.mxu0 %v8402_v30  ;;  %v8550_v3 = vpop.eup %8549  ;;  %v1067_v30 = vrot.slane %v864_v32, %v9584_v56 }
 0x2f0   : > { %v4522_v5 = vpop.f32.mrb[36].mxu1  ;;  %v4563_v6 = vpop.f32.mrb[40].mxu0  ;;  %5668 = vmatprep.mubr.bf16.mxu1 %v9020_v27  ;;  %5709 = vmatprep.mubr.bf16.mxu0 %v9020_v27 }
 0x2f1   : > { %v8552_v9 = vpop.eup %8551  ;;  %v4523_v28 = vadd.f32 %v4522_v5, %v1541_v8  ;;  %v4564_v36 = vadd.f32 %v4563_v6, %v1549_v53  ;;  %v4524_v45 = vpop.f32.mrb[37].mxu1  ;;  %v1075_v53 = vrot.slane %v864_v32, %v9587_v57  ;;  %v1557_v34 = vrot.slane %v1067_v30, %v9584_v56  ;;  %v8418_v5 = vld [vmem:[%s9258_s21 + $0x490] ss:$392 sps:$4 sm:$0xff]   ;;  %v8423_v6 = vld [vmem:[%s9258_s21 + $0x7a4] ss:$392 sps:$4 sm:$0xff]  }
 0x2f2   : > { %v4565_v10 = vpop.f32.mrb[41].mxu0  ;;  %v6085_v49 = vadd.f32 1.0, %v8552_v9  ;;  %v4525_v14 = vadd.f32 %v4524_v45, %v1545_v54  ;;  %v4526_v16 = vpop.f32.mrb[38].mxu1  ;;  %5639 = vmatpush1.bf16.msra.mxu1 %v8397_v58  ;;  %5680 = vmatpush1.bf16.msra.mxu0 %v8400_v63  ;;  %v1071_v54 = vrot.slane %v864_v32, %v9592_v60  ;;  %v8415_v63 = vld [vmem:[%s9258_s21 + $0x180] ss:$392 sps:$4 sm:$0xff]  }
 0x2f3   : > { %v4566_v29 = vadd.f32 %v4565_v10, %v1553_v55  ;;  %v4567_v17 = vpop.f32.mrb[42].mxu0  ;;  %v5795_v23 = vsub.f32 0.0, %v4523_v28  ;;  %v5797_v24 = vsub.f32 0.0, %v4564_v36  ;;  %v4527_v25 = vpop.f32.mrb[39].mxu1  ;;  %5640 = vmatprep.subr.bf16.mxu1 %v8405_v1  ;;  %5681 = vmatprep.subr.bf16.mxu0 %v8408_v2  ;;  %v6632_v55 = vrot.slane %v6624_v44, %v9683_v4  ;;  %v8420_v1 = vld [vmem:[%s9258_s21 + $0x494] ss:$392 sps:$4 sm:$0xff]  }
 0x2f4   : > { %v8554_v13 = vpop.eup %8553  ;;  %v4568_v26 = vpop.f32.mrb[43].mxu0  ;;  %v5796_v20 = vsub.f32 0.0, %v4525_v14  ;;  %8563 = vrcp.f32 %v6085_v49  ;;  %v1565_v40 = vrot.slane %v1075_v53, %v9584_v56  ;;  %v1561_v44 = vrot.slane %v1071_v54, %v9584_v56  ;;  %v8426_v25 = vld [vmem:[%s9258_s21 + $0xab4] ss:$392 sps:$4 sm:$0xff]  }
 0x2f5   : > { %v8556_v19 = vpop.eup %8555  ;;  %v7688_v22 = vpack.c.bf16 %v8554_v13, %v8548_v0  ;;  %v5798_v39 = vsub.f32 0.0, %v4566_v29  ;;  %v5929_v46 = vmul.f32 1.442695, %v5795_v23  ;;  %v5933_v50 = vmul.f32 1.442695, %v5797_v24 }
 0x2f6   : > { %v8558_v52 = vpop.eup %8557  ;;  %v7689_v59 = vpack.c.bf16 %v8556_v19, %v8550_v3  ;;  %5641 = vmatpush1.bf16.msra.mxu1 %v8403_v7  ;;  %5682 = vmatpush1.bf16.msra.mxu0 %v8406_v11  ;;  %v5931_v21 = vmul.f32 1.442695, %v5796_v20  ;;  %v1079_v0 = vrot.slane %v864_v32, %v9595_v61 }
 0x2f7   : > { %v8560_v33 = vpop.eup %8559  ;;  %v6616_v37 = vrot.slane %v7688_v22, %v9683_v4  ;;  %v6087_v38 = vadd.f32 1.0, %v8558_v52  ;;  %5642 = vmatprep.subr.bf16.mxu1 %v8411_v18  ;;  %5683 = vmatprep.subr.bf16.mxu0 %v8414_v31  ;;  %v5935_v8 = vmul.f32 1.442695, %v5798_v39  ;;  %v8421_v18 = vld [vmem:[%s9258_s21 + $0x7a0] ss:$392 sps:$4 sm:$0xff]  }
 0x2f8   : > { %v8562_v42 = vpop.eup %8561  ;;  %v6623_v62 = vrot.slane %v7689_v59, %v9683_v4  ;;  %v6086_v43 = vadd.f32 1.0, %v8560_v33  ;;  %v1569_v3 = vrot.slane %v1079_v0, %v9584_v56 }
 0x2f9   : > { %8565 = vrcp.f32 %v6087_v38  ;;  %v6088_v48 = vadd.f32 1.0, %v8562_v42 }
 0x2fa   : > { %v6625_v15 = vcombine.low %v6616_v37, %v6623_v62  ;;  %8567 = vrcp.f32 %v6086_v43  ;;  %5643 = vmatpush1.bf16.msra.mxu1 %v8409_v41  ;;  %5684 = vmatpush1.bf16.msra.mxu0 %v8412_v47  ;;  %v865_v37 = vunpack.c.h.bf16 %v9990_v12  ;;  %v8424_v62 = vld [vmem:[%s9258_s21 + $0xab0] ss:$392 sps:$4 sm:$0xff]  }
 0x2fb   : > { %8569 = vrcp.f32 %v6088_v48  ;;  %5718 = vmatprep.subr.bf16.mxu1 %v8417_v51 }
 0x2fc   : > { %v6639_v58 = vrot.slane %v6625_v15, %v9683_v4  ;;  %8571 = vpow2.f32 %v5929_v46  ;;  %v1083_v15 = vrot.slane %v865_v37, %v9584_v56  ;;  %v1095_v53 = vrot.slane %v865_v37, %v9595_v61 }
 0x2fd   : > { %8573 = vpow2.f32 %v5933_v50  ;;  %7671 = vmatmul.mubr.msk.bf16.vlgmr.msra.gmra.mrb[92].mxu1 %vm3746_vm2, %v9291_v35  ;;  %7672 = vmatmul.mubr.msk.bf16.vlgmr.msra.gmra.mrb[96].mxu0 %vm3746_vm2, %v9291_v35 }
 0x2fe   : > { %v6640_v2 = vcombine.low %v6632_v55, %v6639_v58  ;;  %8575 = vpow2.f32 %v5931_v21  ;;  %5719 = vmatpush1.bf16.msra.mxu1 %v8415_v63  ;;  %5750 = vmatprep.mubr.bf16.mxu1 %v9020_v27  ;;  %v8564_v7 = vpop.eup %8563  ;;  %v1091_v21 = vrot.slane %v865_v37, %v9587_v57  ;;  %v1573_v54 = vrot.slane %v1083_v15, %v9584_v56 }
 0x2ff   : > { %8577 = vpow2.f32 %v5935_v8  ;;  %5720 = vmatprep.subr.bf16.mxu1 %v8420_v1  ;;  %v1087_v8 = vrot.slane %v865_v37, %v9592_v60  ;;  %v1585_v63 = vrot.slane %v1095_v53, %v9584_v56 }
 0x300   : > { %7064 = vst [vmem:[%s9763_s30 + $0x18] sm:$0xff] %v6640_v2  ;;  %v4604_v9 = vpop.f32.mrb[40].mxu1  ;;  %v4645_v28 = vpop.f32.mrb[44].mxu0  ;;  %v1581_v55 = vrot.slane %v1091_v21, %v9584_v56  ;;  %v10046_v2 = vld [vmem:[%s9575_s28 + $0x30] sm:$0xff] }
 0x301   : > { %v4605_v45 = vadd.f32 %v4604_v9, %v1557_v34  ;;  %v4646_v10 = vadd.f32 %v4645_v28, %v1565_v40  ;;  %v4606_v11 = vpop.f32.mrb[41].mxu1  ;;  %v4647_v13 = vpop.f32.mrb[45].mxu0  ;;  %v1577_v58 = vrot.slane %v1087_v8, %v9584_v56 }
 0x302   : > { %v4607_v14 = vadd.f32 %v4606_v11, %v1561_v44  ;;  %v4648_v29 = vadd.f32 %v4647_v13, %v1569_v3  ;;  %v4608_v16 = vpop.f32.mrb[42].mxu1  ;;  %v4649_v17 = vpop.f32.mrb[46].mxu0  ;;  %5721 = vmatpush1.bf16.msra.mxu1 %v8418_v5  ;;  %v866_v13 = vunpack.c.l.bf16 %v10046_v2 }
 0x303   : > { %v8566_v36 = vpop.eup %8565  ;;  %v5799_v22 = vsub.f32 0.0, %v4605_v45  ;;  %v4609_v23 = vpop.f32.mrb[43].mxu1  ;;  %5722 = vmatprep.subr.bf16.mxu1 %v8423_v6  ;;  %v5801_v52 = vsub.f32 0.0, %v4646_v10 }
 0x304   : > { %v8568_v49 = vpop.eup %8567  ;;  %v4650_v24 = vpop.f32.mrb[47].mxu0  ;;  %v5800_v33 = vsub.f32 0.0, %v4607_v14  ;;  %v5802_v42 = vsub.f32 0.0, %v4648_v29  ;;  %v1107_v37 = vrot.slane %v866_v13, %v9587_v57 }
 0x305   : > { %v8570_v27 = vpop.eup %8569  ;;  %v7690_v19 = vpack.c.bf16 %v8568_v49, %v8564_v7  ;;  %v5937_v47 = vmul.f32 1.442695, %v5799_v22  ;;  %v5941_v51 = vmul.f32 1.442695, %v5801_v52  ;;  %v1099_v52 = vrot.slane %v866_v13, %v9584_v56 }
 0x306   : > { %v8572_v26 = vpop.eup %8571  ;;  %v7691_v31 = vpack.c.bf16 %v8570_v27, %v8566_v36  ;;  %5723 = vmatpush1.bf16.msra.mxu1 %v8421_v18  ;;  %v5939_v12 = vmul.f32 1.442695, %v5800_v33  ;;  %v5943_v30 = vmul.f32 1.442695, %v5802_v42  ;;  %v1597_v15 = vrot.slane %v1107_v37, %v9584_v56 }
 0x307   : > { %v8574_v59 = vpop.eup %8573  ;;  %v10026_v20 = vrot.slane %v7690_v19, %v9683_v4  ;;  %v6089_v32 = vadd.f32 1.0, %v8572_v26  ;;  %5724 = vmatprep.subr.bf16.mxu1 %v8426_v25 }
 0x308   : > { %v8576_v38 = vpop.eup %8575  ;;  %v10030_v39 = vrot.slane %v7691_v31, %v9683_v4  ;;  %v6091_v41 = vadd.f32 1.0, %v8574_v59 }
 0x309   : > { %v8578_v43 = vpop.eup %8577  ;;  %8579 = vrcp.f32 %v6089_v32  ;;  %v6090_v46 = vadd.f32 1.0, %v8576_v38 }
 0x30a   : > { %v6673_v48 = vcombine.low %v10026_v20, %v10030_v39  ;;  %8581 = vrcp.f32 %v6091_v41  ;;  %v6092_v50 = vadd.f32 1.0, %v8578_v43  ;;  %5725 = vmatpush1.bf16.msra.mxu1 %v8424_v62  ;;  %v1103_v43 = vrot.slane %v866_v13, %v9592_v60 }
 0x30b   : > { %8583 = vrcp.f32 %v6090_v46  ;;  %v1111_v46 = vrot.slane %v866_v13, %v9595_v61 }
 0x30c   : > { %8585 = vrcp.f32 %v6092_v50  ;;  %v1593_v21 = vrot.slane %v1103_v43, %v9584_v56 }
 0x30d   : > { %8587 = vpow2.f32 %v5937_v47  ;;  %7673 = vmatmul.mubr.msk.bf16.vlgmr.msra.gmra.mrb[96].mxu1 %vm3746_vm2, %v9291_v35  ;;  %v6681_v47 = vrot.slane %v6673_v48, %v9683_v4 }
 0x30e   : > { %8589 = vpow2.f32 %v5941_v51 }
 0x30f   : > { %8591 = vpow2.f32 %v5939_v12  ;;  %v1589_v12 = vrot.slane %v1099_v52, %v9584_v56 }
 0x310   : > { %8593 = vpow2.f32 %v5943_v30  ;;  %v4686_v0 = vpop.f32.mrb[44].mxu1  ;;  %v4727_v1 = vpop.f32.mrb[48].mxu0  ;;  %v1601_v30 = vrot.slane %v1111_v46, %v9584_v56 }
 0x311   : > { %v4687_v40 = vadd.f32 %v4686_v0, %v1573_v54  ;;  %v4728_v44 = vadd.f32 %v4727_v1, %v1581_v55  ;;  %v4688_v3 = vpop.f32.mrb[45].mxu1  ;;  %v4729_v5 = vpop.f32.mrb[49].mxu0 }
 0x312   : > { %v4689_v35 = vadd.f32 %v4688_v3, %v1577_v58  ;;  %v4730_v7 = vadd.f32 %v4729_v5, %v1585_v63  ;;  %v4690_v9 = vpop.f32.mrb[46].mxu1  ;;  %v4731_v28 = vpop.f32.mrb[50].mxu0 }
 0x313   : > { %v8580_v34 = vpop.eup %8579  ;;  %v5803_v45 = vsub.f32 0.0, %v4687_v40  ;;  %v4691_v10 = vpop.f32.mrb[47].mxu1  ;;  %v5805_v29 = vsub.f32 0.0, %v4728_v44 }
 0x314   : > { %v8582_v6 = vpop.eup %8581  ;;  %v4732_v11 = vpop.f32.mrb[51].mxu0  ;;  %v5804_v27 = vsub.f32 0.0, %v4689_v35  ;;  %v5806_v24 = vsub.f32 0.0, %v4730_v7  ;;  %v867_v7 = vunpack.c.h.bf16 %v10046_v2 }
 0x315   : > { %v8584_v36 = vpop.eup %8583  ;;  %v5945_v18 = vmul.f32 1.442695, %v5803_v45  ;;  %v5949_v33 = vmul.f32 1.442695, %v5805_v29 }
 0x316   : > { %v8586_v49 = vpop.eup %8585  ;;  %v7692_v14 = vpack.c.bf16 %v8584_v36, %v8580_v34  ;;  %v5947_v42 = vmul.f32 1.442695, %v5804_v27  ;;  %v5951_v62 = vmul.f32 1.442695, %v5806_v24  ;;  %v1127_v52 = vrot.slane %v867_v7, %v9595_v61 }
 0x317   : > { %v8588_v16 = vpop.eup %8587  ;;  %v7693_v17 = vpack.c.bf16 %v8586_v49, %v8582_v6  ;;  %8595 = vpow2.f32 %v5945_v18  ;;  %v1115_v18 = vrot.slane %v867_v7, %v9584_v56 }
 0x318   : > { %v8590_v19 = vpop.eup %8589  ;;  %v6665_v22 = vrot.slane %v7692_v14, %v9683_v4  ;;  %v6093_v23 = vadd.f32 1.0, %v8588_v16  ;;  %v1617_v37 = vrot.slane %v1127_v52, %v9584_v56 }
 0x319   : > { %v8592_v25 = vpop.eup %8591  ;;  %v6672_v26 = vrot.slane %v7693_v17, %v9683_v4  ;;  %v6095_v31 = vadd.f32 1.0, %v8590_v19 }
 0x31a   : > { %v8594_v59 = vpop.eup %8593  ;;  %8597 = vrcp.f32 %v6093_v23  ;;  %v6094_v32 = vadd.f32 1.0, %v8592_v25  ;;  %v1123_v25 = vrot.slane %v867_v7, %v9587_v57 }
 0x31b   : > { %v6674_v38 = vcombine.low %v6665_v22, %v6672_v26  ;;  %8599 = vrcp.f32 %v6095_v31  ;;  %v6096_v41 = vadd.f32 1.0, %v8594_v59  ;;  %v1119_v31 = vrot.slane %v867_v7, %v9592_v60 }
 0x31c   : > { %8601 = vrcp.f32 %v6094_v32  ;;  %v1605_v59 = vrot.slane %v1115_v18, %v9584_v56  ;;  %v1613_v32 = vrot.slane %v1123_v25, %v9584_v56 }
 0x31d   : > { %v6688_v50 = vrot.slane %v6674_v38, %v9683_v4  ;;  %8603 = vrcp.f32 %v6096_v41 }
 0x31e   : > { %8605 = vpow2.f32 %v5949_v33  ;;  %v1609_v33 = vrot.slane %v1119_v31, %v9584_v56 }
 0x31f   : > { %v6689_v51 = vcombine.low %v6681_v47, %v6688_v50  ;;  %8607 = vpow2.f32 %v5947_v42 }
 0x320   : > { %8609 = vpow2.f32 %v5951_v62  ;;  %v4768_v8 = vpop.f32.mrb[48].mxu1  ;;  %v4809_v53 = vpop.f32.mrb[52].mxu0 }
 0x321   : > { %7065 = vst [vmem:[%s9763_s30 + $0x20] sm:$0xff] %v6689_v51  ;;  %v8596_v20 = vpop.eup %8595  ;;  %v4769_v39 = vadd.f32 %v4768_v8, %v1589_v12  ;;  %v4810_v48 = vadd.f32 %v4809_v53, %v1597_v15  ;;  %v4770_v54 = vpop.f32.mrb[49].mxu1  ;;  %v10083_v51 = vld [vmem:[%s9575_s28 + $0x38] sm:$0xff] }
 0x322   : > { %v4811_v55 = vpop.f32.mrb[53].mxu0  ;;  %v6097_v63 = vadd.f32 1.0, %v8596_v20  ;;  %v4771_v0 = vadd.f32 %v4770_v54, %v1593_v21  ;;  %v4772_v34 = vpop.f32.mrb[50].mxu1 }
 0x323   : > { %v4812_v1 = vadd.f32 %v4811_v55, %v1601_v30  ;;  %v4813_v40 = vpop.f32.mrb[54].mxu0  ;;  %v5807_v3 = vsub.f32 0.0, %v4769_v39  ;;  %v5809_v5 = vsub.f32 0.0, %v4810_v48  ;;  %v4773_v6 = vpop.f32.mrb[51].mxu1  ;;  %v868_v34 = vunpack.c.l.bf16 %v10083_v51 }
 0x324   : > { %v8598_v58 = vpop.eup %8597  ;;  %v4814_v35 = vpop.f32.mrb[55].mxu0  ;;  %v5808_v28 = vsub.f32 0.0, %v4771_v0  ;;  %8611 = vrcp.f32 %v6097_v63 }
 0x325   : > { %v8600_v44 = vpop.eup %8599  ;;  %v5953_v10 = vmul.f32 1.442695, %v5807_v3  ;;  %v5957_v11 = vmul.f32 1.442695, %v5809_v5  ;;  %v5810_v13 = vsub.f32 0.0, %v4812_v1 }
 0x326   : > { %v8602_v9 = vpop.eup %8601  ;;  %v5955_v22 = vmul.f32 1.442695, %v5808_v28 }
 0x327   : > { %v8604_v36 = vpop.eup %8603  ;;  %v7694_v45 = vpack.c.bf16 %v8602_v9, %v8598_v58  ;;  %8613 = vpow2.f32 %v5953_v10  ;;  %v5959_v24 = vmul.f32 1.442695, %v5810_v13  ;;  %v1131_v13 = vrot.slane %v868_v34, %v9584_v56 }
 0x328   : > { %v8606_v49 = vpop.eup %8605  ;;  %v7695_v14 = vpack.c.bf16 %v8604_v36, %v8600_v44  ;;  %8615 = vpow2.f32 %v5957_v11 }
 0x329   : > { %v8608_v29 = vpop.eup %8607  ;;  %v10067_v16 = vrot.slane %v7694_v45, %v9683_v4  ;;  %v6099_v17 = vadd.f32 1.0, %v8606_v49  ;;  %v1139_v49 = vrot.slane %v868_v34, %v9587_v57 }
 0x32a   : > { %v8610_v27 = vpop.eup %8609  ;;  %v10071_v2 = vrot.slane %v7695_v14, %v9683_v4  ;;  %v6098_v19 = vadd.f32 1.0, %v8608_v29  ;;  %v1135_v29 = vrot.slane %v868_v34, %v9592_v60 }
 0x32b   : > { %8617 = vrcp.f32 %v6099_v17  ;;  %v6100_v23 = vadd.f32 1.0, %v8610_v27  ;;  %v1621_v27 = vrot.slane %v1131_v13, %v9584_v56 }
 0x32c   : > { %v6722_v26 = vcombine.low %v10067_v16, %v10071_v2  ;;  %8619 = vrcp.f32 %v6098_v19  ;;  %v1143_v16 = vrot.slane %v868_v34, %v9595_v61  ;;  %v1629_v2 = vrot.slane %v1139_v49, %v9584_v56 }
 0x32d   : > { %8621 = vrcp.f32 %v6100_v23 }
 0x32e   : > { %8623 = vpow2.f32 %v5955_v22  ;;  %v8612_v38 = vpop.eup %8611  ;;  %v6730_v17 = vrot.slane %v6722_v26, %v9683_v4  ;;  %v1625_v22 = vrot.slane %v1135_v29, %v9584_v56  ;;  %v1633_v23 = vrot.slane %v1143_v16, %v9584_v56 }
 0x32f   : > { %8625 = vpow2.f32 %v5959_v24 }
 0x330   : > { %v4850_v41 = vpop.f32.mrb[52].mxu1  ;;  %v4891_v42 = vpop.f32.mrb[56].mxu0 }
 0x331   : > { %v8614_v62 = vpop.eup %8613  ;;  %v4851_v43 = vadd.f32 %v4850_v41, %v1605_v59  ;;  %v4892_v46 = vadd.f32 %v4891_v42, %v1613_v32  ;;  %v4852_v47 = vpop.f32.mrb[53].mxu1 }
 0x332   : > { %v4893_v50 = vpop.f32.mrb[57].mxu0  ;;  %v8616_v12 = vpop.eup %8615  ;;  %v6101_v15 = vadd.f32 1.0, %v8614_v62  ;;  %v4853_v21 = vadd.f32 %v4852_v47, %v1609_v33 }
 0x333   : > { %v4894_v30 = vadd.f32 %v4893_v50, %v1617_v37  ;;  %v4854_v8 = vpop.f32.mrb[54].mxu1  ;;  %v4895_v53 = vpop.f32.mrb[58].mxu0  ;;  %v6103_v39 = vadd.f32 1.0, %v8616_v12  ;;  %v5811_v48 = vsub.f32 0.0, %v4851_v43  ;;  %v5813_v54 = vsub.f32 0.0, %v4892_v46 }
 0x334   : > { %v4855_v55 = vpop.f32.mrb[55].mxu1  ;;  %v4896_v58 = vpop.f32.mrb[59].mxu0  ;;  %v5812_v0 = vsub.f32 0.0, %v4853_v21  ;;  %8627 = vrcp.f32 %v6101_v15 }
 0x335   : > { %v8618_v20 = vpop.eup %8617  ;;  %v5814_v1 = vsub.f32 0.0, %v4894_v30  ;;  %v5961_v3 = vmul.f32 1.442695, %v5811_v48  ;;  %v5965_v5 = vmul.f32 1.442695, %v5813_v54  ;;  %8629 = vrcp.f32 %v6103_v39 }
 0x336   : > { %v8620_v63 = vpop.eup %8619  ;;  %v5963_v36 = vmul.f32 1.442695, %v5812_v0  ;;  %v869_v58 = vunpack.c.h.bf16 %v10083_v51 }
 0x337   : > { %v8622_v40 = vpop.eup %8621  ;;  %v7696_v44 = vpack.c.bf16 %v8620_v63, %v8612_v38  ;;  %8631 = vpow2.f32 %v5961_v3  ;;  %v5967_v11 = vmul.f32 1.442695, %v5814_v1 }
 0x338   : > { %v8624_v6 = vpop.eup %8623  ;;  %v7697_v35 = vpack.c.bf16 %v8622_v40, %v8618_v20  ;;  %8633 = vpow2.f32 %v5965_v5  ;;  %v1147_v51 = vrot.slane %v869_v58, %v9584_v56 }
 0x339   : > { %v8626_v7 = vpop.eup %8625  ;;  %v6714_v9 = vrot.slane %v7696_v44, %v9683_v4  ;;  %v6102_v28 = vadd.f32 1.0, %v8624_v6 }
 0x33a   : > { %v6721_v45 = vrot.slane %v7697_v35, %v9683_v4  ;;  %v6104_v10 = vadd.f32 1.0, %v8626_v7  ;;  %v1155_v35 = vrot.slane %v869_v58, %v9587_v57  ;;  %v1151_v7 = vrot.slane %v869_v58, %v9592_v60 }
 0x33b   : > { %8635 = vrcp.f32 %v6102_v28  ;;  %v1637_v28 = vrot.slane %v1147_v51, %v9584_v56 }
 0x33c   : > { %v6723_v14 = vcombine.low %v6714_v9, %v6721_v45  ;;  %8637 = vrcp.f32 %v6104_v10  ;;  %v1159_v9 = vrot.slane %v869_v58, %v9595_v61  ;;  %v1641_v45 = vrot.slane %v1151_v7, %v9584_v56 }
 0x33d   : > { %8639 = vpow2.f32 %v5963_v36  ;;  %v1645_v36 = vrot.slane %v1155_v35, %v9584_v56 }
 0x33e   : > { %v6737_v18 = vrot.slane %v6723_v14, %v9683_v4  ;;  %8641 = vpow2.f32 %v5967_v11  ;;  %v8628_v24 = vpop.eup %8627  ;;  %v1649_v10 = vrot.slane %v1159_v9, %v9584_v56 }
 0x33f   : > { %v8630_v25 = vpop.eup %8629 }
 0x340   : > { %v6738_v19 = vcombine.low %v6730_v17, %v6737_v18  ;;  %v4932_v31 = vpop.f32.mrb[56].mxu1  ;;  %v4973_v52 = vpop.f32.mrb[60].mxu0 }
 0x341   : > { %v8632_v59 = vpop.eup %8631  ;;  %v4933_v32 = vadd.f32 %v4932_v31, %v1621_v27  ;;  %v4974_v26 = vadd.f32 %v4973_v52, %v1629_v2  ;;  %v4934_v33 = vpop.f32.mrb[57].mxu1  ;;  %v10117_v2 = vld [vmem:[%s9575_s28 + $0x40] sm:$0xff] }
 0x342   : > { %7066 = vst [vmem:[%s9763_s30 + $0x28] sm:$0xff] %v6738_v19  ;;  %v4975_v37 = vpop.f32.mrb[61].mxu0  ;;  %v8634_v38 = vpop.eup %8633  ;;  %v6105_v41 = vadd.f32 1.0, %v8632_v59  ;;  %v4935_v42 = vadd.f32 %v4934_v33, %v1625_v22 }
 0x343   : > { %v4976_v62 = vadd.f32 %v4975_v37, %v1633_v23  ;;  %v4936_v43 = vpop.f32.mrb[58].mxu1  ;;  %v4977_v46 = vpop.f32.mrb[62].mxu0  ;;  %v6107_v50 = vadd.f32 1.0, %v8634_v38  ;;  %v5815_v12 = vsub.f32 0.0, %v4933_v32  ;;  %v5817_v15 = vsub.f32 0.0, %v4974_v26 }
 0x344   : > { %v4937_v21 = vpop.f32.mrb[59].mxu1  ;;  %v4978_v30 = vpop.f32.mrb[63].mxu0  ;;  %v5816_v20 = vsub.f32 0.0, %v4935_v42  ;;  %8643 = vrcp.f32 %v6105_v41 }
 0x345   : > { %v8636_v47 = vpop.eup %8635  ;;  %v5818_v39 = vsub.f32 0.0, %v4976_v62  ;;  %v5969_v55 = vmul.f32 1.442695, %v5815_v12  ;;  %8645 = vrcp.f32 %v6107_v50  ;;  %v5973_v34 = vmul.f32 1.442695, %v5817_v15 }
 0x346   : > { %v8638_v8 = vpop.eup %8637  ;;  %v7698_v53 = vpack.c.bf16 %v8636_v47, %v8628_v24  ;;  %v5971_v3 = vmul.f32 1.442695, %v5816_v20  ;;  %v870_v62 = vunpack.c.l.bf16 %v10117_v2 }
 0x347   : > { %v8640_v48 = vpop.eup %8639  ;;  %v7699_v54 = vpack.c.bf16 %v8638_v8, %v8630_v25  ;;  %8647 = vpow2.f32 %v5969_v55  ;;  %v5975_v5 = vmul.f32 1.442695, %v5818_v39 }
 0x348   : > { %v8642_v63 = vpop.eup %8641  ;;  %v10101_v0 = vrot.slane %v7698_v53, %v9683_v4  ;;  %v6106_v1 = vadd.f32 1.0, %v8640_v48  ;;  %v1163_v48 = vrot.slane %v870_v62, %v9584_v56  ;;  %v1171_v55 = vrot.slane %v870_v62, %v9587_v57 }
 0x349   : > { %v10104_v40 = vrot.slane %v7699_v54, %v9683_v4  ;;  %v6108_v44 = vadd.f32 1.0, %v8642_v63  ;;  %v1167_v58 = vrot.slane %v870_v62, %v9592_v60 }
 0x34a   : > { %8649 = vrcp.f32 %v6106_v1  ;;  %v1175_v1 = vrot.slane %v870_v62, %v9595_v61 }
 0x34b   : > { %v6771_v6 = vcombine.low %v10101_v0, %v10104_v40  ;;  %8651 = vrcp.f32 %v6108_v44  ;;  %v1653_v40 = vrot.slane %v1163_v48, %v9584_v56  ;;  %v1661_v44 = vrot.slane %v1171_v55, %v9584_v56 }
 0x34c   : > { %8653 = vpow2.f32 %v5973_v34 }
 0x34d   : > { %8655 = vpow2.f32 %v5971_v3  ;;  %v6779_v63 = vrot.slane %v6771_v6, %v9683_v4  ;;  %v1657_v3 = vrot.slane %v1167_v58, %v9584_v56 }
 0x34e   : > { %8657 = vpow2.f32 %v5975_v5  ;;  %v8644_v11 = vpop.eup %8643  ;;  %v1665_v5 = vrot.slane %v1175_v1, %v9584_v56 }
 0x34f   : > { %v8646_v13 = vpop.eup %8645 }
 0x350   : > { %v5014_v49 = vpop.f32.mrb[60].mxu1  ;;  %v5055_v14 = vpop.f32.mrb[64].mxu0 }
 0x351   : > { %v8648_v29 = vpop.eup %8647  ;;  %v5015_v16 = vadd.f32 %v5014_v49, %v1637_v28  ;;  %v5056_v17 = vadd.f32 %v5055_v14, %v1645_v36  ;;  %v5016_v18 = vpop.f32.mrb[61].mxu1 }
 0x352   : > { %v5057_v27 = vpop.f32.mrb[65].mxu0  ;;  %v6109_v22 = vadd.f32 1.0, %v8648_v29  ;;  %v5017_v23 = vadd.f32 %v5016_v18, %v1641_v45  ;;  %v5018_v25 = vpop.f32.mrb[62].mxu1 }
 0x353   : > { %v5058_v24 = vadd.f32 %v5057_v27, %v1649_v10  ;;  %v5059_v31 = vpop.f32.mrb[66].mxu0  ;;  %v5819_v32 = vsub.f32 0.0, %v5015_v16  ;;  %v5821_v26 = vsub.f32 0.0, %v5056_v17  ;;  %v5019_v33 = vpop.f32.mrb[63].mxu1 }
 0x354   : > { %v8650_v19 = vpop.eup %8649  ;;  %v5060_v37 = vpop.f32.mrb[67].mxu0  ;;  %v5820_v42 = vsub.f32 0.0, %v5017_v23  ;;  %8659 = vrcp.f32 %v6109_v22 }
 0x355   : > { %v8652_v52 = vpop.eup %8651  ;;  %v7700_v59 = vpack.c.bf16 %v8650_v19, %v8644_v11  ;;  %v5822_v50 = vsub.f32 0.0, %v5058_v24  ;;  %v5977_v30 = vmul.f32 1.442695, %v5819_v32  ;;  %v5981_v53 = vmul.f32 1.442695, %v5821_v26 }
 0x356   : > { %v8654_v38 = vpop.eup %8653  ;;  %v7701_v41 = vpack.c.bf16 %v8652_v52, %v8646_v13  ;;  %v5979_v39 = vmul.f32 1.442695, %v5820_v42 }
 0x357   : > { %v8656_v43 = vpop.eup %8655  ;;  %v6763_v46 = vrot.slane %v7700_v59, %v9683_v4  ;;  %v6111_v47 = vadd.f32 1.0, %v8654_v38  ;;  %v5983_v54 = vmul.f32 1.442695, %v5822_v50  ;;  %v871_v59 = vunpack.c.h.bf16 %v10117_v2 }
 0x358   : > { %v8658_v12 = vpop.eup %8657  ;;  %v6770_v15 = vrot.slane %v7701_v41, %v9683_v4  ;;  %v6110_v21 = vadd.f32 1.0, %v8656_v43 }
 0x359   : > { %8661 = vrcp.f32 %v6111_v47  ;;  %v6112_v8 = vadd.f32 1.0, %v8658_v12  ;;  %v1179_v2 = vrot.slane %v871_v59, %v9584_v56  ;;  %v1187_v50 = vrot.slane %v871_v59, %v9587_v57 }
 0x35a   : > { %v6772_v20 = vcombine.low %v6763_v46, %v6770_v15  ;;  %8663 = vrcp.f32 %v6110_v21  ;;  %v1183_v15 = vrot.slane %v871_v59, %v9592_v60  ;;  %v1191_v21 = vrot.slane %v871_v59, %v9595_v61 }
 0x35b   : > { %8665 = vrcp.f32 %v6112_v8  ;;  %v1677_v8 = vrot.slane %v1187_v50, %v9584_v56 }
 0x35c   : > { %v6786_v0 = vrot.slane %v6772_v20, %v9683_v4  ;;  %8667 = vpow2.f32 %v5977_v30  ;;  %v1669_v30 = vrot.slane %v1179_v2, %v9584_v56  ;;  %v1681_v20 = vrot.slane %v1191_v21, %v9584_v56 }
 0x35d   : > { %8669 = vpow2.f32 %v5981_v53  ;;  %v1673_v53 = vrot.slane %v1183_v15, %v9584_v56 }
 0x35e   : > { %v6787_v34 = vcombine.low %v6779_v63, %v6786_v0  ;;  %8671 = vpow2.f32 %v5979_v39  ;;  %v8660_v51 = vpop.eup %8659 }
 0x35f   : > { %8673 = vpow2.f32 %v5983_v54  ;;  %v10151_v54 = vld [vmem:[%s9575_s28 + $0x48] sm:$0xff] }
 0x360   : > { %7067 = vst [vmem:[%s9763_s30 + $0x30] sm:$0xff] %v6787_v34  ;;  %v5096_v6 = vpop.f32.mrb[64].mxu1  ;;  %v5137_v35 = vpop.f32.mrb[68].mxu0 }
 0x361   : > { %v5097_v9 = vadd.f32 %v5096_v6, %v1653_v40  ;;  %v5138_v28 = vadd.f32 %v5137_v35, %v1661_v44  ;;  %v5098_v36 = vpop.f32.mrb[65].mxu1  ;;  %v5139_v45 = vpop.f32.mrb[69].mxu0 }
 0x362   : > { %v5099_v11 = vadd.f32 %v5098_v36, %v1657_v3  ;;  %v5140_v13 = vadd.f32 %v5139_v45, %v1665_v5  ;;  %v5100_v49 = vpop.f32.mrb[66].mxu1  ;;  %v5141_v14 = vpop.f32.mrb[70].mxu0 }
 0x363   : > { %v8662_v7 = vpop.eup %8661  ;;  %v5823_v17 = vsub.f32 0.0, %v5097_v9  ;;  %v5101_v18 = vpop.f32.mrb[67].mxu1  ;;  %v5825_v23 = vsub.f32 0.0, %v5138_v28  ;;  %v872_v9 = vunpack.c.l.bf16 %v10151_v54 }
 0x364   : > { %v8664_v10 = vpop.eup %8663  ;;  %v5142_v27 = vpop.f32.mrb[71].mxu0  ;;  %v5824_v52 = vsub.f32 0.0, %v5099_v11  ;;  %v5826_v37 = vsub.f32 0.0, %v5140_v13 }
 0x365   : > { %v8666_v29 = vpop.eup %8665  ;;  %v7702_v16 = vpack.c.bf16 %v8664_v10, %v8660_v51  ;;  %v5985_v42 = vmul.f32 1.442695, %v5823_v17  ;;  %v5989_v46 = vmul.f32 1.442695, %v5825_v23 }
 0x366   : > { %v8668_v19 = vpop.eup %8667  ;;  %v7703_v22 = vpack.c.bf16 %v8666_v29, %v8662_v7  ;;  %v5987_v47 = vmul.f32 1.442695, %v5824_v52  ;;  %v5991_v12 = vmul.f32 1.442695, %v5826_v37  ;;  %v1203_v52 = vrot.slane %v872_v9, %v9587_v57 }
 0x367   : > { %v8670_v24 = vpop.eup %8669  ;;  %v10134_v25 = vrot.slane %v7702_v16, %v9683_v4  ;;  %v6113_v31 = vadd.f32 1.0, %v8668_v19 }
 0x368   : > { %v8672_v32 = vpop.eup %8671  ;;  %v10138_v26 = vrot.slane %v7703_v22, %v9683_v4  ;;  %v6115_v33 = vadd.f32 1.0, %v8670_v24  ;;  %v1195_v22 = vrot.slane %v872_v9, %v9584_v56  ;;  %v1693_v2 = vrot.slane %v1203_v52, %v9584_v56 }
 0x369   : > { %v8674_v38 = vpop.eup %8673  ;;  %8675 = vrcp.f32 %v6113_v31  ;;  %v6114_v41 = vadd.f32 1.0, %v8672_v32 }
 0x36a   : > { %v6820_v62 = vcombine.low %v10134_v25, %v10138_v26  ;;  %8677 = vrcp.f32 %v6115_v33  ;;  %v6116_v43 = vadd.f32 1.0, %v8674_v38  ;;  %v1199_v38 = vrot.slane %v872_v9, %v9592_v60 }
 0x36b   : > { %8679 = vrcp.f32 %v6114_v41  ;;  %v1207_v41 = vrot.slane %v872_v9, %v9595_v61 }
 0x36c   : > { %8681 = vrcp.f32 %v6116_v43  ;;  %v1689_v50 = vrot.slane %v1199_v38, %v9584_v56 }
 0x36d   : > { %8683 = vpow2.f32 %v5985_v42  ;;  %v6828_v42 = vrot.slane %v6820_v62, %v9683_v4 }
 0x36e   : > { %8685 = vpow2.f32 %v5989_v46 }
 0x36f   : > { %8687 = vpow2.f32 %v5987_v47  ;;  %v1685_v47 = vrot.slane %v1195_v22, %v9584_v56 }
 0x370   : > { %8689 = vpow2.f32 %v5991_v12  ;;  %v5178_v39 = vpop.f32.mrb[68].mxu1  ;;  %v5219_v48 = vpop.f32.mrb[72].mxu0  ;;  %v1697_v12 = vrot.slane %v1207_v41, %v9584_v56 }
 0x371   : > { %v5179_v58 = vadd.f32 %v5178_v39, %v1669_v30  ;;  %v5220_v63 = vadd.f32 %v5219_v48, %v1677_v8  ;;  %v5180_v0 = vpop.f32.mrb[69].mxu1  ;;  %v5221_v1 = vpop.f32.mrb[73].mxu0 }
 0x372   : > { %v5181_v40 = vadd.f32 %v5180_v0, %v1673_v53  ;;  %v5222_v44 = vadd.f32 %v5221_v1, %v1681_v20  ;;  %v5182_v3 = vpop.f32.mrb[70].mxu1  ;;  %v5223_v5 = vpop.f32.mrb[74].mxu0 }
 0x373   : > { %v8676_v55 = vpop.eup %8675  ;;  %v5827_v6 = vsub.f32 0.0, %v5179_v58  ;;  %v5183_v35 = vpop.f32.mrb[71].mxu1  ;;  %v5829_v45 = vsub.f32 0.0, %v5220_v63 }
 0x374   : > { %v8678_v34 = vpop.eup %8677  ;;  %v5224_v7 = vpop.f32.mrb[75].mxu0  ;;  %v5828_v49 = vsub.f32 0.0, %v5181_v40  ;;  %v5830_v17 = vsub.f32 0.0, %v5222_v44  ;;  %v873_v44 = vunpack.c.h.bf16 %v10151_v54 }
 0x375   : > { %v8680_v51 = vpop.eup %8679  ;;  %v5993_v13 = vmul.f32 1.442695, %v5827_v6  ;;  %v5997_v31 = vmul.f32 1.442695, %v5829_v45 }
 0x376   : > { %v8682_v28 = vpop.eup %8681  ;;  %v7704_v36 = vpack.c.bf16 %v8680_v51, %v8676_v55  ;;  %v5995_v33 = vmul.f32 1.442695, %v5828_v49  ;;  %v5999_v37 = vmul.f32 1.442695, %v5830_v17  ;;  %v1223_v22 = vrot.slane %v873_v44, %v9595_v61 }
 0x377   : > { %v8684_v10 = vpop.eup %8683  ;;  %v7705_v11 = vpack.c.bf16 %v8682_v28, %v8678_v34  ;;  %8691 = vpow2.f32 %v5993_v13  ;;  %v1211_v13 = vrot.slane %v873_v44, %v9584_v56 }
 0x378   : > { %v8686_v14 = vpop.eup %8685  ;;  %v6812_v29 = vrot.slane %v7704_v36, %v9683_v4  ;;  %v6117_v16 = vadd.f32 1.0, %v8684_v10  ;;  %v1713_v52 = vrot.slane %v1223_v22, %v9584_v56 }
 0x379   : > { %v8688_v18 = vpop.eup %8687  ;;  %v6819_v27 = vrot.slane %v7705_v11, %v9683_v4  ;;  %v6119_v19 = vadd.f32 1.0, %v8686_v14 }
 0x37a   : > { %v8690_v23 = vpop.eup %8689  ;;  %8693 = vrcp.f32 %v6117_v16  ;;  %v6118_v24 = vadd.f32 1.0, %v8688_v18  ;;  %v1219_v18 = vrot.slane %v873_v44, %v9587_v57 }
 0x37b   : > { %v6821_v59 = vcombine.low %v6812_v29, %v6819_v27  ;;  %8695 = vrcp.f32 %v6119_v19  ;;  %v6120_v32 = vadd.f32 1.0, %v8690_v23  ;;  %v1215_v19 = vrot.slane %v873_v44, %v9592_v60 }
 0x37c   : > { %8697 = vrcp.f32 %v6118_v24  ;;  %v1701_v23 = vrot.slane %v1211_v13, %v9584_v56  ;;  %v1709_v24 = vrot.slane %v1219_v18, %v9584_v56 }
 0x37d   : > { %v6835_v43 = vrot.slane %v6821_v59, %v9683_v4  ;;  %8699 = vrcp.f32 %v6120_v32 }
 0x37e   : > { %8701 = vpow2.f32 %v5997_v31  ;;  %v1705_v31 = vrot.slane %v1215_v19, %v9584_v56 }
 0x37f   : > { %v6836_v46 = vcombine.low %v6828_v42, %v6835_v43  ;;  %8703 = vpow2.f32 %v5995_v33 }
 0x380   : > { %8705 = vpow2.f32 %v5999_v37  ;;  %v5260_v15 = vpop.f32.mrb[72].mxu1  ;;  %v5301_v21 = vpop.f32.mrb[76].mxu0 }
 0x381   : > { %7068 = vst [vmem:[%s9763_s30 + $0x38] sm:$0xff] %v6836_v46  ;;  %v8692_v25 = vpop.eup %8691  ;;  %v5261_v26 = vadd.f32 %v5260_v15, %v1685_v47  ;;  %v5302_v62 = vadd.f32 %v5301_v21, %v1693_v2  ;;  %v5262_v30 = vpop.f32.mrb[73].mxu1  ;;  %v10188_v46 = vld [vmem:[%s9575_s28 + $0x50] sm:$0xff] }
 0x382   : > { %v5303_v8 = vpop.f32.mrb[77].mxu0  ;;  %v6121_v20 = vadd.f32 1.0, %v8692_v25  ;;  %v5263_v39 = vadd.f32 %v5262_v30, %v1689_v50  ;;  %v5264_v55 = vpop.f32.mrb[74].mxu1 }
 0x383   : > { %v5304_v48 = vadd.f32 %v5303_v8, %v1697_v12  ;;  %v5305_v58 = vpop.f32.mrb[78].mxu0  ;;  %v5831_v0 = vsub.f32 0.0, %v5261_v26  ;;  %v5833_v1 = vsub.f32 0.0, %v5302_v62  ;;  %v5265_v34 = vpop.f32.mrb[75].mxu1  ;;  %v874_v55 = vunpack.c.l.bf16 %v10188_v46 }
 0x384   : > { %v8694_v53 = vpop.eup %8693  ;;  %v5306_v40 = vpop.f32.mrb[79].mxu0  ;;  %v5832_v5 = vsub.f32 0.0, %v5263_v39  ;;  %8707 = vrcp.f32 %v6121_v20 }
 0x385   : > { %v8696_v63 = vpop.eup %8695  ;;  %v6001_v35 = vmul.f32 1.442695, %v5831_v0  ;;  %v6005_v7 = vmul.f32 1.442695, %v5833_v1  ;;  %v5834_v9 = vsub.f32 0.0, %v5304_v48 }
 0x386   : > { %v8698_v3 = vpop.eup %8697  ;;  %v6003_v29 = vmul.f32 1.442695, %v5832_v5 }
 0x387   : > { %v8700_v51 = vpop.eup %8699  ;;  %v7706_v6 = vpack.c.bf16 %v8698_v3, %v8694_v53  ;;  %8709 = vpow2.f32 %v6001_v35  ;;  %v6007_v17 = vmul.f32 1.442695, %v5834_v9  ;;  %v1227_v9 = vrot.slane %v874_v55, %v9584_v56 }
 0x388   : > { %v8702_v28 = vpop.eup %8701  ;;  %v7707_v36 = vpack.c.bf16 %v8700_v51, %v8696_v63  ;;  %8711 = vpow2.f32 %v6005_v7 }
 0x389   : > { %v8704_v45 = vpop.eup %8703  ;;  %v10172_v10 = vrot.slane %v7706_v6, %v9683_v4  ;;  %v6123_v11 = vadd.f32 1.0, %v8702_v28  ;;  %v1235_v28 = vrot.slane %v874_v55, %v9587_v57 }
 0x38a   : > { %v8706_v49 = vpop.eup %8705  ;;  %v10176_v54 = vrot.slane %v7707_v36, %v9683_v4  ;;  %v6122_v14 = vadd.f32 1.0, %v8704_v45  ;;  %v1231_v45 = vrot.slane %v874_v55, %v9592_v60 }
 0x38b   : > { %8713 = vrcp.f32 %v6123_v11  ;;  %v6124_v16 = vadd.f32 1.0, %v8706_v49  ;;  %v1717_v49 = vrot.slane %v1227_v9, %v9584_v56 }
 0x38c   : > { %v6869_v27 = vcombine.low %v10172_v10, %v10176_v54  ;;  %8715 = vrcp.f32 %v6122_v14  ;;  %v1239_v10 = vrot.slane %v874_v55, %v9595_v61  ;;  %v1725_v54 = vrot.slane %v1235_v28, %v9584_v56 }
 0x38d   : > { %8717 = vrcp.f32 %v6124_v16 }
 0x38e   : > { %8719 = vpow2.f32 %v6003_v29  ;;  %v8708_v59 = vpop.eup %8707  ;;  %v6877_v11 = vrot.slane %v6869_v27, %v9683_v4  ;;  %v1721_v29 = vrot.slane %v1231_v45, %v9584_v56  ;;  %v1729_v16 = vrot.slane %v1239_v10, %v9584_v56 }
 0x38f   : > { %8721 = vpow2.f32 %v6007_v17 }
 0x390   : > { %v5342_v32 = vpop.f32.mrb[76].mxu1  ;;  %v5383_v33 = vpop.f32.mrb[80].mxu0 }
 0x391   : > { %v8710_v37 = vpop.eup %8709  ;;  %v5343_v38 = vadd.f32 %v5342_v32, %v1701_v23  ;;  %v5384_v41 = vadd.f32 %v5383_v33, %v1709_v24  ;;  %v5344_v42 = vpop.f32.mrb[77].mxu1 }
 0x392   : > { %v5385_v43 = vpop.f32.mrb[81].mxu0  ;;  %v8712_v47 = vpop.eup %8711  ;;  %v6125_v2 = vadd.f32 1.0, %v8710_v37  ;;  %v5345_v50 = vadd.f32 %v5344_v42, %v1705_v31 }
 0x393   : > { %v5386_v12 = vadd.f32 %v5385_v43, %v1713_v52  ;;  %v5346_v15 = vpop.f32.mrb[78].mxu1  ;;  %v5387_v21 = vpop.f32.mrb[82].mxu0  ;;  %v6127_v26 = vadd.f32 1.0, %v8712_v47  ;;  %v5835_v62 = vsub.f32 0.0, %v5343_v38  ;;  %v5837_v30 = vsub.f32 0.0, %v5384_v41 }
 0x394   : > { %v5347_v8 = vpop.f32.mrb[79].mxu1  ;;  %v5388_v53 = vpop.f32.mrb[83].mxu0  ;;  %v5836_v39 = vsub.f32 0.0, %v5345_v50  ;;  %8723 = vrcp.f32 %v6125_v2 }
 0x395   : > { %v8714_v25 = vpop.eup %8713  ;;  %v5838_v48 = vsub.f32 0.0, %v5386_v12  ;;  %v6009_v0 = vmul.f32 1.442695, %v5835_v62  ;;  %v6013_v1 = vmul.f32 1.442695, %v5837_v30  ;;  %8725 = vrcp.f32 %v6127_v26 }
 0x396   : > { %v8716_v20 = vpop.eup %8715  ;;  %v6011_v51 = vmul.f32 1.442695, %v5836_v39  ;;  %v875_v53 = vunpack.c.h.bf16 %v10188_v46 }
 0x397   : > { %v8718_v58 = vpop.eup %8717  ;;  %v7708_v63 = vpack.c.bf16 %v8716_v20, %v8708_v59  ;;  %8727 = vpow2.f32 %v6009_v0  ;;  %v6015_v7 = vmul.f32 1.442695, %v5838_v48 }
 0x398   : > { %v8720_v34 = vpop.eup %8719  ;;  %v7709_v40 = vpack.c.bf16 %v8718_v58, %v8714_v25  ;;  %8729 = vpow2.f32 %v6013_v1  ;;  %v1243_v46 = vrot.slane %v875_v53, %v9584_v56 }
 0x399   : > { %v8722_v44 = vpop.eup %8721  ;;  %v6861_v3 = vrot.slane %v7708_v63, %v9683_v4  ;;  %v6126_v5 = vadd.f32 1.0, %v8720_v34 }
 0x39a   : > { %v6868_v6 = vrot.slane %v7709_v40, %v9683_v4  ;;  %v6128_v35 = vadd.f32 1.0, %v8722_v44  ;;  %v1251_v40 = vrot.slane %v875_v53, %v9587_v57  ;;  %v1247_v44 = vrot.slane %v875_v53, %v9592_v60 }
 0x39b   : > { %8731 = vrcp.f32 %v6126_v5  ;;  %v1733_v5 = vrot.slane %v1243_v46, %v9584_v56 }
 0x39c   : > { %v6870_v36 = vcombine.low %v6861_v3, %v6868_v6  ;;  %8733 = vrcp.f32 %v6128_v35  ;;  %v1255_v3 = vrot.slane %v875_v53, %v9595_v61  ;;  %v1737_v6 = vrot.slane %v1247_v44, %v9584_v56 }
 0x39d   : > { %8735 = vpow2.f32 %v6011_v51  ;;  %v1741_v51 = vrot.slane %v1251_v40, %v9584_v56 }
 0x39e   : > { %v6884_v13 = vrot.slane %v6870_v36, %v9683_v4  ;;  %8737 = vpow2.f32 %v6015_v7  ;;  %v8724_v17 = vpop.eup %8723  ;;  %v1745_v35 = vrot.slane %v1255_v3, %v9584_v56 }
 0x39f   : > { %v8726_v18 = vpop.eup %8725 }
 0x3a0   : > { %v6885_v14 = vcombine.low %v6877_v11, %v6884_v13  ;;  %v5424_v19 = vpop.f32.mrb[80].mxu1  ;;  %v5465_v22 = vpop.f32.mrb[84].mxu0 }
 0x3a1   : > { %v8728_v23 = vpop.eup %8727  ;;  %v5425_v24 = vadd.f32 %v5424_v19, %v1717_v49  ;;  %v5466_v27 = vadd.f32 %v5465_v22, %v1725_v54  ;;  %v5426_v31 = vpop.f32.mrb[81].mxu1  ;;  %v10222_v54 = vld [vmem:[%s9575_s28 + $0x58] sm:$0xff] }
 0x3a2   : > { %7069 = vst [vmem:[%s9763_s30 + $0x40] sm:$0xff] %v6885_v14  ;;  %v5467_v52 = vpop.f32.mrb[85].mxu0  ;;  %v8730_v59 = vpop.eup %8729  ;;  %v6129_v32 = vadd.f32 1.0, %v8728_v23  ;;  %v5427_v33 = vadd.f32 %v5426_v31, %v1721_v29 }
 0x3a3   : > { %v5468_v37 = vadd.f32 %v5467_v52, %v1729_v16  ;;  %v5428_v38 = vpop.f32.mrb[82].mxu1  ;;  %v5469_v41 = vpop.f32.mrb[86].mxu0  ;;  %v6131_v43 = vadd.f32 1.0, %v8730_v59  ;;  %v5839_v47 = vsub.f32 0.0, %v5425_v24  ;;  %v5841_v2 = vsub.f32 0.0, %v5466_v27 }
 0x3a4   : > { %v5429_v50 = vpop.f32.mrb[83].mxu1  ;;  %v5470_v12 = vpop.f32.mrb[87].mxu0  ;;  %v5840_v25 = vsub.f32 0.0, %v5427_v33  ;;  %8739 = vrcp.f32 %v6129_v32 }
 0x3a5   : > { %v8732_v42 = vpop.eup %8731  ;;  %v5842_v26 = vsub.f32 0.0, %v5468_v37  ;;  %v6017_v8 = vmul.f32 1.442695, %v5839_v47  ;;  %8741 = vrcp.f32 %v6131_v43  ;;  %v6021_v55 = vmul.f32 1.442695, %v5841_v2 }
 0x3a6   : > { %v8734_v15 = vpop.eup %8733  ;;  %v7710_v21 = vpack.c.bf16 %v8732_v42, %v8724_v17  ;;  %v6019_v0 = vmul.f32 1.442695, %v5840_v25  ;;  %v876_v37 = vunpack.c.l.bf16 %v10222_v54 }
 0x3a7   : > { %v8736_v62 = vpop.eup %8735  ;;  %v7711_v30 = vpack.c.bf16 %v8734_v15, %v8726_v18  ;;  %8743 = vpow2.f32 %v6017_v8  ;;  %v6023_v1 = vmul.f32 1.442695, %v5842_v26 }
 0x3a8   : > { %v8738_v20 = vpop.eup %8737  ;;  %v10206_v39 = vrot.slane %v7710_v21, %v9683_v4  ;;  %v6130_v48 = vadd.f32 1.0, %v8736_v62  ;;  %v1259_v62 = vrot.slane %v876_v37, %v9584_v56  ;;  %v1267_v8 = vrot.slane %v876_v37, %v9587_v57 }
 0x3a9   : > { %v10209_v58 = vrot.slane %v7711_v30, %v9683_v4  ;;  %v6132_v63 = vadd.f32 1.0, %v8738_v20  ;;  %v1263_v53 = vrot.slane %v876_v37, %v9592_v60 }
 0x3aa   : > { %8745 = vrcp.f32 %v6130_v48  ;;  %v1271_v48 = vrot.slane %v876_v37, %v9595_v61 }
 0x3ab   : > { %v6918_v34 = vcombine.low %v10206_v39, %v10209_v58  ;;  %8747 = vrcp.f32 %v6132_v63  ;;  %v1749_v58 = vrot.slane %v1259_v62, %v9584_v56  ;;  %v1757_v63 = vrot.slane %v1267_v8, %v9584_v56 }
 0x3ac   : > { %8749 = vpow2.f32 %v6021_v55 }
 0x3ad   : > { %8751 = vpow2.f32 %v6019_v0  ;;  %v6926_v20 = vrot.slane %v6918_v34, %v9683_v4  ;;  %v1753_v0 = vrot.slane %v1263_v53, %v9584_v56 }
 0x3ae   : > { %8753 = vpow2.f32 %v6023_v1  ;;  %v8740_v7 = vpop.eup %8739  ;;  %v1761_v1 = vrot.slane %v1271_v48, %v9584_v56 }
 0x3af   : > { %v8742_v9 = vpop.eup %8741 }
 0x3b0   : > { %v5506_v28 = vpop.f32.mrb[84].mxu1  ;;  %v5547_v36 = vpop.f32.mrb[88].mxu0 }
 0x3b1   : > { %v8744_v45 = vpop.eup %8743  ;;  %v5507_v10 = vadd.f32 %v5506_v28, %v1733_v5  ;;  %v5548_v11 = vadd.f32 %v5547_v36, %v1741_v51  ;;  %v5508_v13 = vpop.f32.mrb[85].mxu1 }
 0x3b2   : > { %v5549_v49 = vpop.f32.mrb[89].mxu0  ;;  %v6133_v29 = vadd.f32 1.0, %v8744_v45  ;;  %v5509_v16 = vadd.f32 %v5508_v13, %v1737_v6  ;;  %v5510_v18 = vpop.f32.mrb[86].mxu1 }
 0x3b3   : > { %v5550_v17 = vadd.f32 %v5549_v49, %v1745_v35  ;;  %v5551_v19 = vpop.f32.mrb[90].mxu0  ;;  %v5843_v24 = vsub.f32 0.0, %v5507_v10  ;;  %v5845_v27 = vsub.f32 0.0, %v5548_v11  ;;  %v5511_v31 = vpop.f32.mrb[87].mxu1 }
 0x3b4   : > { %v8746_v14 = vpop.eup %8745  ;;  %v5552_v52 = vpop.f32.mrb[91].mxu0  ;;  %v5844_v33 = vsub.f32 0.0, %v5509_v16  ;;  %8755 = vrcp.f32 %v6133_v29 }
 0x3b5   : > { %v8748_v22 = vpop.eup %8747  ;;  %v7712_v23 = vpack.c.bf16 %v8746_v14, %v8740_v7  ;;  %v5846_v43 = vsub.f32 0.0, %v5550_v17  ;;  %v6025_v12 = vmul.f32 1.442695, %v5843_v24  ;;  %v6029_v21 = vmul.f32 1.442695, %v5845_v27 }
 0x3b6   : > { %v8750_v59 = vpop.eup %8749  ;;  %v7713_v32 = vpack.c.bf16 %v8748_v22, %v8742_v9  ;;  %v6027_v26 = vmul.f32 1.442695, %v5844_v33 }
 0x3b7   : > { %v8752_v38 = vpop.eup %8751  ;;  %v6910_v41 = vrot.slane %v7712_v23, %v9683_v4  ;;  %v6135_v42 = vadd.f32 1.0, %v8750_v59  ;;  %v6031_v30 = vmul.f32 1.442695, %v5846_v43  ;;  %v877_v23 = vunpack.c.h.bf16 %v10222_v54 }
 0x3b8   : > { %v8754_v47 = vpop.eup %8753  ;;  %v6917_v2 = vrot.slane %v7713_v32, %v9683_v4  ;;  %v6134_v50 = vadd.f32 1.0, %v8752_v38 }
 0x3b9   : > { %8757 = vrcp.f32 %v6135_v42  ;;  %v6136_v15 = vadd.f32 1.0, %v8754_v47  ;;  %v1275_v54 = vrot.slane %v877_v23, %v9584_v56  ;;  %v1283_v43 = vrot.slane %v877_v23, %v9587_v57 }
 0x3ba   : > { %v6919_v25 = vcombine.low %v6910_v41, %v6917_v2  ;;  %8759 = vrcp.f32 %v6134_v50  ;;  %v1279_v2 = vrot.slane %v877_v23, %v9592_v60  ;;  %v1287_v50 = vrot.slane %v877_v23, %v9595_v61 }
 0x3bb   : > { %8761 = vrcp.f32 %v6136_v15  ;;  %v1773_v15 = vrot.slane %v1283_v43, %v9584_v56 }
 0x3bc   : > { %v6933_v39 = vrot.slane %v6919_v25, %v9683_v4  ;;  %8763 = vpow2.f32 %v6025_v12  ;;  %v1765_v12 = vrot.slane %v1275_v54, %v9584_v56  ;;  %v1777_v25 = vrot.slane %v1287_v50, %v9584_v56 }
 0x3bd   : > { %8765 = vpow2.f32 %v6029_v21  ;;  %v1769_v21 = vrot.slane %v1279_v2, %v9584_v56 }
 0x3be   : > { %v6934_v55 = vcombine.low %v6926_v20, %v6933_v39  ;;  %8767 = vpow2.f32 %v6027_v26  ;;  %v8756_v46 = vpop.eup %8755  ;;  %v853_v20 = vld [vmem:[%s9575_s28 + $0x60] sm:$0x3] }
 0x3bf   : > { %8769 = vpow2.f32 %v6031_v30 }
 0x3c0   : > { %7070 = vst [vmem:[%s9763_s30 + $0x48] sm:$0xff] %v6934_v55  ;;  %v5588_v34 = vpop.f32.mrb[88].mxu1  ;;  %v5629_v40 = vpop.f32.mrb[92].mxu0 }
 0x3c1   : > { %v5589_v3 = vadd.f32 %v5588_v34, %v1749_v58  ;;  %v5630_v5 = vadd.f32 %v5629_v40, %v1757_v63  ;;  %v5590_v51 = vpop.f32.mrb[89].mxu1  ;;  %v5631_v6 = vpop.f32.mrb[93].mxu0 }
 0x3c2   : > { %v5591_v7 = vadd.f32 %v5590_v51, %v1753_v0  ;;  %v5632_v9 = vadd.f32 %v5631_v6, %v1761_v1  ;;  %v5592_v28 = vpop.f32.mrb[90].mxu1  ;;  %v5633_v36 = vpop.f32.mrb[94].mxu0 }
 0x3c3   : > { %v8758_v44 = vpop.eup %8757  ;;  %v5847_v11 = vsub.f32 0.0, %v5589_v3  ;;  %v5593_v13 = vpop.f32.mrb[91].mxu1  ;;  %v5849_v16 = vsub.f32 0.0, %v5630_v5  ;;  %v878_v5 = vunpack.c.l.bf16 %v853_v20 }
 0x3c4   : > { %v8760_v35 = vpop.eup %8759  ;;  %v5634_v49 = vpop.f32.mrb[95].mxu0  ;;  %v5848_v22 = vsub.f32 0.0, %v5591_v7  ;;  %v5850_v52 = vsub.f32 0.0, %v5632_v9 }
 0x3c5   : > { %v8762_v45 = vpop.eup %8761  ;;  %v7714_v10 = vpack.c.bf16 %v8760_v35, %v8756_v46  ;;  %v6033_v33 = vmul.f32 1.442695, %v5847_v11  ;;  %v6037_v41 = vmul.f32 1.442695, %v5849_v16  ;;  %v1291_v16 = vrot.slane %v878_v5, %v9584_v56 }
 0x3c6   : > { %v8764_v14 = vpop.eup %8763  ;;  %v7715_v29 = vpack.c.bf16 %v8762_v45, %v8758_v44  ;;  %v6035_v42 = vmul.f32 1.442695, %v5848_v22  ;;  %v6039_v47 = vmul.f32 1.442695, %v5850_v52 }
 0x3c7   : > { %v8766_v17 = vpop.eup %8765  ;;  %v10239_v18 = vrot.slane %v7714_v10, %v9683_v4  ;;  %v6137_v19 = vadd.f32 1.0, %v8764_v14 }
 0x3c8   : > { %v8768_v24 = vpop.eup %8767  ;;  %v10243_v27 = vrot.slane %v7715_v29, %v9683_v4  ;;  %v6139_v31 = vadd.f32 1.0, %v8766_v17 }
 0x3c9   : > { %v8770_v59 = vpop.eup %8769  ;;  %8771 = vrcp.f32 %v6137_v19  ;;  %v6138_v32 = vadd.f32 1.0, %v8768_v24  ;;  %v1295_v24 = vrot.slane %v878_v5, %v9592_v60 }
 0x3ca   : > { %v6967_v37 = vcombine.low %v10239_v18, %v10243_v27  ;;  %8773 = vrcp.f32 %v6139_v31  ;;  %v6140_v38 = vadd.f32 1.0, %v8770_v59 }
 0x3cb   : > { %8775 = vrcp.f32 %v6138_v32  ;;  %v1781_v32 = vrot.slane %v1291_v16, %v9584_v56 }
 0x3cc   : > { %8777 = vrcp.f32 %v6140_v38  ;;  %v6975_v31 = vrot.slane %v6967_v37, %v9683_v4 }
 0x3cd   : > { %8779 = vpow2.f32 %v6033_v33  ;;  %v1785_v33 = vrot.slane %v1295_v24, %v9584_v56 }
 0x3ce   : > { %8781 = vpow2.f32 %v6037_v41 }
 0x3cf   : > { %8783 = vpow2.f32 %v6035_v42 }
 0x3d0   : > { %8785 = vpow2.f32 %v6039_v47  ;;  %v5670_v57 = vpop.f32.mrb[92].mxu1  ;;  %v5711_v26 = vpop.f32.mrb[96].mxu0 }
 0x3d1   : > { %v5671_v30 = vadd.f32 %v5670_v57, %v1765_v12  ;;  %v5712_v8 = vadd.f32 %v5711_v26, %v1773_v15  ;;  %v5672_v53 = vpop.f32.mrb[93].mxu1  ;;  %v5713_v61 = vpop.f32.mrb[97].mxu0 }
 0x3d2   : > { %v5673_v48 = vadd.f32 %v5672_v53, %v1769_v21  ;;  %v5714_v55 = vadd.f32 %v5713_v61, %v1777_v25  ;;  %v5674_v58 = vpop.f32.mrb[94].mxu1  ;;  %v5715_v63 = vpop.f32.mrb[98].mxu0 }
 0x3d3   : > { %v8772_v62 = vpop.eup %8771  ;;  %v5851_v1 = vsub.f32 0.0, %v5671_v30  ;;  %v5675_v46 = vpop.f32.mrb[95].mxu1  ;;  %v5853_v3 = vsub.f32 0.0, %v5712_v8 }
 0x3d4   : > { %v8774_v39 = vpop.eup %8773  ;;  %v5716_v34 = vpop.f32.mrb[99].mxu0  ;;  %v5852_v7 = vsub.f32 0.0, %v5673_v48  ;;  %v5854_v45 = vsub.f32 0.0, %v5714_v55 }
 0x3d5   : > { %v8776_v0 = vpop.eup %8775  ;;  %v6041_v35 = vmul.f32 1.442695, %v5851_v1  ;;  %v6045_v29 = vmul.f32 1.442695, %v5853_v3 }
 0x3d6   : > { %v8778_v40 = vpop.eup %8777  ;;  %v7716_v44 = vpack.c.bf16 %v8776_v0, %v8772_v62  ;;  %v6043_v22 = vmul.f32 1.442695, %v5852_v7  ;;  %v6047_v23 = vmul.f32 1.442695, %v5854_v45 }
 0x3d7   : > { %v8780_v51 = vpop.eup %8779  ;;  %v7717_v6 = vpack.c.bf16 %v8778_v40, %v8774_v39  ;;  %8787 = vpow2.f32 %v6041_v35 }
 0x3d8   : > { %v8782_v9 = vpop.eup %8781  ;;  %v6959_v28 = vrot.slane %v7716_v44, %v9683_v4  ;;  %v6141_v36 = vadd.f32 1.0, %v8780_v51 }
 0x3d9   : > { %v8784_v10 = vpop.eup %8783  ;;  %v6966_v11 = vrot.slane %v7717_v6, %v9683_v4  ;;  %v6143_v13 = vadd.f32 1.0, %v8782_v9 }
 0x3da   : > { %v8786_v49 = vpop.eup %8785  ;;  %8789 = vrcp.f32 %v6141_v36  ;;  %v6142_v14 = vadd.f32 1.0, %v8784_v10 }
 0x3db   : > { %v6968_v17 = vcombine.low %v6959_v28, %v6966_v11  ;;  %8791 = vrcp.f32 %v6143_v13  ;;  %v6144_v19 = vadd.f32 1.0, %v8786_v49 }
 0x3dc   : > { %8793 = vrcp.f32 %v6142_v14 }
 0x3dd   : > { %v6982_v52 = vrot.slane %v6968_v17, %v9683_v4  ;;  %8795 = vrcp.f32 %v6144_v19 }
 0x3de   : > { %8797 = vpow2.f32 %v6045_v29 }
 0x3df   : > { %v6983_v59 = vcombine.low %v6975_v31, %v6982_v52  ;;  %8799 = vpow2.f32 %v6043_v22 }
 0x3e0   : > { %8801 = vpow2.f32 %v6047_v23  ;;  %v5752_v38 = vpop.f32.mrb[96].mxu1 }
 0x3e1   : > { %7071 = vst [vmem:[%s9763_s30 + $0x50] sm:$0xff] %v6983_v59  ;;  %v8788_v41 = vpop.eup %8787  ;;  %v5753_v60 = vadd.f32 %v5752_v38, %v1781_v32  ;;  %v5754_v42 = vpop.f32.mrb[97].mxu1 }
 0x3e2   : > { %v6145_v43 = vadd.f32 1.0, %v8788_v41  ;;  %v5755_v18 = vadd.f32 %v5754_v42, %v1785_v33  ;;  %v5756_v27 = vpop.f32.mrb[98].mxu1 }
 0x3e3   : > { %v5855_v47 = vsub.f32 0.0, %v5753_v60  ;;  %v5757_v2 = vpop.f32.mrb[99].mxu1 }
 0x3e4   : > { %v8790_v54 = vpop.eup %8789  ;;  %v5856_v12 = vsub.f32 0.0, %v5755_v18  ;;  %8803 = vrcp.f32 %v6145_v43 }
 0x3e5   : > { %v8792_v37 = vpop.eup %8791  ;;  %v6049_v25 = vmul.f32 1.442695, %v5855_v47 }
 0x3e6   : > { %v8794_v50 = vpop.eup %8793  ;;  %v6051_v56 = vmul.f32 1.442695, %v5856_v12 }
 0x3e7   : > { %v8796_v15 = vpop.eup %8795  ;;  %v7718_v21 = vpack.c.bf16 %v8794_v50, %v8790_v54  ;;  %8805 = vpow2.f32 %v6049_v25 }
 0x3e8   : > { %v8798_v57 = vpop.eup %8797  ;;  %v7719_v26 = vpack.c.bf16 %v8796_v15, %v8792_v37  ;;  %8807 = vpow2.f32 %v6051_v56 }
 0x3e9   : > { %v8800_v62 = vpop.eup %8799  ;;  %v6994_v30 = vrot.slane %v7718_v21, %v9683_v4  ;;  %v6147_v8 = vadd.f32 1.0, %v8798_v57 }
 0x3ea   : > { %v8802_v53 = vpop.eup %8801  ;;  %v7001_v61 = vrot.slane %v7719_v26, %v9683_v4  ;;  %v6146_v20 = vadd.f32 1.0, %v8800_v62 }
 0x3eb   : > { %8809 = vrcp.f32 %v6147_v8  ;;  %v6148_v39 = vadd.f32 1.0, %v8802_v53 }
 0x3ec   : > { %v7016_v48 = vcombine.low %v6994_v30, %v7001_v61  ;;  %8811 = vrcp.f32 %v6146_v20 }
 0x3ed   : > { %8813 = vrcp.f32 %v6148_v39 }
 0x3ee   : > { %v8804_v55 = vpop.eup %8803  ;;  %v7024_v35 = vrot.slane %v7016_v48, %v9683_v4 }
 0x3f1   : > { %v8806_v58 = vpop.eup %8805 }
 0x3f2   : > { %v8808_v63 = vpop.eup %8807  ;;  %v6149_v0 = vadd.f32 1.0, %v8806_v58 }
 0x3f3   : > { %v6150_v46 = vadd.f32 1.0, %v8808_v63 }
 0x3f4   : > { %8815 = vrcp.f32 %v6149_v0 }
 0x3f5   : > { %v8810_v1 = vpop.eup %8809  ;;  %8817 = vrcp.f32 %v6150_v46 }
 0x3f6   : > { %v8812_v34 = vpop.eup %8811 }
 0x3f7   : > { %v8814_v40 = vpop.eup %8813  ;;  %v7720_v44 = vpack.c.bf16 %v8812_v34, %v8804_v55 }
 0x3f8   : > { %v7721_v3 = vpack.c.bf16 %v8814_v40, %v8810_v1 }
 0x3f9   : > { %v7008_v5 = vrot.slane %v7720_v44, %v9683_v4 }
 0x3fa   : > { %v7015_v51 = vrot.slane %v7721_v3, %v9683_v4 }
 0x3fc   : > { %v7017_v6 = vcombine.low %v7008_v5, %v7015_v51 }
 0x3fe   : > { %v7031_v7 = vrot.slane %v7017_v6, %v9683_v4  ;;  %v8816_v9 = vpop.eup %8815 }
 0x3ff   : > { %v8818_v36 = vpop.eup %8817 }
 0x400   : > { %v7032_v28 = vcombine.low %v7024_v35, %v7031_v7  ;;  %v7722_v45 = vpack.c.bf16 %v8818_v36, %v8816_v9 }
 0x402   : > { %7072 = vst [vmem:[%s9763_s30 + $0x58] sm:$0xff] %v7032_v28  ;;  %v7040_v10 = vrot.slane %v7722_v45, %v9683_v4 }
 0x404   : > { %7723 = vst.sshfl [vmem:[%s9763_s30 + $0x60] sm:$0x5 pattern:$0x73625140] %v7040_v10 }
 0x405 PF: > { %s10333_s24 = sld [smem:[#allocation13_spill]]  ;;  %s10334_s16 = sld [smem:[#allocation14_spill]] }
 0x406   : > { %s10335_s21 = smov %s8997_s22  ;;  %s10336_s22 = smov %s9001_s23 }
 0x40b   : > { %p19_p4 = scmp.ge.s32.totalorder %s10333_s24, 6   ;;  %s10337_s23 = smov %s10334_s16 }
 0x40d   :  { %21 = sbr.rel (!%p19_p4) target bundleno = 8 (0x8), region = 116 }
 0x414   :  { %7108 = vsyncpa [#allocation3], 1 }
 0x415   :  { %7110 = vsyncpa [#allocation3 + $0x1], 1 }
 0x416   :  { %7111 = vsyncpa [#allocation5], 1 }
 0x417   :  { %7112 = vsyncpa [#allocation8], 1 }
 0x418   :  { %7114 = vsyncpa [#allocation8 + $0x1], 1 }

</bundles_post_ra>
